<compile_context>
chip_gen: v7x
topology: tpu7x:2x2x1
jax: 0.10.0
libtpu: 0.0.40
codegen_flags: <defaults>
</compile_context>

<pallas_src>
import functools
import math

import jax
import jax.numpy as jnp
from jax.experimental import pallas as pl
from jax.experimental.pallas import tpu as pltpu


_WEIGHT_ORDER = (
    "ln1_g", "ln1_b", "ln2_g", "ln2_b", "ln3_g", "ln3_b",
    "a1_wqkv", "a1_bqkv", "a1_wo", "a1_bo",
    "a2_wq", "a2_bq", "a2_wkv", "a2_bkv", "a2_wo", "a2_bo",
    "f1_w", "f1_b", "f2_w", "f2_b",
)


# ---------------- shared math (used by the kernel and by the mixed-precision
# ---------------- reference; `w` maps names to Refs *or* plain arrays) -------

def _layernorm(x, g, b, eps=1e-5):
    mu = jnp.mean(x, axis=-1, keepdims=True)
    var = jnp.mean(jnp.square(x - mu), axis=-1, keepdims=True)
    return (x - mu) * jax.lax.rsqrt(var + eps) * g + b


def _mm_bf16(x, w_bf16):
    """MXU matmul: bf16 operands, f32 accumulation."""
    return jnp.dot(x.astype(jnp.bfloat16), w_bf16,
                   preferred_element_type=jnp.float32)


def _decoder_block(x, enc, w, n_heads, batch, *, approx_reciprocal):
    """x: (B*S, D) f32 slab, enc: (B*Se, D) f32 slab (batch-major rows).

    Weights are contraction-major bf16 matrices; biases / LN params are f32.
    The 1/sqrt(head_dim) scale is already folded into the Q projections."""
    D = x.shape[-1]
    B = batch
    S = x.shape[0] // B
    Se = enc.shape[0] // B
    H = n_heads
    hd = D // H
    bf16 = jnp.bfloat16

    def recip(d):
        if approx_reciprocal:
            return pl.reciprocal(d, approx=True)      # EUP; frees VALU slots
        return 1.0 / d

    def split_heads(t, seq):
        # (B*seq, H*hd) -> (H*B, seq, hd). Head slices are lane-aligned when
        # hd is a multiple of 128 (test config); the leading-dim reshape is a
        # contiguous re-tiling (seq multiple of 8).
        parts = [t[:, h * hd:(h + 1) * hd] for h in range(H)]
        return jnp.stack(parts, axis=0).reshape(H * B, seq, hd)

    def merge_heads(t, seq):
        # (H*B, seq, hd) -> (B*seq, H*hd) via a lane concat (no transpose).
        t = t.reshape(H, B * seq, hd)
        return jnp.concatenate([t[h] for h in range(H)], axis=-1)

    def attend(q, k, v, sq, sk, wo, bo):
        # Heads batched into the einsum batch dim: one batched score matmul,
        # one batched softmax, one batched PV matmul, then a single fused
        # (K=D) output projection.
        qh = split_heads(q, sq).astype(bf16)
        kh = split_heads(k, sk).astype(bf16)
        vh = split_heads(v, sk).astype(bf16)
        s = jnp.einsum("bqd,bkd->bqk", qh, kh,
                       preferred_element_type=jnp.float32)
        s = s - jnp.max(s, axis=-1, keepdims=True)
        e = jnp.exp(s)
        p = e * recip(jnp.sum(e, axis=-1, keepdims=True))
        o = jnp.einsum("bqk,bkd->bqd", p.astype(bf16), vh,
                       preferred_element_type=jnp.float32)
        o = merge_heads(o, sq)                        # (B*sq, D)
        return _mm_bf16(o, wo[...]) + bo[...]         # fused out-projection

    # --- self-attention: fused QKV projection, one (B*S,D)x(D,3D) matmul ---
    a = _layernorm(x, w["ln1_g"][...], w["ln1_b"][...])
    qkv = _mm_bf16(a, w["a1_wqkv"][...]) + w["a1_bqkv"][...]
    a = attend(qkv[:, :D], qkv[:, D:2 * D], qkv[:, 2 * D:], S, S,
               w["a1_wo"], w["a1_bo"])

    # --- cross-attention: Q from decoder stream, fused K/V from encoder ---
    x = _layernorm(a + x, w["ln2_g"][...], w["ln2_b"][...])
    q = _mm_bf16(x, w["a2_wq"][...]) + w["a2_bq"][...]
    kv = _mm_bf16(enc, w["a2_wkv"][...]) + w["a2_bkv"][...]
    a = attend(q, kv[:, :D], kv[:, D:], S, Se, w["a2_wo"], w["a2_bo"])

    # --- FFN ---
    x = _layernorm(a + x, w["ln3_g"][...], w["ln3_b"][...])
    h = jnp.maximum(_mm_bf16(x, w["f1_w"][...]) + w["f1_b"][...], 0.0)
    y = _mm_bf16(h, w["f2_w"][...]) + w["f2_b"][...]
    return x + y


# ---------------- Pallas kernel ---------------------------------------------

def _decoder_kernel(n_heads, batch, x_ref, enc_ref, *rest):
    *w_refs, out_ref = rest
    w = dict(zip(_WEIGHT_ORDER, w_refs))
    out = _decoder_block(x_ref[...], enc_ref[...], w, n_heads, batch,
                         approx_reciprocal=True)
    out_ref[...] = out.astype(out_ref.dtype)


# ---------------- wrapper ----------------------------------------------------

def _kernel_params(p, D, n_heads):
    """Host-side weight re-layout: pre-transpose to contraction-major, cast the
    matmul weights to bf16, split the cross-attention in_proj into Wq/Wkv, and
    fold the 1/sqrt(head_dim) softmax scale into the Q projections."""
    bf16, f32 = jnp.bfloat16, jnp.float32
    scale = 1.0 / math.sqrt(D // n_heads)
    a1_w = jnp.concatenate([p["a1_inw"][:D] * scale, p["a1_inw"][D:]], axis=0)
    a1_b = jnp.concatenate([p["a1_inb"][:, :D] * scale, p["a1_inb"][:, D:]],
                           axis=1)
    return {
        "ln1_g": p["ln1_g"].astype(f32), "ln1_b": p["ln1_b"].astype(f32),
        "ln2_g": p["ln2_g"].astype(f32), "ln2_b": p["ln2_b"].astype(f32),
        "ln3_g": p["ln3_g"].astype(f32), "ln3_b": p["ln3_b"].astype(f32),
        "a1_wqkv": a1_w.T.astype(bf16),                     # (D, 3D), Q scaled
        "a1_bqkv": a1_b.astype(f32),                        # (1, 3D)
        "a1_wo": p["a1_ow"].T.astype(bf16),                 # (D, D)
        "a1_bo": p["a1_ob"].astype(f32),                    # (1, D)
        "a2_wq": (p["a2_inw"][:D] * scale).T.astype(bf16),  # (D, D), scaled
        "a2_bq": (p["a2_inb"][:, :D] * scale).astype(f32),  # (1, D)
        "a2_wkv": p["a2_inw"][D:].T.astype(bf16),           # (D, 2D)
        "a2_bkv": p["a2_inb"][:, D:].astype(f32),           # (1, 2D)
        "a2_wo": p["a2_ow"].T.astype(bf16),
        "a2_bo": p["a2_ob"].astype(f32),
        "f1_w": p["f1_w"].T.astype(bf16), "f1_b": p["f1_b"].astype(f32),
        "f2_w": p["f2_w"].T.astype(bf16), "f2_b": p["f2_b"].astype(f32),
    }


def decoder_forward(x, enc, params, n_heads):
    B, S, D = x.shape
    Se = enc.shape[1]
    assert D % n_heads == 0

    kp = _kernel_params(params, D, n_heads)
    weights = [kp[name] for name in _WEIGHT_ORDER]

    # Batch folded into the matmul M dimension: the kernel sees (B*S, D) and
    # (B*Se, D) slabs and runs as a single step (no grid), so there is no
    # per-step pipeline overhead and no double-buffering of the weights.
    x2 = x.reshape(B * S, D)
    enc2 = enc.reshape(B * Se, D)

    vmem = pl.BlockSpec(memory_space=pltpu.MemorySpace.VMEM)

    # VMEM budget: resident weights + activation slabs + generous allowance
    # for in-kernel intermediates, capped at ~72% of this generation's
    # per-core VMEM (v7x: 64 MiB per TensorCore; v5e/v6e: 128 MiB).
    w_bytes = sum(int(w.size) * w.dtype.itemsize for w in weights)
    act_bytes = 4 * (2 * B * S * D + B * Se * D)
    inter_bytes = 4 * (10 * B * S * D + 3 * B * Se * D
                       + 2 * n_heads * B * S * max(S, Se))
    try:
        vmem_cap = int(getattr(pltpu.get_tpu_info(), "vmem_capacity_bytes",
                               64 * 1024 * 1024))
    except Exception:
        vmem_cap = 64 * 1024 * 1024
    vmem_limit = int(min(max(2 * (w_bytes + act_bytes + inter_bytes),
                             32 * 1024 * 1024),
                         int(0.72 * vmem_cap)))

    out2 = pl.pallas_call(
        functools.partial(_decoder_kernel, n_heads, B),
        out_shape=jax.ShapeDtypeStruct((B * S, D), x.dtype),
        in_specs=[vmem, vmem] + [vmem] * len(weights),
        out_specs=vmem,
        compiler_params=pltpu.CompilerParams(vmem_limit_bytes=vmem_limit),
    )(x2, enc2, *weights)
    return out2.reshape(B, S, D)


# ---------------- references (for verification) -----------------------------

def ref_forward_f32(x, enc, p, n_heads):
    """Pure f32 JAX reference mirroring PyTorch Decoder.forward."""
    def mha(q_in, kv_in, in_w, in_b, out_w, out_b):
        D = q_in.shape[-1]
        hd = D // n_heads
        q = q_in @ in_w[:D].T + in_b[0, :D]
        k = kv_in @ in_w[D:2 * D].T + in_b[0, D:2 * D]
        v = kv_in @ in_w[2 * D:].T + in_b[0, 2 * D:]
        split = lambda t: t.reshape(t.shape[0], n_heads, hd).transpose(1, 0, 2)
        s = jnp.einsum("hqd,hkd->hqk", split(q), split(k)) / math.sqrt(hd)
        pr = jax.nn.softmax(s, axis=-1)
        o = jnp.einsum("hqk,hkd->hqd", pr, split(v)).transpose(1, 0, 2)
        return o.reshape(q_in.shape[0], D) @ out_w.T + out_b[0]

    def one(xb, eb):
        a = _layernorm(xb, p["ln1_g"], p["ln1_b"])
        a = mha(a, a, p["a1_inw"], p["a1_inb"], p["a1_ow"], p["a1_ob"])
        xx = _layernorm(a + xb, p["ln2_g"], p["ln2_b"])
        a = mha(xx, eb, p["a2_inw"], p["a2_inb"], p["a2_ow"], p["a2_ob"])
        xx = _layernorm(a + xx, p["ln3_g"], p["ln3_b"])
        h = jnp.maximum(xx @ p["f1_w"].T + p["f1_b"][0], 0.0)
        return xx + (h @ p["f2_w"].T + p["f2_b"][0])

    return jax.vmap(one)(x, enc)


def ref_forward_mixed(x, enc, params, n_heads):
    """Same bf16-matmul / f32-accumulate policy as the kernel (exact softmax
    division), run as plain XLA — isolates the Pallas-specific numerics."""
    B, S, D = x.shape
    Se = enc.shape[1]
    kp = _kernel_params(params, D, n_heads)
    out = _decoder_block(x.reshape(B * S, D), enc.reshape(B * Se, D), kp,
                         n_heads, B, approx_reciprocal=False)
    return out.reshape(B, S, D)


# ---------------- parameter init --------------------------------------------

def init_params(key, dimv):
    D = dimv
    ks = jax.random.split(key, 18)
    n = lambda k, shape, s=0.1: s * jax.random.normal(k, shape, jnp.float32)
    p = {}
    p["ln1_g"] = 1.0 + n(ks[0], (1, D), 0.05); p["ln1_b"] = n(ks[1], (1, D), 0.05)
    p["ln2_g"] = 1.0 + n(ks[2], (1, D), 0.05); p["ln2_b"] = n(ks[3], (1, D), 0.05)
    p["ln3_g"] = 1.0 + n(ks[4], (1, D), 0.05); p["ln3_b"] = n(ks[5], (1, D), 0.05)
    p["a1_inw"] = n(ks[6], (3 * D, D)); p["a1_inb"] = n(ks[7], (1, 3 * D), 0.05)
    p["a1_ow"] = n(ks[8], (D, D));      p["a1_ob"] = n(ks[9], (1, D), 0.05)
    p["a2_inw"] = n(ks[10], (3 * D, D)); p["a2_inb"] = n(ks[11], (1, 3 * D), 0.05)
    p["a2_ow"] = n(ks[12], (D, D));      p["a2_ob"] = n(ks[13], (1, D), 0.05)
    p["f1_w"] = n(ks[14], (D, D)); p["f1_b"] = n(ks[15], (1, D), 0.05)
    p["f2_w"] = n(ks[16], (D, D)); p["f2_b"] = n(ks[17], (1, D), 0.05)
    return p


if __name__ == "__main__":
    # dimv == dimatt (required by the residual adds in the PyTorch module).
    # Lane-dense small config: D multiple of 128, S/Se multiples of 8, hd=128.
    B, S, S_enc, D, H = 2, 16, 16, 256, 2

    key = jax.random.PRNGKey(0)
    kx, ke, kw = jax.random.split(key, 3)
    x = jax.random.normal(kx, (B, S, D), jnp.float32)
    enc = jax.random.normal(ke, (B, S_enc, D), jnp.float32)
    params = init_params(kw, D)

    out = jax.block_until_ready(decoder_forward(x, enc, params, H))
    assert out.shape == (B, S, D)

    # Tight check vs. a reference with the identical mixed-precision policy,
    # loose check vs. the full-f32 reference (bf16 rounding dominates there).
    ref_mix = ref_forward_mixed(x, enc, params, H)
    ref_f32 = ref_forward_f32(x, enc, params, H)
    rel_mix = float(jnp.linalg.norm(out - ref_mix) / jnp.linalg.norm(ref_mix))
    rel_f32 = float(jnp.linalg.norm(out - ref_f32) / jnp.linalg.norm(ref_f32))
    assert rel_mix < 2e-2, ("mixed-precision reference mismatch", rel_mix)
    assert rel_f32 < 5e-2, ("f32 reference mismatch", rel_f32)

    print("KERNEL_OK")
</pallas_src>

<mosaic_0001>
module attributes {stable_mosaic.version = 11 : i64} {
  func.func @_decoder_kernel(%arg0: memref<32x256xf32, #tpu.memory_space<vmem>>, %arg1: memref<32x256xf32, #tpu.memory_space<vmem>>, %arg2: memref<1x256xf32, #tpu.memory_space<vmem>>, %arg3: memref<1x256xf32, #tpu.memory_space<vmem>>, %arg4: memref<1x256xf32, #tpu.memory_space<vmem>>, %arg5: memref<1x256xf32, #tpu.memory_space<vmem>>, %arg6: memref<1x256xf32, #tpu.memory_space<vmem>>, %arg7: memref<1x256xf32, #tpu.memory_space<vmem>>, %arg8: memref<256x768xbf16, #tpu.memory_space<vmem>>, %arg9: memref<1x768xf32, #tpu.memory_space<vmem>>, %arg10: memref<256x256xbf16, #tpu.memory_space<vmem>>, %arg11: memref<1x256xf32, #tpu.memory_space<vmem>>, %arg12: memref<256x256xbf16, #tpu.memory_space<vmem>>, %arg13: memref<1x256xf32, #tpu.memory_space<vmem>>, %arg14: memref<256x512xbf16, #tpu.memory_space<vmem>>, %arg15: memref<1x512xf32, #tpu.memory_space<vmem>>, %arg16: memref<256x256xbf16, #tpu.memory_space<vmem>>, %arg17: memref<1x256xf32, #tpu.memory_space<vmem>>, %arg18: memref<256x256xbf16, #tpu.memory_space<vmem>>, %arg19: memref<1x256xf32, #tpu.memory_space<vmem>>, %arg20: memref<256x256xbf16, #tpu.memory_space<vmem>>, %arg21: memref<1x256xf32, #tpu.memory_space<vmem>>, %arg22: memref<32x256xf32, #tpu.memory_space<vmem>>) attributes {dimension_semantics = [], scalar_prefetch = 0 : i64, scratch_operands = 0 : i64, tpu.core_type = #tpu.core_type<tc>} {
    %c0 = arith.constant 0 : index
    %c0_0 = arith.constant 0 : index
    %0 = vector.load %arg0[%c0, %c0_0] : memref<32x256xf32, #tpu.memory_space<vmem>>, vector<32x256xf32>
    %c0_1 = arith.constant 0 : index
    %c0_2 = arith.constant 0 : index
    %1 = vector.load %arg1[%c0_1, %c0_2] : memref<32x256xf32, #tpu.memory_space<vmem>>, vector<32x256xf32>
    %c0_3 = arith.constant 0 : index
    %c0_4 = arith.constant 0 : index
    %2 = vector.load %arg2[%c0_3, %c0_4] : memref<1x256xf32, #tpu.memory_space<vmem>>, vector<1x256xf32>
    %c0_5 = arith.constant 0 : index
    %c0_6 = arith.constant 0 : index
    %3 = vector.load %arg3[%c0_5, %c0_6] : memref<1x256xf32, #tpu.memory_space<vmem>>, vector<1x256xf32>
    %cst = arith.constant dense<0.000000e+00> : vector<32xf32>
    %4 = vector.multi_reduction <add>, %0, %cst [1] : vector<32x256xf32> to vector<32xf32>
    %5 = vector.shape_cast %4 : vector<32xf32> to vector<32x1xf32>
    %cst_7 = arith.constant 2.560000e+02 : f32
    %6 = vector.broadcast %cst_7 : f32 to vector<32x1xf32>
    %7 = arith.divf %5, %6 : vector<32x1xf32>
    %8 = vector.broadcast %7 : vector<32x1xf32> to vector<32x256xf32>
    %9 = arith.subf %0, %8 : vector<32x256xf32>
    %10 = arith.mulf %9, %9 : vector<32x256xf32>
    %cst_8 = arith.constant dense<0.000000e+00> : vector<32xf32>
    %11 = vector.multi_reduction <add>, %10, %cst_8 [1] : vector<32x256xf32> to vector<32xf32>
    %12 = vector.shape_cast %11 : vector<32xf32> to vector<32x1xf32>
    %cst_9 = arith.constant 2.560000e+02 : f32
    %13 = vector.broadcast %cst_9 : f32 to vector<32x1xf32>
    %14 = arith.divf %12, %13 : vector<32x1xf32>
    %15 = vector.broadcast %7 : vector<32x1xf32> to vector<32x256xf32>
    %16 = arith.subf %0, %15 : vector<32x256xf32>
    %cst_10 = arith.constant 9.99999974E-6 : f32
    %17 = vector.broadcast %cst_10 : f32 to vector<32x1xf32>
    %18 = arith.addf %14, %17 : vector<32x1xf32>
    %19 = math.rsqrt %18 : vector<32x1xf32>
    %20 = vector.broadcast %19 : vector<32x1xf32> to vector<32x256xf32>
    %21 = arith.mulf %16, %20 : vector<32x256xf32>
    %22 = vector.broadcast %2 : vector<1x256xf32> to vector<32x256xf32>
    %23 = arith.mulf %21, %22 : vector<32x256xf32>
    %24 = vector.broadcast %3 : vector<1x256xf32> to vector<32x256xf32>
    %25 = arith.addf %23, %24 : vector<32x256xf32>
    %c0_11 = arith.constant 0 : index
    %c0_12 = arith.constant 0 : index
    %26 = vector.load %arg8[%c0_11, %c0_12] : memref<256x768xbf16, #tpu.memory_space<vmem>>, vector<256x768xbf16>
    %27 = arith.truncf %25 : vector<32x256xf32> to vector<32x256xbf16>
    %cst_13 = arith.constant dense<0.000000e+00> : vector<32x768xf32>
    %28 = tpu.matmul %27, %26, %cst_13 {dimension_numbers = #tpu.dot_dimension_numbers<[1], [0], [0], [1], [0, 0, 1, 1], [], []>} : vector<32x256xbf16>, vector<256x768xbf16>, vector<32x768xf32> -> vector<32x768xf32>
    %c0_14 = arith.constant 0 : index
    %c0_15 = arith.constant 0 : index
    %29 = vector.load %arg9[%c0_14, %c0_15] : memref<1x768xf32, #tpu.memory_space<vmem>>, vector<1x768xf32>
    %30 = vector.broadcast %29 : vector<1x768xf32> to vector<32x768xf32>
    %31 = arith.addf %28, %30 : vector<32x768xf32>
    %32 = vector.extract_strided_slice %31 {offsets = [0, 0], sizes = [32, 256], strides = [1, 1]} : vector<32x768xf32> to vector<32x256xf32>
    %33 = vector.extract_strided_slice %31 {offsets = [0, 256], sizes = [32, 256], strides = [1, 1]} : vector<32x768xf32> to vector<32x256xf32>
    %34 = vector.extract_strided_slice %31 {offsets = [0, 512], sizes = [32, 256], strides = [1, 1]} : vector<32x768xf32> to vector<32x256xf32>
    %35 = vector.extract_strided_slice %32 {offsets = [0, 0], sizes = [32, 128], strides = [1, 1]} : vector<32x256xf32> to vector<32x128xf32>
    %36 = vector.extract_strided_slice %32 {offsets = [0, 128], sizes = [32, 128], strides = [1, 1]} : vector<32x256xf32> to vector<32x128xf32>
    %37 = vector.shape_cast %35 : vector<32x128xf32> to vector<1x32x128xf32>
    %38 = vector.shape_cast %36 : vector<32x128xf32> to vector<1x32x128xf32>
    %39 = tpu.concatenate %37, %38 in 0 : vector<1x32x128xf32>, vector<1x32x128xf32> -> vector<2x32x128xf32>
    %40 = vector.shape_cast %39 : vector<2x32x128xf32> to vector<4x16x128xf32>
    %41 = arith.truncf %40 : vector<4x16x128xf32> to vector<4x16x128xbf16>
    %42 = vector.extract_strided_slice %33 {offsets = [0, 0], sizes = [32, 128], strides = [1, 1]} : vector<32x256xf32> to vector<32x128xf32>
    %43 = vector.extract_strided_slice %33 {offsets = [0, 128], sizes = [32, 128], strides = [1, 1]} : vector<32x256xf32> to vector<32x128xf32>
    %44 = vector.shape_cast %42 : vector<32x128xf32> to vector<1x32x128xf32>
    %45 = vector.shape_cast %43 : vector<32x128xf32> to vector<1x32x128xf32>
    %46 = tpu.concatenate %44, %45 in 0 : vector<1x32x128xf32>, vector<1x32x128xf32> -> vector<2x32x128xf32>
    %47 = vector.shape_cast %46 : vector<2x32x128xf32> to vector<4x16x128xf32>
    %48 = arith.truncf %47 : vector<4x16x128xf32> to vector<4x16x128xbf16>
    %49 = vector.extract_strided_slice %34 {offsets = [0, 0], sizes = [32, 128], strides = [1, 1]} : vector<32x256xf32> to vector<32x128xf32>
    %50 = vector.extract_strided_slice %34 {offsets = [0, 128], sizes = [32, 128], strides = [1, 1]} : vector<32x256xf32> to vector<32x128xf32>
    %51 = vector.shape_cast %49 : vector<32x128xf32> to vector<1x32x128xf32>
    %52 = vector.shape_cast %50 : vector<32x128xf32> to vector<1x32x128xf32>
    %53 = tpu.concatenate %51, %52 in 0 : vector<1x32x128xf32>, vector<1x32x128xf32> -> vector<2x32x128xf32>
    %54 = vector.shape_cast %53 : vector<2x32x128xf32> to vector<4x16x128xf32>
    %55 = arith.truncf %54 : vector<4x16x128xf32> to vector<4x16x128xbf16>
    "tpu.trace_start"() <{level = 10 : i32, message = "bqd,bkd->bqk"}> : () -> ()
    %cst_16 = arith.constant dense<0.000000e+00> : vector<4x16x16xf32>
    %56 = tpu.matmul %41, %48, %cst_16 {dimension_numbers = #tpu.dot_dimension_numbers<[2], [2], [1], [1], [0, 0, 0, 1, 1, 1], [0], [0]>} : vector<4x16x128xbf16>, vector<4x16x128xbf16>, vector<4x16x16xf32> -> vector<4x16x16xf32>
    "tpu.trace_stop"() : () -> ()
    %cst_17 = arith.constant dense<0xFF800000> : vector<4x16xf32>
    %57 = vector.multi_reduction <maximumf>, %56, %cst_17 [2] : vector<4x16x16xf32> to vector<4x16xf32>
    %58 = vector.shape_cast %57 : vector<4x16xf32> to vector<4x16x1xf32>
    %59 = vector.broadcast %58 : vector<4x16x1xf32> to vector<4x16x16xf32>
    %60 = arith.subf %56, %59 : vector<4x16x16xf32>
    %61 = math.exp %60 : vector<4x16x16xf32>
    %cst_18 = arith.constant dense<0.000000e+00> : vector<4x16xf32>
    %62 = vector.multi_reduction <add>, %61, %cst_18 [2] : vector<4x16x16xf32> to vector<4x16xf32>
    %63 = vector.shape_cast %62 : vector<4x16xf32> to vector<4x16x1xf32>
    %64 = tpu.reciprocal %63 {approx = true} : vector<4x16x1xf32> -> vector<4x16x1xf32>
    %65 = vector.broadcast %64 : vector<4x16x1xf32> to vector<4x16x16xf32>
    %66 = arith.mulf %61, %65 : vector<4x16x16xf32>
    %67 = arith.truncf %66 : vector<4x16x16xf32> to vector<4x16x16xbf16>
    "tpu.trace_start"() <{level = 10 : i32, message = "bqk,bkd->bqd"}> : () -> ()
    %cst_19 = arith.constant dense<0.000000e+00> : vector<4x16x128xf32>
    %68 = tpu.matmul %67, %55, %cst_19 {dimension_numbers = #tpu.dot_dimension_numbers<[2], [1], [1], [2], [0, 0, 0, 1, 1, 2], [0], [0]>} : vector<4x16x16xbf16>, vector<4x16x128xbf16>, vector<4x16x128xf32> -> vector<4x16x128xf32>
    "tpu.trace_stop"() : () -> ()
    %69 = vector.shape_cast %68 : vector<4x16x128xf32> to vector<2x32x128xf32>
    %70 = vector.extract_strided_slice %69 {offsets = [0, 0, 0], sizes = [1, 32, 128], strides = [1, 1, 1]} : vector<2x32x128xf32> to vector<1x32x128xf32>
    %71 = vector.shape_cast %70 : vector<1x32x128xf32> to vector<32x128xf32>
    %72 = vector.extract_strided_slice %69 {offsets = [1, 0, 0], sizes = [1, 32, 128], strides = [1, 1, 1]} : vector<2x32x128xf32> to vector<1x32x128xf32>
    %73 = vector.shape_cast %72 : vector<1x32x128xf32> to vector<32x128xf32>
    %74 = tpu.concatenate %71, %73 in 1 : vector<32x128xf32>, vector<32x128xf32> -> vector<32x256xf32>
    %c0_20 = arith.constant 0 : index
    %c0_21 = arith.constant 0 : index
    %75 = vector.load %arg10[%c0_20, %c0_21] : memref<256x256xbf16, #tpu.memory_space<vmem>>, vector<256x256xbf16>
    %76 = arith.truncf %74 : vector<32x256xf32> to vector<32x256xbf16>
    %cst_22 = arith.constant dense<0.000000e+00> : vector<32x256xf32>
    %77 = tpu.matmul %76, %75, %cst_22 {dimension_numbers = #tpu.dot_dimension_numbers<[1], [0], [0], [1], [0, 0, 1, 1], [], []>} : vector<32x256xbf16>, vector<256x256xbf16>, vector<32x256xf32> -> vector<32x256xf32>
    %c0_23 = arith.constant 0 : index
    %c0_24 = arith.constant 0 : index
    %78 = vector.load %arg11[%c0_23, %c0_24] : memref<1x256xf32, #tpu.memory_space<vmem>>, vector<1x256xf32>
    %79 = vector.broadcast %78 : vector<1x256xf32> to vector<32x256xf32>
    %80 = arith.addf %77, %79 : vector<32x256xf32>
    %81 = arith.addf %80, %0 : vector<32x256xf32>
    %c0_25 = arith.constant 0 : index
    %c0_26 = arith.constant 0 : index
    %82 = vector.load %arg4[%c0_25, %c0_26] : memref<1x256xf32, #tpu.memory_space<vmem>>, vector<1x256xf32>
    %c0_27 = arith.constant 0 : index
    %c0_28 = arith.constant 0 : index
    %83 = vector.load %arg5[%c0_27, %c0_28] : memref<1x256xf32, #tpu.memory_space<vmem>>, vector<1x256xf32>
    %cst_29 = arith.constant dense<0.000000e+00> : vector<32xf32>
    %84 = vector.multi_reduction <add>, %81, %cst_29 [1] : vector<32x256xf32> to vector<32xf32>
    %85 = vector.shape_cast %84 : vector<32xf32> to vector<32x1xf32>
    %cst_30 = arith.constant 2.560000e+02 : f32
    %86 = vector.broadcast %cst_30 : f32 to vector<32x1xf32>
    %87 = arith.divf %85, %86 : vector<32x1xf32>
    %88 = vector.broadcast %87 : vector<32x1xf32> to vector<32x256xf32>
    %89 = arith.subf %81, %88 : vector<32x256xf32>
    %90 = arith.mulf %89, %89 : vector<32x256xf32>
    %cst_31 = arith.constant dense<0.000000e+00> : vector<32xf32>
    %91 = vector.multi_reduction <add>, %90, %cst_31 [1] : vector<32x256xf32> to vector<32xf32>
    %92 = vector.shape_cast %91 : vector<32xf32> to vector<32x1xf32>
    %cst_32 = arith.constant 2.560000e+02 : f32
    %93 = vector.broadcast %cst_32 : f32 to vector<32x1xf32>
    %94 = arith.divf %92, %93 : vector<32x1xf32>
    %95 = vector.broadcast %87 : vector<32x1xf32> to vector<32x256xf32>
    %96 = arith.subf %81, %95 : vector<32x256xf32>
    %cst_33 = arith.constant 9.99999974E-6 : f32
    %97 = vector.broadcast %cst_33 : f32 to vector<32x1xf32>
    %98 = arith.addf %94, %97 : vector<32x1xf32>
    %99 = math.rsqrt %98 : vector<32x1xf32>
    %100 = vector.broadcast %99 : vector<32x1xf32> to vector<32x256xf32>
    %101 = arith.mulf %96, %100 : vector<32x256xf32>
    %102 = vector.broadcast %82 : vector<1x256xf32> to vector<32x256xf32>
    %103 = arith.mulf %101, %102 : vector<32x256xf32>
    %104 = vector.broadcast %83 : vector<1x256xf32> to vector<32x256xf32>
    %105 = arith.addf %103, %104 : vector<32x256xf32>
    %c0_34 = arith.constant 0 : index
    %c0_35 = arith.constant 0 : index
    %106 = vector.load %arg12[%c0_34, %c0_35] : memref<256x256xbf16, #tpu.memory_space<vmem>>, vector<256x256xbf16>
    %107 = arith.truncf %105 : vector<32x256xf32> to vector<32x256xbf16>
    %cst_36 = arith.constant dense<0.000000e+00> : vector<32x256xf32>
    %108 = tpu.matmul %107, %106, %cst_36 {dimension_numbers = #tpu.dot_dimension_numbers<[1], [0], [0], [1], [0, 0, 1, 1], [], []>} : vector<32x256xbf16>, vector<256x256xbf16>, vector<32x256xf32> -> vector<32x256xf32>
    %c0_37 = arith.constant 0 : index
    %c0_38 = arith.constant 0 : index
    %109 = vector.load %arg13[%c0_37, %c0_38] : memref<1x256xf32, #tpu.memory_space<vmem>>, vector<1x256xf32>
    %110 = vector.broadcast %109 : vector<1x256xf32> to vector<32x256xf32>
    %111 = arith.addf %108, %110 : vector<32x256xf32>
    %c0_39 = arith.constant 0 : index
    %c0_40 = arith.constant 0 : index
    %112 = vector.load %arg14[%c0_39, %c0_40] : memref<256x512xbf16, #tpu.memory_space<vmem>>, vector<256x512xbf16>
    %113 = arith.truncf %1 : vector<32x256xf32> to vector<32x256xbf16>
    %cst_41 = arith.constant dense<0.000000e+00> : vector<32x512xf32>
    %114 = tpu.matmul %113, %112, %cst_41 {dimension_numbers = #tpu.dot_dimension_numbers<[1], [0], [0], [1], [0, 0, 1, 1], [], []>} : vector<32x256xbf16>, vector<256x512xbf16>, vector<32x512xf32> -> vector<32x512xf32>
    %c0_42 = arith.constant 0 : index
    %c0_43 = arith.constant 0 : index
    %115 = vector.load %arg15[%c0_42, %c0_43] : memref<1x512xf32, #tpu.memory_space<vmem>>, vector<1x512xf32>
    %116 = vector.broadcast %115 : vector<1x512xf32> to vector<32x512xf32>
    %117 = arith.addf %114, %116 : vector<32x512xf32>
    %118 = vector.extract_strided_slice %117 {offsets = [0, 0], sizes = [32, 256], strides = [1, 1]} : vector<32x512xf32> to vector<32x256xf32>
    %119 = vector.extract_strided_slice %117 {offsets = [0, 256], sizes = [32, 256], strides = [1, 1]} : vector<32x512xf32> to vector<32x256xf32>
    %120 = vector.extract_strided_slice %111 {offsets = [0, 0], sizes = [32, 128], strides = [1, 1]} : vector<32x256xf32> to vector<32x128xf32>
    %121 = vector.extract_strided_slice %111 {offsets = [0, 128], sizes = [32, 128], strides = [1, 1]} : vector<32x256xf32> to vector<32x128xf32>
    %122 = vector.shape_cast %120 : vector<32x128xf32> to vector<1x32x128xf32>
    %123 = vector.shape_cast %121 : vector<32x128xf32> to vector<1x32x128xf32>
    %124 = tpu.concatenate %122, %123 in 0 : vector<1x32x128xf32>, vector<1x32x128xf32> -> vector<2x32x128xf32>
    %125 = vector.shape_cast %124 : vector<2x32x128xf32> to vector<4x16x128xf32>
    %126 = arith.truncf %125 : vector<4x16x128xf32> to vector<4x16x128xbf16>
    %127 = vector.extract_strided_slice %118 {offsets = [0, 0], sizes = [32, 128], strides = [1, 1]} : vector<32x256xf32> to vector<32x128xf32>
    %128 = vector.extract_strided_slice %118 {offsets = [0, 128], sizes = [32, 128], strides = [1, 1]} : vector<32x256xf32> to vector<32x128xf32>
    %129 = vector.shape_cast %127 : vector<32x128xf32> to vector<1x32x128xf32>
    %130 = vector.shape_cast %128 : vector<32x128xf32> to vector<1x32x128xf32>
    %131 = tpu.concatenate %129, %130 in 0 : vector<1x32x128xf32>, vector<1x32x128xf32> -> vector<2x32x128xf32>
    %132 = vector.shape_cast %131 : vector<2x32x128xf32> to vector<4x16x128xf32>
    %133 = arith.truncf %132 : vector<4x16x128xf32> to vector<4x16x128xbf16>
    %134 = vector.extract_strided_slice %119 {offsets = [0, 0], sizes = [32, 128], strides = [1, 1]} : vector<32x256xf32> to vector<32x128xf32>
    %135 = vector.extract_strided_slice %119 {offsets = [0, 128], sizes = [32, 128], strides = [1, 1]} : vector<32x256xf32> to vector<32x128xf32>
    %136 = vector.shape_cast %134 : vector<32x128xf32> to vector<1x32x128xf32>
    %137 = vector.shape_cast %135 : vector<32x128xf32> to vector<1x32x128xf32>
    %138 = tpu.concatenate %136, %137 in 0 : vector<1x32x128xf32>, vector<1x32x128xf32> -> vector<2x32x128xf32>
    %139 = vector.shape_cast %138 : vector<2x32x128xf32> to vector<4x16x128xf32>
    %140 = arith.truncf %139 : vector<4x16x128xf32> to vector<4x16x128xbf16>
    "tpu.trace_start"() <{level = 10 : i32, message = "bqd,bkd->bqk"}> : () -> ()
    %cst_44 = arith.constant dense<0.000000e+00> : vector<4x16x16xf32>
    %141 = tpu.matmul %126, %133, %cst_44 {dimension_numbers = #tpu.dot_dimension_numbers<[2], [2], [1], [1], [0, 0, 0, 1, 1, 1], [0], [0]>} : vector<4x16x128xbf16>, vector<4x16x128xbf16>, vector<4x16x16xf32> -> vector<4x16x16xf32>
    "tpu.trace_stop"() : () -> ()
    %cst_45 = arith.constant dense<0xFF800000> : vector<4x16xf32>
    %142 = vector.multi_reduction <maximumf>, %141, %cst_45 [2] : vector<4x16x16xf32> to vector<4x16xf32>
    %143 = vector.shape_cast %142 : vector<4x16xf32> to vector<4x16x1xf32>
    %144 = vector.broadcast %143 : vector<4x16x1xf32> to vector<4x16x16xf32>
    %145 = arith.subf %141, %144 : vector<4x16x16xf32>
    %146 = math.exp %145 : vector<4x16x16xf32>
    %cst_46 = arith.constant dense<0.000000e+00> : vector<4x16xf32>
    %147 = vector.multi_reduction <add>, %146, %cst_46 [2] : vector<4x16x16xf32> to vector<4x16xf32>
    %148 = vector.shape_cast %147 : vector<4x16xf32> to vector<4x16x1xf32>
    %149 = tpu.reciprocal %148 {approx = true} : vector<4x16x1xf32> -> vector<4x16x1xf32>
    %150 = vector.broadcast %149 : vector<4x16x1xf32> to vector<4x16x16xf32>
    %151 = arith.mulf %146, %150 : vector<4x16x16xf32>
    %152 = arith.truncf %151 : vector<4x16x16xf32> to vector<4x16x16xbf16>
    "tpu.trace_start"() <{level = 10 : i32, message = "bqk,bkd->bqd"}> : () -> ()
    %cst_47 = arith.constant dense<0.000000e+00> : vector<4x16x128xf32>
    %153 = tpu.matmul %152, %140, %cst_47 {dimension_numbers = #tpu.dot_dimension_numbers<[2], [1], [1], [2], [0, 0, 0, 1, 1, 2], [0], [0]>} : vector<4x16x16xbf16>, vector<4x16x128xbf16>, vector<4x16x128xf32> -> vector<4x16x128xf32>
    "tpu.trace_stop"() : () -> ()
    %154 = vector.shape_cast %153 : vector<4x16x128xf32> to vector<2x32x128xf32>
    %155 = vector.extract_strided_slice %154 {offsets = [0, 0, 0], sizes = [1, 32, 128], strides = [1, 1, 1]} : vector<2x32x128xf32> to vector<1x32x128xf32>
    %156 = vector.shape_cast %155 : vector<1x32x128xf32> to vector<32x128xf32>
    %157 = vector.extract_strided_slice %154 {offsets = [1, 0, 0], sizes = [1, 32, 128], strides = [1, 1, 1]} : vector<2x32x128xf32> to vector<1x32x128xf32>
    %158 = vector.shape_cast %157 : vector<1x32x128xf32> to vector<32x128xf32>
    %159 = tpu.concatenate %156, %158 in 1 : vector<32x128xf32>, vector<32x128xf32> -> vector<32x256xf32>
    %c0_48 = arith.constant 0 : index
    %c0_49 = arith.constant 0 : index
    %160 = vector.load %arg16[%c0_48, %c0_49] : memref<256x256xbf16, #tpu.memory_space<vmem>>, vector<256x256xbf16>
    %161 = arith.truncf %159 : vector<32x256xf32> to vector<32x256xbf16>
    %cst_50 = arith.constant dense<0.000000e+00> : vector<32x256xf32>
    %162 = tpu.matmul %161, %160, %cst_50 {dimension_numbers = #tpu.dot_dimension_numbers<[1], [0], [0], [1], [0, 0, 1, 1], [], []>} : vector<32x256xbf16>, vector<256x256xbf16>, vector<32x256xf32> -> vector<32x256xf32>
    %c0_51 = arith.constant 0 : index
    %c0_52 = arith.constant 0 : index
    %163 = vector.load %arg17[%c0_51, %c0_52] : memref<1x256xf32, #tpu.memory_space<vmem>>, vector<1x256xf32>
    %164 = vector.broadcast %163 : vector<1x256xf32> to vector<32x256xf32>
    %165 = arith.addf %162, %164 : vector<32x256xf32>
    %166 = arith.addf %165, %105 : vector<32x256xf32>
    %c0_53 = arith.constant 0 : index
    %c0_54 = arith.constant 0 : index
    %167 = vector.load %arg6[%c0_53, %c0_54] : memref<1x256xf32, #tpu.memory_space<vmem>>, vector<1x256xf32>
    %c0_55 = arith.constant 0 : index
    %c0_56 = arith.constant 0 : index
    %168 = vector.load %arg7[%c0_55, %c0_56] : memref<1x256xf32, #tpu.memory_space<vmem>>, vector<1x256xf32>
    %cst_57 = arith.constant dense<0.000000e+00> : vector<32xf32>
    %169 = vector.multi_reduction <add>, %166, %cst_57 [1] : vector<32x256xf32> to vector<32xf32>
    %170 = vector.shape_cast %169 : vector<32xf32> to vector<32x1xf32>
    %cst_58 = arith.constant 2.560000e+02 : f32
    %171 = vector.broadcast %cst_58 : f32 to vector<32x1xf32>
    %172 = arith.divf %170, %171 : vector<32x1xf32>
    %173 = vector.broadcast %172 : vector<32x1xf32> to vector<32x256xf32>
    %174 = arith.subf %166, %173 : vector<32x256xf32>
    %175 = arith.mulf %174, %174 : vector<32x256xf32>
    %cst_59 = arith.constant dense<0.000000e+00> : vector<32xf32>
    %176 = vector.multi_reduction <add>, %175, %cst_59 [1] : vector<32x256xf32> to vector<32xf32>
    %177 = vector.shape_cast %176 : vector<32xf32> to vector<32x1xf32>
    %cst_60 = arith.constant 2.560000e+02 : f32
    %178 = vector.broadcast %cst_60 : f32 to vector<32x1xf32>
    %179 = arith.divf %177, %178 : vector<32x1xf32>
    %180 = vector.broadcast %172 : vector<32x1xf32> to vector<32x256xf32>
    %181 = arith.subf %166, %180 : vector<32x256xf32>
    %cst_61 = arith.constant 9.99999974E-6 : f32
    %182 = vector.broadcast %cst_61 : f32 to vector<32x1xf32>
    %183 = arith.addf %179, %182 : vector<32x1xf32>
    %184 = math.rsqrt %183 : vector<32x1xf32>
    %185 = vector.broadcast %184 : vector<32x1xf32> to vector<32x256xf32>
    %186 = arith.mulf %181, %185 : vector<32x256xf32>
    %187 = vector.broadcast %167 : vector<1x256xf32> to vector<32x256xf32>
    %188 = arith.mulf %186, %187 : vector<32x256xf32>
    %189 = vector.broadcast %168 : vector<1x256xf32> to vector<32x256xf32>
    %190 = arith.addf %188, %189 : vector<32x256xf32>
    %c0_62 = arith.constant 0 : index
    %c0_63 = arith.constant 0 : index
    %191 = vector.load %arg18[%c0_62, %c0_63] : memref<256x256xbf16, #tpu.memory_space<vmem>>, vector<256x256xbf16>
    %192 = arith.truncf %190 : vector<32x256xf32> to vector<32x256xbf16>
    %cst_64 = arith.constant dense<0.000000e+00> : vector<32x256xf32>
    %193 = tpu.matmul %192, %191, %cst_64 {dimension_numbers = #tpu.dot_dimension_numbers<[1], [0], [0], [1], [0, 0, 1, 1], [], []>} : vector<32x256xbf16>, vector<256x256xbf16>, vector<32x256xf32> -> vector<32x256xf32>
    %c0_65 = arith.constant 0 : index
    %c0_66 = arith.constant 0 : index
    %194 = vector.load %arg19[%c0_65, %c0_66] : memref<1x256xf32, #tpu.memory_space<vmem>>, vector<1x256xf32>
    %195 = vector.broadcast %194 : vector<1x256xf32> to vector<32x256xf32>
    %196 = arith.addf %193, %195 : vector<32x256xf32>
    %cst_67 = arith.constant 0.000000e+00 : f32
    %197 = vector.broadcast %cst_67 : f32 to vector<32x256xf32>
    %198 = arith.maximumf %196, %197 : vector<32x256xf32>
    %c0_68 = arith.constant 0 : index
    %c0_69 = arith.constant 0 : index
    %199 = vector.load %arg20[%c0_68, %c0_69] : memref<256x256xbf16, #tpu.memory_space<vmem>>, vector<256x256xbf16>
    %200 = arith.truncf %198 : vector<32x256xf32> to vector<32x256xbf16>
    %cst_70 = arith.constant dense<0.000000e+00> : vector<32x256xf32>
    %201 = tpu.matmul %200, %199, %cst_70 {dimension_numbers = #tpu.dot_dimension_numbers<[1], [0], [0], [1], [0, 0, 1, 1], [], []>} : vector<32x256xbf16>, vector<256x256xbf16>, vector<32x256xf32> -> vector<32x256xf32>
    %c0_71 = arith.constant 0 : index
    %c0_72 = arith.constant 0 : index
    %202 = vector.load %arg21[%c0_71, %c0_72] : memref<1x256xf32, #tpu.memory_space<vmem>>, vector<1x256xf32>
    %203 = vector.broadcast %202 : vector<1x256xf32> to vector<32x256xf32>
    %204 = arith.addf %201, %203 : vector<32x256xf32>
    %205 = arith.addf %190, %204 : vector<32x256xf32>
    %c0_73 = arith.constant 0 : index
    %c0_74 = arith.constant 0 : index
    %206 = vector.load %arg22[%c0_73, %c0_74] : memref<32x256xf32, #tpu.memory_space<vmem>>, vector<32x256xf32>
    tpu.vector_store %arg22[%c0_73, %c0_74], %205 {strides = array<i32>} : memref<32x256xf32, #tpu.memory_space<vmem>>, vector<32x256xf32>,
    return
  }
}

</mosaic_0001>

<bundles_post_ra>
// kernel: tpu_custom_call.1
= control target key start
LH: loop header
LB: loop body
LE: loop exit
PB: predicated region body
PF: predicated region fallthrough
CT: control target
= control target key end

     0   :  { %s6297_s0 = inlined_call_operand.hbm [shape: f32[32,256], index: 0, kind: input, shape index: {}]   ;;  %s6298_s1 = inlined_call_operand.hbm [shape: f32[32,256], index: 1, kind: input, shape index: {}]   ;;  %s6299_s2 = inlined_call_operand.hbm [shape: f32[1,256], index: 2, kind: input, shape index: {}]   ;;  %s6300_s3 = inlined_call_operand.hbm [shape: f32[1,256], index: 3, kind: input, shape index: {}]   ;;  %s6301_s4 = inlined_call_operand.vmem [shape: f32[1,256], index: 4, kind: input, shape index: {}]   ;;  %s6302_s5 = inlined_call_operand.vmem [shape: f32[1,256], index: 5, kind: input, shape index: {}]   ;;  %s6303_s6 = inlined_call_operand.vmem [shape: f32[1,256], index: 6, kind: input, shape index: {}]   ;;  %s6304_s7 = inlined_call_operand.vmem [shape: f32[1,256], index: 7, kind: input, shape index: {}]   ;;  %s6305_s8 = inlined_call_operand.hbm [shape: bf16[256,768], index: 8, kind: input, shape index: {}]   ;;  %s6306_s9 = inlined_call_operand.vmem [shape: f32[1,768], index: 9, kind: input, shape index: {}]   ;;  %s6307_s10 = inlined_call_operand.hbm [shape: bf16[256,256], index: 10, kind: input, shape index: {}]   ;;  %s6308_s11 = inlined_call_operand.vmem [shape: f32[1,256], index: 11, kind: input, shape index: {}]   ;;  %s6309_s12 = inlined_call_operand.hbm [shape: bf16[256,256], index: 12, kind: input, shape index: {}]   ;;  %s6310_s13 = inlined_call_operand.vmem [shape: f32[1,256], index: 13, kind: input, shape index: {}]   ;;  %s6311_s14 = inlined_call_operand.hbm [shape: bf16[256,512], index: 14, kind: input, shape index: {}]   ;;  %s6312_s15 = inlined_call_operand.vmem [shape: f32[1,512], index: 15, kind: input, shape index: {}]   ;;  %s6313_s16 = inlined_call_operand.hbm [shape: bf16[256,256], index: 16, kind: input, shape index: {}]   ;;  %s6314_s17 = inlined_call_operand.vmem [shape: f32[1,256], index: 17, kind: input, shape index: {}]   ;;  %s6315_s18 = inlined_call_operand.hbm [shape: bf16[256,256], index: 18, kind: input, shape index: {}]   ;;  %s6316_s19 = inlined_call_operand.vmem [shape: f32[1,256], index: 19, kind: input, shape index: {}]   ;;  %s6317_s20 = inlined_call_operand.hbm [shape: bf16[256,256], index: 20, kind: input, shape index: {}]   ;;  %s6318_s21 = inlined_call_operand.vmem [shape: f32[1,256], index: 21, kind: input, shape index: {}]   ;;  %s6319_s22 = inlined_call_operand.hbm [shape: f32[32,256], index: 22, kind: output, shape index: {}]  }
   0x1   :  { %6329 = sst [smem:[#allocation28_spill]] %s6297_s0 }
   0x2   :  { %6330 = sst [smem:[#allocation29_spill]] %s6298_s1 }
   0x3   :  { %6331 = sst [smem:[#allocation30_spill]] %s6299_s2 }
   0x4   :  { %6332 = sst [smem:[#allocation31_spill]] %s6300_s3 }
   0x5   :  { %6333 = sst [smem:[#allocation32_spill]] %s6301_s4 }
   0x6   :  { %6334 = sst [smem:[#allocation33_spill]] %s6302_s5 }
   0x7   :  { %6335 = sst [smem:[#allocation34_spill]] %s6303_s6 }
   0x8   :  { %6336 = sst [smem:[#allocation35_spill]] %s6318_s21 }
   0x9   :  { %6337 = sst [smem:[#allocation36_spill]] %s6319_s22 }
   0xa   :  { %27 = vsyncpa [#allocation3], 0 }
   0xb   :  { %28 = vsyncpa [#allocation6], 0 }
   0xc   :  { %29 = vsyncpa [#allocation9], 0 }
   0xd   :  { %30 = vsyncpa [#allocation12], 0 }
   0xe   :  { %31 = vsyncpa [#allocation15], 0 }
   0xf   :  { %32 = vsyncpa [#allocation18], 0 }
  0x10   :  { %33 = vsyncpa [#allocation4], 0  ;;  %s5420_s3 = smov [#allocation5]   ;;  %s5421_s29 = smov [#allocation8]  }
  0x11   :  { %s51_s28 = sshll.u32 %s5420_s3, 4  ;;  %s74_s30 = sshll.u32 %s5421_s29, 4  ;;  %s52_s28 = int_to_ptr.vmem [resolvable:$true] %s51_s28  ;;  %s75_s30 = int_to_ptr.vmem [resolvable:$true] %s74_s30 }
  0x12   :  { %s6338_s23 = sld [smem:[#allocation29_spill]] }
  0x18   :  { %s5142_s1 = scalar_lea.hbm %s6338_s23, 1024 }
  0x19   :  { %p5143_p0 = scmp.ne.s32.totalorder %s6338_s23, %s5142_s1  ;;  %p5146_p1 = scmp.lt.u32.totalorder %s5142_s1, %s6338_s23 }
  0x1b   :  { %p5148_p2 = pnand %p5146_p1, %p5143_p0 }
  0x1d   :  { %5151 = shalt.err (!%p5148_p2)
}
  0x1e   :  { %s5152_s26 = scalar_lea.vmem %s52_s28, 1024  ;;  %p5157_p4 = scmp.lt.s32.totalorder %s52_s28, %s52_s28 }
  0x1f   :  { %p5153_p3 = scmp.ne.s32.totalorder %s52_s28, %s5152_s26  ;;  %p5158_p5 = scmp.lt.s32.totalorder %s5152_s26, %s5152_s26 }
  0x21   :  { %p5159_p6 = por %p5158_p5, %p5157_p4 }
  0x23   :  { %p5160_p7 = pnand %p5159_p6, %p5153_p3 }
  0x25   :  { %5163 = shalt.err (!%p5160_p7)
}
  0x26   :  { %s6325_s2 = smov 256   ;;  %s6327_s27 = smov 16  }
  0x27   :  { %57 = dma.hbm_to_vmem [thread:$0]  %s6338_s23, 1024, %s52_s28, [#allocation6], %s6325_s2, %s6325_s2, %s6327_s27  }
  0x28   :  { %s6339_s1 = sld [smem:[#allocation31_spill]] }
  0x2e   :  { %s5164_s5 = scalar_lea.hbm %s6339_s1, 32 }
  0x2f   :  { %p5165_p8 = scmp.ne.s32.totalorder %s6339_s1, %s5164_s5  ;;  %p5168_p9 = scmp.lt.u32.totalorder %s5164_s5, %s6339_s1 }
  0x31   :  { %p5170_p10 = pnand %p5168_p9, %p5165_p8 }
  0x33   :  { %5173 = shalt.err (!%p5170_p10)
}
  0x34   :  { %s5174_s22 = scalar_lea.vmem %s75_s30, 32  ;;  %p5179_p12 = scmp.lt.s32.totalorder %s75_s30, %s75_s30 }
  0x35   :  { %p5175_p11 = scmp.ne.s32.totalorder %s75_s30, %s5174_s22  ;;  %p5180_p13 = scmp.lt.s32.totalorder %s5174_s22, %s5174_s22 }
  0x37   :  { %p5181_p0 = por %p5180_p13, %p5179_p12 }
  0x39   :  { %p5182_p1 = pnand %p5181_p0, %p5175_p11 }
  0x3b   :  { %5185 = shalt.err (!%p5182_p1)
}
  0x3c   :  { %77 = dma.hbm_to_vmem [thread:$0]  %s6339_s1, 32, %s75_s30, [#allocation9]  }
  0x3d   :  { %s5424_s3 = smov [#allocation11]   ;;  %s5186_s5 = scalar_lea.hbm %s6307_s10, 4096 }
  0x3e   :  { %s105_s29 = sshll.u32 %s5424_s3, 4  ;;  %p5187_p2 = scmp.ne.s32.totalorder %s6307_s10, %s5186_s5  ;;  %s106_s29 = int_to_ptr.vmem [resolvable:$true] %s105_s29 }
  0x3f   :  { %p5190_p3 = scmp.lt.u32.totalorder %s5186_s5, %s6307_s10 }
  0x41   :  { %p5192_p4 = pnand %p5190_p3, %p5187_p2 }
  0x43   :  { %5195 = shalt.err (!%p5192_p4)
}
  0x44   :  { %s5196_s26 = scalar_lea.vmem %s106_s29, 4096  ;;  %p5201_p6 = scmp.lt.s32.totalorder %s106_s29, %s106_s29 }
  0x45   :  { %p5197_p5 = scmp.ne.s32.totalorder %s106_s29, %s5196_s26  ;;  %p5202_p7 = scmp.lt.s32.totalorder %s5196_s26, %s5196_s26 }
  0x47   :  { %p5203_p8 = por %p5202_p7, %p5201_p6 }
  0x49   :  { %p5204_p9 = pnand %p5203_p8, %p5197_p5 }
  0x4b   :  { %5207 = shalt.err (!%p5204_p9)
}
  0x4c   :  { %s5425_s30 = smov 128   ;;  %s5426_s1 = smov 8  }
  0x4d   :  { %111 = dma.hbm_to_vmem [thread:$0]  %s6307_s10, 4096, %s106_s29, [#allocation12], %s5425_s30, %s5425_s30, %s5426_s1  }
  0x4e   :  { %s5427_s3 = smov [#allocation14]   ;;  %s5428_s0 = smov [#allocation17]  }
  0x4f   :  { %s133_s4 = sshll.u32 %s5427_s3, 4  ;;  %s161_s5 = sshll.u32 %s5428_s0, 4  ;;  %s134_s4 = int_to_ptr.vmem [resolvable:$true] %s133_s4  ;;  %s162_s5 = int_to_ptr.vmem [resolvable:$true] %s161_s5 }
  0x50   :  { %s5208_s25 = scalar_lea.hbm %s6311_s14, 8192 }
  0x51   :  { %p5209_p10 = scmp.ne.s32.totalorder %s6311_s14, %s5208_s25  ;;  %p5212_p11 = scmp.lt.u32.totalorder %s5208_s25, %s6311_s14 }
  0x53   :  { %p5214_p12 = pnand %p5212_p11, %p5209_p10 }
  0x55   :  { %5217 = shalt.err (!%p5214_p12)
}
  0x56   :  { %s5218_s10 = scalar_lea.vmem %s134_s4, 8192  ;;  %p5223_p0 = scmp.lt.s32.totalorder %s134_s4, %s134_s4 }
  0x57   :  { %p5219_p13 = scmp.ne.s32.totalorder %s134_s4, %s5218_s10  ;;  %p5224_p1 = scmp.lt.s32.totalorder %s5218_s10, %s5218_s10 }
  0x59   :  { %p5225_p2 = por %p5224_p1, %p5223_p0 }
  0x5b   :  { %p5226_p3 = pnand %p5225_p2, %p5219_p13 }
  0x5d   :  { %5229 = shalt.err (!%p5226_p3)
}
  0x5e   :  { %s6340_s29 = smov 16   ;;  %s6341_s28 = smov 256  }
  0x5f   :  { %139 = dma.hbm_to_vmem [thread:$0]  %s6311_s14, 8192, %s134_s4, [#allocation15], %s6341_s28, %s6341_s28, %s6340_s29  }
  0x60   :  { %s5230_s27 = scalar_lea.hbm %s6315_s18, 4096 }
  0x61   :  { %p5231_p4 = scmp.ne.s32.totalorder %s6315_s18, %s5230_s27  ;;  %p5234_p5 = scmp.lt.u32.totalorder %s5230_s27, %s6315_s18 }
  0x63   :  { %p5236_p6 = pnand %p5234_p5, %p5231_p4 }
  0x65   :  { %5239 = shalt.err (!%p5236_p6)
}
  0x66   :  { %s5240_s26 = scalar_lea.vmem %s162_s5, 4096  ;;  %p5245_p8 = scmp.lt.s32.totalorder %s162_s5, %s162_s5 }
  0x67   :  { %p5241_p7 = scmp.ne.s32.totalorder %s162_s5, %s5240_s26  ;;  %p5246_p9 = scmp.lt.s32.totalorder %s5240_s26, %s5240_s26 }
  0x69   :  { %p5247_p10 = por %p5246_p9, %p5245_p8 }
  0x6b   :  { %p5248_p11 = pnand %p5247_p10, %p5241_p7 }
  0x6d   :  { %5251 = shalt.err (!%p5248_p11)
}
  0x6e   :  { %167 = dma.hbm_to_vmem [thread:$0]  %s6315_s18, 4096, %s162_s5, [#allocation18], %s5425_s30, %s5425_s30, %s5426_s1  }
  0x6f   :  { %s5429_s10 = smov [#allocation2]   ;;  %s5430_s3 = smov [#allocation7]  }
  0x70   :  { %s39_s23 = sshll.u32 %s5429_s10, 4  ;;  %s64_s0 = sshll.u32 %s5430_s3, 4  ;;  %s40_s23 = int_to_ptr.vmem [resolvable:$true] %s39_s23  ;;  %s65_s0 = int_to_ptr.vmem [resolvable:$true] %s64_s0 }
  0x71   :  { %s6342_s24 = sld [smem:[#allocation28_spill]] }
  0x77   :  { %s5252_s6 = scalar_lea.hbm %s6342_s24, 1024 }
  0x78   :  { %p5253_p12 = scmp.ne.s32.totalorder %s6342_s24, %s5252_s6  ;;  %p5256_p13 = scmp.lt.u32.totalorder %s5252_s6, %s6342_s24 }
  0x7a   :  { %p5258_p0 = pnand %p5256_p13, %p5253_p12 }
  0x7c   :  { %5261 = shalt.err (!%p5258_p0)
}
  0x7d   :  { %s5262_s18 = scalar_lea.vmem %s40_s23, 1024  ;;  %p5267_p2 = scmp.lt.s32.totalorder %s40_s23, %s40_s23 }
  0x7e   :  { %p5263_p1 = scmp.ne.s32.totalorder %s40_s23, %s5262_s18  ;;  %p5268_p3 = scmp.lt.s32.totalorder %s5262_s18, %s5262_s18 }
  0x80   :  { %p5269_p4 = por %p5268_p3, %p5267_p2 }
  0x82   :  { %p5270_p5 = pnand %p5269_p4, %p5263_p1 }
  0x84   :  { %5273 = shalt.err (!%p5270_p5)
}
  0x85   :  { %45 = dma.hbm_to_vmem [thread:$0]  %s6342_s24, 1024, %s40_s23, [#allocation3], %s6341_s28, %s6341_s28, %s6340_s29  }
  0x86   :  { %s6343_s10 = sld [smem:[#allocation30_spill]] }
  0x8c   :  { %s5274_s3 = scalar_lea.hbm %s6343_s10, 32 }
  0x8d   :  { %p5275_p6 = scmp.ne.s32.totalorder %s6343_s10, %s5274_s3  ;;  %p5278_p7 = scmp.lt.u32.totalorder %s5274_s3, %s6343_s10 }
  0x8f   :  { %p5280_p8 = pnand %p5278_p7, %p5275_p6 }
  0x91   :  { %5283 = shalt.err (!%p5280_p8)
}
  0x92   :  { %s5284_s22 = scalar_lea.vmem %s65_s0, 32  ;;  %p5289_p10 = scmp.lt.s32.totalorder %s65_s0, %s65_s0 }
  0x93   :  { %p5285_p9 = scmp.ne.s32.totalorder %s65_s0, %s5284_s22  ;;  %p5290_p11 = scmp.lt.s32.totalorder %s5284_s22, %s5284_s22 }
  0x95   :  { %p5291_p12 = por %p5290_p11, %p5289_p10 }
  0x97   :  { %p5292_p13 = pnand %p5291_p12, %p5285_p9 }
  0x99   :  { %5295 = shalt.err (!%p5292_p13)
}
  0x9a   :  { %67 = dma.hbm_to_vmem [thread:$0]  %s6343_s10, 32, %s65_s0, [#allocation6]  }
  0x9b   :  { %s5431_s26 = smov [#allocation10]   ;;  %s5296_s4 = scalar_lea.hbm %s6305_s8, 12288 }
  0x9c   :  { %s91_s18 = sshll.u32 %s5431_s26, 4  ;;  %p5297_p0 = scmp.ne.s32.totalorder %s6305_s8, %s5296_s4  ;;  %s92_s18 = int_to_ptr.vmem [resolvable:$true] %s91_s18 }
  0x9d   :  { %p5300_p1 = scmp.lt.u32.totalorder %s5296_s4, %s6305_s8 }
  0x9f   :  { %p5302_p2 = pnand %p5300_p1, %p5297_p0 }
  0xa1   :  { %5305 = shalt.err (!%p5302_p2)
}
  0xa2   :  { %s5306_s6 = scalar_lea.vmem %s92_s18, 12288  ;;  %p5311_p4 = scmp.lt.s32.totalorder %s92_s18, %s92_s18 }
  0xa3   :  { %p5307_p3 = scmp.ne.s32.totalorder %s92_s18, %s5306_s6  ;;  %p5312_p5 = scmp.lt.s32.totalorder %s5306_s6, %s5306_s6 }
  0xa5   :  { %p5313_p6 = por %p5312_p5, %p5311_p4 }
  0xa7   :  { %p5314_p7 = pnand %p5313_p6, %p5307_p3 }
  0xa9   :  { %5317 = shalt.err (!%p5314_p7)
}
  0xaa   :  { %s5432_s0 = smov 384   ;;  %s5433_s10 = smov 24  }
  0xab   :  { %97 = dma.hbm_to_vmem [thread:$0]  %s6305_s8, 12288, %s92_s18, [#allocation9], %s5432_s0, %s5432_s0, %s5433_s10  }
  0xac   :  { %s5434_s23 = smov [#allocation13]   ;;  %s5435_s26 = smov [#allocation16]  }
  0xad   :  { %s119_s24 = sshll.u32 %s5434_s23, 4  ;;  %s147_s5 = sshll.u32 %s5435_s26, 4  ;;  %s120_s24 = int_to_ptr.vmem [resolvable:$true] %s119_s24  ;;  %s5666_s5 = int_to_ptr.vmem [resolvable:$true] %s147_s5 }
  0xae   :  { %s5318_s21 = scalar_lea.hbm %s6309_s12, 4096 }
  0xaf   :  { %p5319_p8 = scmp.ne.s32.totalorder %s6309_s12, %s5318_s21  ;;  %p5322_p9 = scmp.lt.u32.totalorder %s5318_s21, %s6309_s12 }
  0xb1   :  { %p5324_p10 = pnand %p5322_p9, %p5319_p8 }
  0xb3   :  { %5327 = shalt.err (!%p5324_p10)
}
  0xb4   :  { %s5328_s8 = scalar_lea.vmem %s120_s24, 4096  ;;  %p5333_p12 = scmp.lt.s32.totalorder %s120_s24, %s120_s24 }
  0xb5   :  { %p5329_p11 = scmp.ne.s32.totalorder %s120_s24, %s5328_s8  ;;  %p5334_p13 = scmp.lt.s32.totalorder %s5328_s8, %s5328_s8 }
  0xb7   :  { %p5335_p0 = por %p5334_p13, %p5333_p12 }
  0xb9   :  { %p5336_p1 = pnand %p5335_p0, %p5329_p11 }
  0xbb   :  { %5339 = shalt.err (!%p5336_p1)
}
  0xbc   :  { %125 = dma.hbm_to_vmem [thread:$0]  %s6309_s12, 4096, %s120_s24, [#allocation12], %s5425_s30, %s5425_s30, %s5426_s1  }
  0xbd   :  { %s5340_s22 = scalar_lea.hbm %s6313_s16, 4096 }
  0xbe   :  { %p5341_p2 = scmp.ne.s32.totalorder %s6313_s16, %s5340_s22  ;;  %p5344_p3 = scmp.lt.u32.totalorder %s5340_s22, %s6313_s16 }
  0xc0   :  { %p5346_p4 = pnand %p5344_p3, %p5341_p2 }
  0xc2   :  { %5349 = shalt.err (!%p5346_p4)
}
  0xc3   :  { %s5350_s21 = scalar_lea.vmem %s5666_s5, 4096  ;;  %p5355_p6 = scmp.lt.s32.totalorder %s5666_s5, %s5666_s5 }
  0xc4   :  { %p5351_p5 = scmp.ne.s32.totalorder %s5666_s5, %s5350_s21  ;;  %p5356_p7 = scmp.lt.s32.totalorder %s5350_s21, %s5350_s21 }
  0xc6   :  { %p5357_p8 = por %p5356_p7, %p5355_p6 }
  0xc8   :  { %p5358_p9 = pnand %p5357_p8, %p5351_p5 }
  0xca   :  { %5361 = shalt.err (!%p5358_p9)
}
  0xcb   :  { %153 = dma.hbm_to_vmem [thread:$0]  %s6313_s16, 4096, %s5666_s5, [#allocation15], %s5425_s30, %s5425_s30, %s5426_s1  }
  0xcc   :  { %s5436_s3 = smov [#allocation19]   ;;  %s5362_s8 = scalar_lea.hbm %s6317_s20, 4096 }
  0xcd   :  { %s175_s2 = sshll.u32 %s5436_s3, 4  ;;  %p5363_p10 = scmp.ne.s32.totalorder %s6317_s20, %s5362_s8  ;;  %s176_s2 = int_to_ptr.vmem [resolvable:$true] %s175_s2 }
  0xce   :  { %p5366_p11 = scmp.lt.u32.totalorder %s5362_s8, %s6317_s20 }
  0xd0   :  { %p5368_p12 = pnand %p5366_p11, %p5363_p10 }
  0xd2   :  { %5371 = shalt.err (!%p5368_p12)
}
  0xd3   :  { %s5372_s22 = scalar_lea.vmem %s176_s2, 4096  ;;  %p5377_p0 = scmp.lt.s32.totalorder %s176_s2, %s176_s2 }
  0xd4   :  { %p5373_p13 = scmp.ne.s32.totalorder %s176_s2, %s5372_s22  ;;  %p5378_p1 = scmp.lt.s32.totalorder %s5372_s22, %s5372_s22 }
  0xd6   :  { %p5379_p2 = por %p5378_p1, %p5377_p0 }
  0xd8   :  { %p5380_p3 = pnand %p5379_p2, %p5373_p13 }
  0xda   :  { %5383 = shalt.err (!%p5380_p3)
}
  0xdb   :  { %181 = dma.hbm_to_vmem [thread:$0]  %s6317_s20, 4096, %s176_s2, [#allocation18], %s5425_s30, %s5425_s30, %s5426_s1  }
  0xdc   :  { %5406 = dma.done.wait [#allocation3], 1024  }
  0xdd   :  { %5407 = vsyncadd [#allocation3], 4294966272 }
  0xde   :  { %5408 = dma.done.wait [#allocation6], 1056  }
  0xdf   :  { %5409 = vsyncadd [#allocation6], 4294966240 }
  0xe0   :  { %5410 = dma.done.wait [#allocation9], 12320  }
  0xe1   :  { %5411 = vsyncadd [#allocation9], 4294954976 }
  0xe2   :  { %5412 = dma.done.wait [#allocation12], 8192  }
  0xe3   :  { %5413 = vsyncadd [#allocation12], 4294959104 }
  0xe4   :  { %5414 = dma.done.wait [#allocation15], 12288  }
  0xe5   :  { %5415 = vsyncadd [#allocation15], 4294955008 }
  0xe6   :  { %5416 = dma.done.wait [#allocation18], 8192  }
  0xe7   :  { %5417 = vsyncadd [#allocation18], 4294959104  ;;  %v5718_v0 = vld [vmem:[#allocation2] sm:$0xff]  ;;  %v5720_v1 = vld [vmem:[#allocation2 + $0x8] sm:$0xff]  ;;  %vm5438_vm0 = vmmov 0   ;;  %vm1286_vm1 = vcmask 130048  }
  0xe8   :  { %v5722_v2 = vld [vmem:[#allocation2 + $0x20] sm:$0xff]  ;;  %v236_v3 = vadd.f32 %v5720_v1, %v5718_v0  ;;  %v5726_v4 = vld [vmem:[#allocation2 + $0x28] sm:$0xff]  ;;  %v5728_v5 = vld [vmem:[#allocation2 + $0x10] sm:$0xff]  ;;  %s6344_s26 = sld [smem:[#allocation32_spill]]  ;;  %s6345_s21 = sld [smem:[#allocation33_spill]] }
  0xe9   :  { %v5730_v6 = vld [vmem:[#allocation2 + $0x18] sm:$0xff]  ;;  %v242_v7 = vadd.f32 %v5726_v4, %v5722_v2  ;;  %v5734_v8 = vld [vmem:[#allocation2 + $0x30] sm:$0xff]  ;;  %v4566_v12 = vld [vmem:[#allocation10 + $0x4] ss:$24 sps:$4 sm:$0xff]   ;;  %s6346_s6 = sld [smem:[#allocation34_spill]]  ;;  %s6347_s25 = sld [smem:[#allocation35_spill]] }
  0xea   :  { %v5736_v9 = vld [vmem:[#allocation2 + $0x38] sm:$0xff]  ;;  %237 = vadd.xlane.f32.xlu0 %v236_v3  ;;  %v239_v10 = vadd.f32 %v5730_v6, %v5728_v5  ;;  %v4569_v14 = vld [vmem:[#allocation10 + $0xc] ss:$24 sps:$4 sm:$0xff]   ;;  %v4571_v15 = vld [vmem:[#allocation10 + $0x8] ss:$24 sps:$4 sm:$0xff]   ;;  %951 = vmatprep.subr.bf16.mxu0 %v4566_v12  ;;  %s5439_s22 = smov [#allocation20]  }
  0xeb   :  { %243 = vadd.xlane.f32.xlu1 %v242_v7  ;;  %v245_v11 = vadd.f32 %v5736_v9, %v5734_v8  ;;  %v4568_v13 = vld [vmem:[#allocation10] ss:$24 sps:$4 sm:$0xff]   ;;  %v4572_v16 = vld [vmem:[#allocation10 + $0x34] ss:$24 sps:$4 sm:$0xff]   ;;  %1004 = vmatprep.subr.bf16.mxu1 %v4569_v14  ;;  %v4574_v18 = vld [vmem:[#allocation10 + $0x30] ss:$24 sps:$4 sm:$0xff]  }
  0xec   :  { %v4575_v17 = vld [vmem:[#allocation10 + $0x3c] ss:$24 sps:$4 sm:$0xff]   ;;  %952 = vmatpush1.bf16.msra.mxu0 %v4568_v13  ;;  %1005 = vmatpush1.bf16.msra.mxu1 %v4571_v15  ;;  %v4577_v19 = vld [vmem:[#allocation10 + $0x38] ss:$24 sps:$4 sm:$0xff]   ;;  %v4581_v21 = vld [vmem:[#allocation10 + $0x6c] ss:$24 sps:$4 sm:$0xff]  }
  0xed   :  { %953 = vmatprep.subr.bf16.mxu0 %v4572_v16  ;;  %1006 = vmatprep.subr.bf16.mxu1 %v4575_v17  ;;  %v4578_v20 = vld [vmem:[#allocation10 + $0x64] ss:$24 sps:$4 sm:$0xff]   ;;  %v4580_v22 = vld [vmem:[#allocation10 + $0x60] ss:$24 sps:$4 sm:$0xff]   ;;  %v4584_v24 = vld [vmem:[#allocation10 + $0x94] ss:$24 sps:$4 sm:$0xff]  }
  0xee   :  { %240 = vadd.xlane.f32.xlu0 %v239_v10  ;;  %v4583_v23 = vld [vmem:[#allocation10 + $0x68] ss:$24 sps:$4 sm:$0xff]   ;;  %v4587_v25 = vld [vmem:[#allocation10 + $0x9c] ss:$24 sps:$4 sm:$0xff]   ;;  %v4589_v27 = vld [vmem:[#allocation10 + $0x98] ss:$24 sps:$4 sm:$0xff]  }
  0xef   :  { %246 = vadd.xlane.f32.xlu1 %v245_v11  ;;  %v4586_v26 = vld [vmem:[#allocation10 + $0x90] ss:$24 sps:$4 sm:$0xff]   ;;  %v4590_v28 = vld [vmem:[#allocation10 + $0xc4] ss:$24 sps:$4 sm:$0xff]   ;;  %v4592_v30 = vld [vmem:[#allocation10 + $0xc0] ss:$24 sps:$4 sm:$0xff]  }
  0xf0   :  { %954 = vmatpush1.bf16.msra.mxu0 %v4574_v18  ;;  %1007 = vmatpush1.bf16.msra.mxu1 %v4577_v19  ;;  %v4593_v29 = vld [vmem:[#allocation10 + $0xcc] ss:$24 sps:$4 sm:$0xff]   ;;  %v4595_v31 = vld [vmem:[#allocation10 + $0xc8] ss:$24 sps:$4 sm:$0xff]   ;;  %v4599_v33 = vld [vmem:[#allocation10 + $0xfc] ss:$24 sps:$4 sm:$0xff]  }
  0xf1   :  { %955 = vmatprep.subr.bf16.mxu0 %v4578_v20  ;;  %1008 = vmatprep.subr.bf16.mxu1 %v4581_v21  ;;  %v4596_v32 = vld [vmem:[#allocation10 + $0xf4] ss:$24 sps:$4 sm:$0xff]   ;;  %v4598_v34 = vld [vmem:[#allocation10 + $0xf0] ss:$24 sps:$4 sm:$0xff]   ;;  %v4602_v36 = vld [vmem:[#allocation10 + $0x124] ss:$24 sps:$4 sm:$0xff]  }
  0xf2   :  { %v4601_v35 = vld [vmem:[#allocation10 + $0xf8] ss:$24 sps:$4 sm:$0xff]   ;;  %v4605_v37 = vld [vmem:[#allocation10 + $0x12c] ss:$24 sps:$4 sm:$0xff]   ;;  %v4607_v39 = vld [vmem:[#allocation10 + $0x128] ss:$24 sps:$4 sm:$0xff]  }
  0xf3   :  { %v4604_v38 = vld [vmem:[#allocation10 + $0x120] ss:$24 sps:$4 sm:$0xff]   ;;  %v4608_v40 = vld [vmem:[#allocation10 + $0x154] ss:$24 sps:$4 sm:$0xff]   ;;  %v4610_v42 = vld [vmem:[#allocation10 + $0x150] ss:$24 sps:$4 sm:$0xff]  }
  0xf4   :  { %956 = vmatpush1.bf16.msra.mxu0 %v4580_v22  ;;  %1009 = vmatpush1.bf16.msra.mxu1 %v4583_v23  ;;  %v4611_v41 = vld [vmem:[#allocation10 + $0x15c] ss:$24 sps:$4 sm:$0xff]   ;;  %v4613_v43 = vld [vmem:[#allocation10 + $0x158] ss:$24 sps:$4 sm:$0xff]   ;;  %v4617_v45 = vld [vmem:[#allocation10 + $0x18c] ss:$24 sps:$4 sm:$0xff]  }
  0xf5   :  { %957 = vmatprep.subr.bf16.mxu0 %v4584_v24  ;;  %1010 = vmatprep.subr.bf16.mxu1 %v4587_v25  ;;  %v4614_v44 = vld [vmem:[#allocation10 + $0x184] ss:$24 sps:$4 sm:$0xff]   ;;  %v4616_v46 = vld [vmem:[#allocation10 + $0x180] ss:$24 sps:$4 sm:$0xff]   ;;  %v4620_v48 = vld [vmem:[#allocation10 + $0x1b4] ss:$24 sps:$4 sm:$0xff]  }
  0xf6   :  { %v4619_v47 = vld [vmem:[#allocation10 + $0x188] ss:$24 sps:$4 sm:$0xff]   ;;  %v4623_v14 = vld [vmem:[#allocation10 + $0x1bc] ss:$24 sps:$4 sm:$0xff]   ;;  %v4625_v15 = vld [vmem:[#allocation10 + $0x1b8] ss:$24 sps:$4 sm:$0xff]  }
  0xf7   :  { %v4626_v16 = vld [vmem:[#allocation10 + $0x1e4] ss:$24 sps:$4 sm:$0xff]   ;;  %v4628_v17 = vld [vmem:[#allocation10 + $0x1e0] ss:$24 sps:$4 sm:$0xff]   ;;  %v4632_v20 = vld [vmem:[#allocation10 + $0x214] ss:$24 sps:$4 sm:$0xff]  }
  0xf8   :  { %958 = vmatpush1.bf16.msra.mxu0 %v4586_v26  ;;  %1011 = vmatpush1.bf16.msra.mxu1 %v4589_v27  ;;  %v4629_v18 = vld [vmem:[#allocation10 + $0x1ec] ss:$24 sps:$4 sm:$0xff]   ;;  %v4631_v19 = vld [vmem:[#allocation10 + $0x1e8] ss:$24 sps:$4 sm:$0xff]   ;;  %v4635_v22 = vld [vmem:[#allocation10 + $0x21c] ss:$24 sps:$4 sm:$0xff]  }
  0xf9   :  { %959 = vmatprep.subr.bf16.mxu0 %v4590_v28  ;;  %1012 = vmatprep.subr.bf16.mxu1 %v4593_v29  ;;  %v4634_v21 = vld [vmem:[#allocation10 + $0x210] ss:$24 sps:$4 sm:$0xff]   ;;  %v4638_v24 = vld [vmem:[#allocation10 + $0x244] ss:$24 sps:$4 sm:$0xff]   ;;  %v4640_v25 = vld [vmem:[#allocation10 + $0x240] ss:$24 sps:$4 sm:$0xff]  }
  0xfa   :  { %v4637_v23 = vld [vmem:[#allocation10 + $0x218] ss:$24 sps:$4 sm:$0xff]   ;;  %v4641_v26 = vld [vmem:[#allocation10 + $0x24c] ss:$24 sps:$4 sm:$0xff]   ;;  %v4643_v27 = vld [vmem:[#allocation10 + $0x248] ss:$24 sps:$4 sm:$0xff]  }
  0xfb   :  { %v4644_v28 = vld [vmem:[#allocation10 + $0x274] ss:$24 sps:$4 sm:$0xff]   ;;  %v4646_v29 = vld [vmem:[#allocation10 + $0x270] ss:$24 sps:$4 sm:$0xff]   ;;  %s4073_s16 = sshll.u32 %s5439_s22, 4  ;;  %s4074_s16 = int_to_ptr.vmem [resolvable:$true] %s4073_s16 }
  0xfc   :  { %960 = vmatpush1.bf16.msra.mxu0 %v4592_v30  ;;  %1013 = vmatpush1.bf16.msra.mxu1 %v4595_v31  ;;  %v4647_v30 = vld [vmem:[#allocation10 + $0x27c] ss:$24 sps:$4 sm:$0xff]   ;;  %v4649_v31 = vld [vmem:[#allocation10 + $0x278] ss:$24 sps:$4 sm:$0xff]   ;;  %s5384_s5 = scalar_lea.vmem %s4074_s16, 1024  ;;  %p5389_p5 = scmp.lt.s32.totalorder %s4074_s16, %s4074_s16 }
  0xfd   :  { %961 = vmatprep.subr.bf16.mxu0 %v4596_v32  ;;  %1014 = vmatprep.subr.bf16.mxu1 %v4599_v33  ;;  %v4650_v32 = vld [vmem:[#allocation10 + $0x2a4] ss:$24 sps:$4 sm:$0xff]   ;;  %p5385_p4 = scmp.ne.s32.totalorder %s4074_s16, %s5384_s5  ;;  %p5390_p6 = scmp.lt.s32.totalorder %s5384_s5, %s5384_s5 }
  0xfe   :  { %v4653_v33 = vld [vmem:[#allocation10 + $0x2ac] ss:$24 sps:$4 sm:$0xff]  }
  0xff   :  { %p5391_p7 = por %p5390_p6, %p5389_p5 }
 0x100   :  { %962 = vmatpush1.bf16.msra.mxu0 %v4598_v34  ;;  %1015 = vmatpush1.bf16.msra.mxu1 %v4601_v35  ;;  %v4652_v34 = vld [vmem:[#allocation10 + $0x2a0] ss:$24 sps:$4 sm:$0xff]  }
 0x101   :  { %963 = vmatprep.subr.bf16.mxu0 %v4602_v36  ;;  %1016 = vmatprep.subr.bf16.mxu1 %v4605_v37  ;;  %v4655_v35 = vld [vmem:[#allocation10 + $0x2a8] ss:$24 sps:$4 sm:$0xff]   ;;  %v4656_v36 = vld [vmem:[#allocation10 + $0x2d4] ss:$24 sps:$4 sm:$0xff]   ;;  %p5392_p8 = pnand %p5391_p7, %p5385_p4 }
 0x102   :  { %v4659_v37 = vld [vmem:[#allocation10 + $0x2dc] ss:$24 sps:$4 sm:$0xff]  }
 0x104   :  { %964 = vmatpush1.bf16.msra.mxu0 %v4604_v38  ;;  %1017 = vmatpush1.bf16.msra.mxu1 %v4607_v39  ;;  %v4658_v38 = vld [vmem:[#allocation10 + $0x2d0] ss:$24 sps:$4 sm:$0xff]  }
 0x105   :  { %965 = vmatprep.subr.bf16.mxu0 %v4608_v40  ;;  %1018 = vmatprep.subr.bf16.mxu1 %v4611_v41  ;;  %v4661_v39 = vld [vmem:[#allocation10 + $0x2d8] ss:$24 sps:$4 sm:$0xff]   ;;  %v4664_v40 = vld [vmem:[#allocation10 + $0x14] ss:$24 sps:$4 sm:$0xff]  }
 0x108   :  { %966 = vmatpush1.bf16.msra.mxu0 %v4610_v42  ;;  %1019 = vmatpush1.bf16.msra.mxu1 %v4613_v43 }
 0x109   :  { %967 = vmatprep.subr.bf16.mxu0 %v4614_v44  ;;  %1020 = vmatprep.subr.bf16.mxu1 %v4617_v45  ;;  %v302_v44 = vlaneseq }
 0x10c   :  { %968 = vmatpush1.bf16.msra.mxu0 %v4616_v46  ;;  %1021 = vmatpush1.bf16.msra.mxu1 %v4619_v47 }
 0x10d   :  { %969 = vmatprep.subr.bf16.mxu0 %v4620_v48  ;;  %1022 = vmatprep.subr.bf16.mxu1 %v4623_v14 }
 0x110   :  { %1023 = vmatpush1.bf16.msra.mxu1 %v4625_v15 }
 0x111   :  { %1024 = vmatprep.subr.bf16.mxu1 %v4629_v18 }
 0x114   :  { %1025 = vmatpush1.bf16.msra.mxu1 %v4631_v19 }
 0x115   :  { %1026 = vmatprep.subr.bf16.mxu1 %v4635_v22 }
 0x118   :  { %1027 = vmatpush1.bf16.msra.mxu1 %v4637_v23 }
 0x119   :  { %1028 = vmatprep.subr.bf16.mxu1 %v4641_v26 }
 0x11c   :  { %1029 = vmatpush1.bf16.msra.mxu1 %v4643_v27 }
 0x11d   :  { %1030 = vmatprep.subr.bf16.mxu1 %v4647_v30 }
 0x120   :  { %1031 = vmatpush1.bf16.msra.mxu1 %v4649_v31  ;;  %v4670_v31 = vld [vmem:[#allocation10 + $0x74] ss:$24 sps:$4 sm:$0xff]  }
 0x121   :  { %1032 = vmatprep.subr.bf16.mxu1 %v4653_v33 }
 0x124   :  { %1033 = vmatpush1.bf16.msra.mxu1 %v4655_v35 }
 0x125   :  { %1034 = vmatprep.subr.bf16.mxu1 %v4659_v37  ;;  %v4671_v37 = vld [vmem:[#allocation10 + $0xa0] ss:$24 sps:$4 sm:$0xff]  }
 0x128   :  { %1035 = vmatpush1.bf16.msra.mxu1 %v4661_v39  ;;  %v4674_v39 = vld [vmem:[#allocation10 + $0xd0] ss:$24 sps:$4 sm:$0xff]  }
 0x177   :  { %v238_v49 = vpop.xlane.xlu0 %237 }
 0x178   :  { %v249_v50 = vmul.f32 0.00390625, %v238_v49  ;;  %v244_v51 = vpop.xlane.xlu1 %243 }
 0x179   :  { %v251_v52 = vmul.f32 0.00390625, %v244_v51  ;;  %v5782_v51 = vshrl.u32 %v302_v44, 7  ;;  %v4685_v44 = vld [vmem:[#allocation10 + $0x164] ss:$24 sps:$4 sm:$0xff]  }
 0x17a   :  { %v5743_v53 = vsub.f32 %v5718_v0, %v249_v50  ;;  %v5746_v54 = vsub.f32 %v5720_v1, %v249_v50 }
 0x17b   :  { %v5749_v55 = vsub.f32 %v5722_v2, %v251_v52  ;;  %v5752_v56 = vsub.f32 %v5726_v4, %v251_v52  ;;  %v241_v57 = vpop.xlane.xlu0 %240 }
 0x17c   :  { %v250_v58 = vmul.f32 0.00390625, %v241_v57  ;;  %v247_v59 = vpop.xlane.xlu1 %246  ;;  %v261_v60 = vmul.f32 %v5743_v53, %v5743_v53  ;;  %v262_v61 = vmul.f32 %v5746_v54, %v5746_v54 }
 0x17d   :  { %v252_v62 = vmul.f32 0.00390625, %v247_v59  ;;  %v265_v63 = vmul.f32 %v5749_v55, %v5749_v55  ;;  %v266_v0 = vmul.f32 %v5752_v56, %v5752_v56  ;;  %v5785_v59 = vsub.s32 1, %v5782_v51 }
 0x17e   :  { %v5763_v1 = vsub.f32 %v5728_v5, %v250_v58  ;;  %v5766_v2 = vsub.f32 %v5730_v6, %v250_v58  ;;  %v269_v3 = vadd.f32 %v262_v61, %v261_v60  ;;  %v5788_v60 = vsub.s32 0, %v5782_v51  ;;  %v234_v61 = vld [vmem:[#allocation7] sm:$0x3] }
 0x17f   :  { %v5769_v4 = vsub.f32 %v5734_v8, %v252_v62  ;;  %v5772_v7 = vsub.f32 %v5736_v9, %v252_v62  ;;  %v275_v10 = vadd.f32 %v266_v0, %v265_v63  ;;  %v4622_v9 = vld [vmem:[#allocation10 + $0x1b0] ss:$24 sps:$4 sm:$0xff]   ;;  %v309_v63 = vrot.slane %v234_v61, %v5785_v59 }
 0x180   :  { %270 = vadd.xlane.f32.xlu0 %v269_v3  ;;  %v263_v11 = vmul.f32 %v5763_v1, %v5763_v1  ;;  %v264_v12 = vmul.f32 %v5766_v2, %v5766_v2  ;;  %970 = vmatpush1.bf16.msra.mxu0 %v4622_v9  ;;  %v305_v0 = vrot.slane %v234_v61, %v5788_v60  ;;  %v235_v3 = vld [vmem:[#allocation8] sm:$0x3]  ;;  %v4700_v61 = vld [vmem:[#allocation10 + $0x254] ss:$24 sps:$4 sm:$0xff]  }
 0x181   :  { %v267_v5 = vmul.f32 %v5769_v4, %v5769_v4  ;;  %v268_v6 = vmul.f32 %v5772_v7, %v5772_v7  ;;  %971 = vmatprep.subr.bf16.mxu0 %v4626_v16 }
 0x182   :  { %v272_v13 = vadd.f32 %v264_v12, %v263_v11 }
 0x183   :  { %v278_v8 = vadd.f32 %v268_v6, %v267_v5  ;;  %v328_v6 = vrot.slane %v235_v3, %v5785_v59 }
 0x184   :  { %276 = vadd.xlane.f32.xlu0 %v275_v10  ;;  %273 = vadd.xlane.f32.xlu1 %v272_v13 }
 0x185   :  { %972 = vmatpush1.bf16.msra.mxu0 %v4628_v17 }
 0x186   :  { %973 = vmatprep.subr.bf16.mxu0 %v4632_v20 }
 0x188   :  { %279 = vadd.xlane.f32.xlu1 %v278_v8  ;;  %v324_v8 = vrot.slane %v235_v3, %v5788_v60  ;;  %v4706_v3 = vld [vmem:[#allocation10 + $0x2b4] ss:$24 sps:$4 sm:$0xff]  }
 0x189   :  { %974 = vmatpush1.bf16.msra.mxu0 %v4634_v21 }
 0x18a   :  { %975 = vmatprep.subr.bf16.mxu0 %v4638_v24 }
 0x18d   :  { %976 = vmatpush1.bf16.msra.mxu0 %v4640_v25 }
 0x18e   :  { %977 = vmatprep.subr.bf16.mxu0 %v4644_v28 }
 0x191   :  { %978 = vmatpush1.bf16.msra.mxu0 %v4646_v29 }
 0x192   :  { %979 = vmatprep.subr.bf16.mxu0 %v4650_v32 }
 0x195   :  { %980 = vmatpush1.bf16.msra.mxu0 %v4652_v34  ;;  %v4668_v34 = vld [vmem:[#allocation10 + $0x70] ss:$24 sps:$4 sm:$0xff]  }
 0x196   :  { %981 = vmatprep.subr.bf16.mxu0 %v4656_v36  ;;  %v4673_v36 = vld [vmem:[#allocation10 + $0xa4] ss:$24 sps:$4 sm:$0xff]  }
 0x199   :  { %982 = vmatpush1.bf16.msra.mxu0 %v4658_v38  ;;  %v4676_v38 = vld [vmem:[#allocation10 + $0xd4] ss:$24 sps:$4 sm:$0xff]  }
 0x19a   :  { %1057 = vmatprep.subr.bf16.mxu0 %v4664_v40  ;;  %v4679_v40 = vld [vmem:[#allocation10 + $0x104] ss:$24 sps:$4 sm:$0xff]  }
 0x20d   :  { %v271_v41 = vpop.xlane.xlu0 %270 }
 0x20e   :  { %v281_v42 = vmul.f32 0.00390625, %v271_v41  ;;  %v4677_v41 = vld [vmem:[#allocation10 + $0x100] ss:$24 sps:$4 sm:$0xff]  }
 0x210   :  { %v285_v43 = vadd.f32 1e-05, %v281_v42  ;;  %v4682_v42 = vld [vmem:[#allocation10 + $0x134] ss:$24 sps:$4 sm:$0xff]  }
 0x211   :  { %v274_v45 = vpop.xlane.xlu1 %273  ;;  %v277_v46 = vpop.xlane.xlu0 %276 }
 0x212   :  { %5046 = vrsqrt.f32 %v285_v43  ;;  %v282_v47 = vmul.f32 0.00390625, %v274_v45  ;;  %v283_v48 = vmul.f32 0.00390625, %v277_v46  ;;  %v4680_v43 = vld [vmem:[#allocation10 + $0x130] ss:$24 sps:$4 sm:$0xff]   ;;  %v4683_v45 = vld [vmem:[#allocation10 + $0x160] ss:$24 sps:$4 sm:$0xff]  }
 0x213   :  { %v4688_v46 = vld [vmem:[#allocation10 + $0x194] ss:$24 sps:$4 sm:$0xff]  }
 0x214   :  { %v286_v49 = vadd.f32 1e-05, %v282_v47  ;;  %v287_v50 = vadd.f32 1e-05, %v283_v48  ;;  %v4686_v47 = vld [vmem:[#allocation10 + $0x190] ss:$24 sps:$4 sm:$0xff]  }
 0x215   :  { %v280_v52 = vpop.xlane.xlu1 %279  ;;  %v4691_v48 = vld [vmem:[#allocation10 + $0x1c4] ss:$24 sps:$4 sm:$0xff]  }
 0x216   :  { %5048 = vrsqrt.f32 %v286_v49  ;;  %v284_v57 = vmul.f32 0.00390625, %v280_v52  ;;  %v4689_v49 = vld [vmem:[#allocation10 + $0x1c0] ss:$24 sps:$4 sm:$0xff]   ;;  %v4692_v52 = vld [vmem:[#allocation10 + $0x1f0] ss:$24 sps:$4 sm:$0xff]  }
 0x217   :  { %5050 = vrsqrt.f32 %v287_v50  ;;  %v4694_v50 = vld [vmem:[#allocation10 + $0x1f4] ss:$24 sps:$4 sm:$0xff]  }
 0x218   :  { %v288_v58 = vadd.f32 1e-05, %v284_v57  ;;  %v4697_v57 = vld [vmem:[#allocation10 + $0x224] ss:$24 sps:$4 sm:$0xff]  }
 0x21a   :  { %5052 = vrsqrt.f32 %v288_v58  ;;  %v4695_v58 = vld [vmem:[#allocation10 + $0x220] ss:$24 sps:$4 sm:$0xff]  }
 0x21c   :  { %v5047_v62 = vpop.eup %5046 }
 0x21d   :  { %v294_v10 = vmul.f32 %v5047_v62, %v5746_v54  ;;  %v293_v11 = vmul.f32 %v5047_v62, %v5743_v53  ;;  %v4698_v62 = vld [vmem:[#allocation10 + $0x250] ss:$24 sps:$4 sm:$0xff]  }
 0x21f   :  { %v313_v5 = vmul.f32 %v309_v63, %v294_v10  ;;  %v312_v13 = vmul.f32 %v305_v0, %v293_v11  ;;  %v4704_v10 = vld [vmem:[#allocation10 + $0x2b0] ss:$24 sps:$4 sm:$0xff]   ;;  %v4709_v11 = vld [vmem:[#allocation10 + $0x2e4] ss:$24 sps:$4 sm:$0xff]  }
 0x220   :  { %v5049_v12 = vpop.eup %5048 }
 0x221   :  { %v5051_v9 = vpop.eup %5050  ;;  %v296_v14 = vmul.f32 %v5049_v12, %v5766_v2  ;;  %v295_v15 = vmul.f32 %v5049_v12, %v5763_v1  ;;  %v332_v54 = vadd.f32 %v328_v6, %v313_v5  ;;  %v331_v20 = vadd.f32 %v324_v8, %v312_v13  ;;  %v4662_v2 = vld [vmem:[#allocation10 + $0x10] ss:$24 sps:$4 sm:$0xff]   ;;  %v4707_v12 = vld [vmem:[#allocation10 + $0x2e0] ss:$24 sps:$4 sm:$0xff]  }
 0x222   :  { %v298_v16 = vmul.f32 %v5051_v9, %v5752_v56  ;;  %v297_v25 = vmul.f32 %v5051_v9, %v5749_v55  ;;  %v4667_v56 = vld [vmem:[#allocation10 + $0x44] ss:$24 sps:$4 sm:$0xff]   ;;  %v4665_v55 = vld [vmem:[#allocation10 + $0x40] ss:$24 sps:$4 sm:$0xff]   ;;  %v5437_v5 = vmov 0.0  }
 0x223   :  { %v315_v17 = vmul.f32 %v309_v63, %v296_v14  ;;  %v314_v18 = vmul.f32 %v305_v0, %v295_v15  ;;  %4468 = vmatprep.subr.bf16.mxu1 %v5437_v5  ;;  %v5822_v13 = vld [vmem:[%s6306_s9] sm:$0x3f] }
 0x224   :  { %v5053_v19 = vpop.eup %5052  ;;  %v317_v53 = vmul.f32 %v309_v63, %v298_v16  ;;  %v444_v9 = vrot.slane %v5822_v13, %v5788_v60 }
 0x225   :  { %v334_v21 = vadd.f32 %v328_v6, %v315_v17  ;;  %v333_v22 = vadd.f32 %v324_v8, %v314_v18  ;;  %v300_v23 = vmul.f32 %v5053_v19, %v5772_v7  ;;  %v299_v24 = vmul.f32 %v5053_v19, %v5769_v4 }
 0x226   :  { %v336_v29 = vadd.f32 %v328_v6, %v317_v53  ;;  %v316_v7 = vmul.f32 %v305_v0, %v297_v25  ;;  %v448_v17 = vrot.slane %v5822_v13, %v5785_v59 }
 0x227   :  { %v436_v26 = vpack.c.bf16 %v334_v21, %v332_v54  ;;  %v5802_v27 = vpack.c.bf16 %v333_v22, %v331_v20  ;;  %v319_v1 = vmul.f32 %v309_v63, %v300_v23  ;;  %v318_v28 = vmul.f32 %v305_v0, %v299_v24  ;;  %v4703_v63 = vld [vmem:[#allocation10 + $0x284] ss:$24 sps:$4 sm:$0xff]   ;;  %v4701_v0 = vld [vmem:[#allocation10 + $0x280] ss:$24 sps:$4 sm:$0xff]  }
 0x228   :  { %v335_v33 = vadd.f32 %v324_v8, %v316_v7 }
 0x229   :  { %983 = vmatprep.mubr.bf16.mxu0 %v436_v26  ;;  %1036 = vmatprep.mubr.bf16.mxu1 %v436_v26  ;;  %v338_v30 = vadd.f32 %v328_v6, %v319_v1  ;;  %v337_v32 = vadd.f32 %v324_v8, %v318_v28  ;;  %v451_v6 = vsub.s32 2, %v5782_v51  ;;  %v455_v8 = vsub.s32 3, %v5782_v51 }
 0x22a   :  { %984 = vmatmul.mubr.bf16.vlgmr.msra.gmra.mrb[0].mxu0 %v5802_v27  ;;  %1037 = vmatmul.mubr.bf16.vlgmr.msra.gmra.mrb[0].mxu1 %v5802_v27 }
 0x22b   :  { %1058 = vmatpush1.bf16.msra.mxu0 %v4662_v2  ;;  %v5806_v4 = vpack.c.bf16 %v338_v30, %v336_v29  ;;  %v437_v35 = vpack.c.bf16 %v337_v32, %v335_v33  ;;  %v452_v14 = vrot.slane %v5822_v13, %v451_v6  ;;  %v456_v18 = vrot.slane %v5822_v13, %v455_v8 }
 0x22c   :  { %1059 = vmatprep.subr.bf16.mxu0 %v4667_v56 }
 0x22d   :  { %993 = vmatprep.mubr.bf16.mxu0 %v5806_v4  ;;  %1046 = vmatprep.mubr.bf16.mxu1 %v5806_v4 }
 0x22f   :  { %1060 = vmatpush1.bf16.msra.mxu0 %v4665_v55 }
 0x230   :  { %1061 = vmatprep.subr.bf16.mxu0 %v4670_v31 }
 0x232   :  { %994 = vmatmul.mubr.bf16.gmra.mrb[4].mxu0 %v437_v35  ;;  %1047 = vmatmul.mubr.bf16.gmra.mrb[4].mxu1 %v437_v35 }
 0x233   :  { %1062 = vmatpush1.bf16.msra.mxu0 %v4668_v34  ;;  %1089 = vmatprep.mubr.bf16.mxu0 %v436_v26 }
 0x234   :  { %1063 = vmatprep.subr.bf16.mxu0 %v4673_v36  ;;  %4470 = vmatprep.mubr.msk.bf16.mxu1 %vm5438_vm0, %v5437_v5 }
 0x237   :  { %1064 = vmatpush1.bf16.msra.mxu0 %v4671_v37 }
 0x238   :  { %1065 = vmatprep.subr.bf16.mxu0 %v4676_v38 }
 0x23b   :  { %1066 = vmatpush1.bf16.msra.mxu0 %v4674_v39 }
 0x23c   :  { %1067 = vmatprep.subr.bf16.mxu0 %v4679_v40 }
 0x23f   :  { %1068 = vmatpush1.bf16.msra.mxu0 %v4677_v41 }
 0x240   :  { %1069 = vmatprep.subr.bf16.mxu0 %v4682_v42 }
 0x243   :  { %1070 = vmatpush1.bf16.msra.mxu0 %v4680_v43 }
 0x244   :  { %1071 = vmatprep.subr.bf16.mxu0 %v4685_v44 }
 0x247   :  { %1072 = vmatpush1.bf16.msra.mxu0 %v4683_v45 }
 0x248   :  { %1073 = vmatprep.subr.bf16.mxu0 %v4688_v46 }
 0x24b   :  { %1074 = vmatpush1.bf16.msra.mxu0 %v4686_v47 }
 0x24c   :  { %1075 = vmatprep.subr.bf16.mxu0 %v4691_v48 }
 0x24f   :  { %1076 = vmatpush1.bf16.msra.mxu0 %v4689_v49  ;;  %v459_v49 = vsub.s32 4, %v5782_v51 }
 0x250   :  { %1077 = vmatprep.subr.bf16.mxu0 %v4694_v50  ;;  %v463_v50 = vsub.s32 5, %v5782_v51 }
 0x253   :  { %1078 = vmatpush1.bf16.msra.mxu0 %v4692_v52  ;;  %v460_v52 = vrot.slane %v5822_v13, %v459_v49 }
 0x254   :  { %1079 = vmatprep.subr.bf16.mxu0 %v4697_v57 }
 0x257   :  { %1080 = vmatpush1.bf16.msra.mxu0 %v4695_v58  ;;  %v464_v58 = vrot.slane %v5822_v13, %v463_v50 }
 0x258   :  { %1081 = vmatprep.subr.bf16.mxu0 %v4700_v61 }
 0x25b   :  { %1082 = vmatpush1.bf16.msra.mxu0 %v4698_v62 }
 0x25c   :  { %1083 = vmatprep.subr.bf16.mxu0 %v4703_v63 }
 0x25f   :  { %1084 = vmatpush1.bf16.msra.mxu0 %v4701_v0 }
 0x260   :  { %1085 = vmatprep.subr.bf16.mxu0 %v4706_v3 }
 0x263   :  { %1086 = vmatpush1.bf16.msra.mxu0 %v4704_v10 }
 0x264   :  { %1087 = vmatprep.subr.bf16.mxu0 %v4709_v11 }
 0x267   :  { %1088 = vmatpush1.bf16.msra.mxu0 %v4707_v12 }
 0x268   :  { %4450 = vmatprep.subr.bf16.mxu0 %v5437_v5 }
 0x26a   :  { %1090 = vmatmul.mubr.bf16.vlgmr.msra.gmra.mrb[8].mxu0 %v5802_v27 }
 0x26b   :  { %1099 = vmatprep.mubr.bf16.mxu0 %v5806_v4 }
 0x272   :  { %1100 = vmatmul.mubr.bf16.gmra.mrb[12].mxu0 %v437_v35 }
 0x273   :  { %4452 = vmatprep.mubr.msk.bf16.mxu0 %vm5438_vm0, %v5437_v5 }
 0x2fd   :  { %v985_v15 = vpop.f32.mrb[0].mxu0  ;;  %v1038_v16 = vpop.f32.mrb[0].mxu1 }
 0x2fe   :  { %v987_v19 = vpop.f32.mrb[1].mxu0  ;;  %v1040_v54 = vpop.f32.mrb[1].mxu1  ;;  %v986_v21 = vadd.f32 %v985_v15, %v444_v9  ;;  %v1039_v22 = vadd.f32 %v1038_v16, %v452_v14 }
 0x2ff   :  { %v989_v20 = vpop.f32.mrb[2].mxu0  ;;  %v1042_v53 = vpop.f32.mrb[2].mxu1  ;;  %v988_v2 = vadd.f32 %v987_v19, %v448_v17  ;;  %v1041_v27 = vadd.f32 %v1040_v54, %v456_v18 }
 0x300   :  { %v990_v23 = vadd.f32 %v989_v20, %v444_v9  ;;  %v1043_v24 = vadd.f32 %v1042_v53, %v452_v14  ;;  %v991_v25 = vpop.f32.mrb[3].mxu0  ;;  %v1044_v26 = vpop.f32.mrb[3].mxu1 }
 0x301   :  { %v992_v1 = vadd.f32 %v991_v25, %v448_v17  ;;  %v1045_v56 = vadd.f32 %v1044_v26, %v456_v18 }
 0x302   :  { %v1110_v28 = vpack.c.bf16 %v990_v23, %v986_v21  ;;  %v1114_v29 = vpack.c.bf16 %v1043_v24, %v1039_v22 }
 0x303   :  { %v1112_v30 = vpack.c.bf16 %v992_v1, %v988_v2  ;;  %v1116_v7 = vpack.c.bf16 %v1045_v56, %v1041_v27 }
 0x304   :  { %4451 = vmatpush3.bf16.xpose.msra.mxu0 %v1114_v29 }
 0x305   :  { %v995_v4 = vpop.f32.mrb[4].mxu0  ;;  %v1048_v55 = vpop.f32.mrb[4].mxu1  ;;  %4456 = vmatprep.subr.bf16.mxu0 %v5437_v5 }
 0x306   :  { %v997_v31 = vpop.f32.mrb[5].mxu0  ;;  %v1050_v32 = vpop.f32.mrb[5].mxu1  ;;  %v996_v35 = vadd.f32 %v995_v4, %v444_v9  ;;  %v1049_v36 = vadd.f32 %v1048_v55, %v452_v14 }
 0x307   :  { %v999_v33 = vpop.f32.mrb[6].mxu0  ;;  %v1052_v34 = vpop.f32.mrb[6].mxu1  ;;  %v998_v41 = vadd.f32 %v997_v31, %v448_v17  ;;  %v1051_v42 = vadd.f32 %v1050_v32, %v456_v18 }
 0x308   :  { %v1000_v37 = vadd.f32 %v999_v33, %v444_v9  ;;  %v1053_v38 = vadd.f32 %v1052_v34, %v452_v14  ;;  %v1001_v39 = vpop.f32.mrb[7].mxu0  ;;  %v1054_v40 = vpop.f32.mrb[7].mxu1 }
 0x309   :  { %v1002_v43 = vadd.f32 %v1001_v39, %v448_v17  ;;  %v1055_v44 = vadd.f32 %v1054_v40, %v456_v18 }
 0x30a   :  { %v1111_v45 = vpack.c.bf16 %v1000_v37, %v996_v35  ;;  %v1115_v46 = vpack.c.bf16 %v1053_v38, %v1049_v36 }
 0x30b   :  { %v1113_v47 = vpack.c.bf16 %v1002_v43, %v998_v41  ;;  %v1117_v48 = vpack.c.bf16 %v1055_v44, %v1051_v42  ;;  %4453 = vmatmul.mubr.bf16.vlgmr.msra.gmra.mrb[16].mxu0 %v1110_v28 }
 0x30c   :  { %4457 = vmatpush3.bf16.xpose.msra.mxu0 %v1115_v46  ;;  %4458 = vmatprep.mubr.msk.bf16.mxu0 %vm5438_vm0, %v5437_v5 }
 0x30d   :  { %4469 = vmatpush3.bf16.xpose.msra.mxu1 %v1117_v48  ;;  %4462 = vmatprep.subr.bf16.mxu0 %v5437_v5 }
 0x30e   :  { %4474 = vmatprep.subr.bf16.mxu1 %v5437_v5 }
 0x313   :  { %4459 = vmatmul.mubr.bf16.vlgmr.msra.gmra.mrb[20].mxu0 %v1111_v45 }
 0x314   :  { %4463 = vmatpush3.bf16.xpose.msra.mxu0 %v1116_v7  ;;  %4471 = vmatmul.mubr.bf16.vlgmr.msra.gmra.mrb[8].mxu1 %v1113_v47 }
 0x315   :  { %4464 = vmatprep.mubr.msk.bf16.mxu0 %vm5438_vm0, %v5437_v5  ;;  %4476 = vmatprep.mubr.msk.bf16.mxu1 %vm5438_vm0, %v5437_v5 }
 0x31b   :  { %4465 = vmatmul.mubr.bf16.vlgmr.msra.gmra.mrb[24].mxu0 %v1112_v30 }
 0x33d   :  { %v1091_v57 = vpop.f32.mrb[8].mxu0 }
 0x33e   :  { %v1093_v61 = vpop.f32.mrb[9].mxu0  ;;  %v1092_v63 = vadd.f32 %v1091_v57, %v460_v52 }
 0x33f   :  { %v1095_v62 = vpop.f32.mrb[10].mxu0  ;;  %v5848_v10 = vadd.f32 %v1093_v61, %v464_v58 }
 0x340   :  { %v1096_v0 = vadd.f32 %v1095_v62, %v460_v52  ;;  %v1097_v3 = vpop.f32.mrb[11].mxu0 }
 0x341   :  { %v5850_v11 = vadd.f32 %v1097_v3, %v464_v58 }
 0x342   :  { %v1118_v12 = vpack.c.bf16 %v1096_v0, %v1092_v63 }
 0x343   :  { %v1120_v9 = vpack.c.bf16 %v5850_v11, %v5848_v10 }
 0x344   :  { %4475 = vmatpush3.bf16.msra.mxu1 %v1118_v12 }
 0x345   :  { %v1101_v14 = vpop.f32.mrb[12].mxu0  ;;  %4480 = vmatprep.subr.bf16.mxu1 %v5437_v5 }
 0x346   :  { %v5855_v15 = vadd.f32 %v1101_v14, %v460_v52  ;;  %v1103_v13 = vpop.f32.mrb[13].mxu0 }
 0x347   :  { %v1105_v16 = vpop.f32.mrb[14].mxu0  ;;  %v5859_v19 = vadd.f32 %v1103_v13, %v464_v58 }
 0x348   :  { %v5857_v17 = vadd.f32 %v1105_v16, %v460_v52  ;;  %v1107_v18 = vpop.f32.mrb[15].mxu0 }
 0x349   :  { %v5861_v54 = vadd.f32 %v1107_v18, %v464_v58 }
 0x34a   :  { %v1119_v20 = vpack.c.bf16 %v5857_v17, %v5855_v15 }
 0x34b   :  { %v1121_v53 = vpack.c.bf16 %v5861_v54, %v5859_v19  ;;  %v4751_v19 = vld [vmem:[#allocation11 + $0xd4] ss:$8 sps:$4 sm:$0xff]   ;;  %v4749_v54 = vld [vmem:[#allocation11 + $0xd0] ss:$8 sps:$4 sm:$0xff]  }
 0x3de   :  { %v1156_v21 = vpop.f32.mrb[16].mxu0 }
 0x3df   :  { %v4454_v22 = vpop.f32.mrb[17].mxu0  ;;  %v1287_v23 = vsel %vm1286_vm1, %v1156_v21, -inf }
 0x3e0   :  { %1288 = vmax.xlane.f32.xlu0 %v1287_v23  ;;  %v1159_v24 = vpop.f32.mrb[18].mxu0 }
 0x3e1   :  { %v4455_v25 = vpop.f32.mrb[19].mxu0  ;;  %v1290_v26 = vsel %vm1286_vm1, %v1159_v24, -inf }
 0x3e2   :  { %1291 = vmax.xlane.f32.xlu1 %v1290_v26 }
 0x3e6   :  { %v1197_v2 = vpop.f32.mrb[20].mxu0 }
 0x3e7   :  { %v4460_v27 = vpop.f32.mrb[21].mxu0  ;;  %v1279_v1 = vpop.f32.mrb[8].mxu1  ;;  %v1293_v56 = vsel %vm1286_vm1, %v1197_v2, -inf }
 0x3e8   :  { %v4472_v28 = vpop.f32.mrb[9].mxu1  ;;  %1294 = vmax.xlane.f32.xlu0 %v1293_v56  ;;  %v1200_v29 = vpop.f32.mrb[22].mxu0  ;;  %v1305_v37 = vsel %vm1286_vm1, %v1279_v1, -inf }
 0x3e9   :  { %v4461_v30 = vpop.f32.mrb[23].mxu0  ;;  %v1282_v7 = vpop.f32.mrb[10].mxu1  ;;  %v1296_v4 = vsel %vm1286_vm1, %v1200_v29, -inf }
 0x3ea   :  { %v4473_v55 = vpop.f32.mrb[11].mxu1  ;;  %1297 = vmax.xlane.f32.xlu1 %v1296_v4  ;;  %v1308_v38 = vsel %vm1286_vm1, %v1282_v7, -inf }
 0x3eb   :  { %v4710_v55 = vld [vmem:[#allocation11] ss:$8 sps:$4 sm:$0xff]  }
 0x3ee   :  { %v1238_v31 = vpop.f32.mrb[24].mxu0 }
 0x3ef   :  { %v4466_v32 = vpop.f32.mrb[25].mxu0  ;;  %v1299_v33 = vsel %vm1286_vm1, %v1238_v31, -inf }
 0x3f0   :  { %1300 = vmax.xlane.f32.xlu0 %v1299_v33  ;;  %v1241_v34 = vpop.f32.mrb[26].mxu0  ;;  %v4715_v32 = vld [vmem:[#allocation11 + $0x14] ss:$8 sps:$4 sm:$0xff]   ;;  %v4713_v33 = vld [vmem:[#allocation11 + $0x10] ss:$8 sps:$4 sm:$0xff]  }
 0x3f1   :  { %v4467_v35 = vpop.f32.mrb[27].mxu0  ;;  %v1302_v36 = vsel %vm1286_vm1, %v1241_v34, -inf }
 0x3f2   :  { %1303 = vmax.xlane.f32.xlu1 %v1302_v36  ;;  %v4716_v35 = vld [vmem:[#allocation11 + $0x20] ss:$8 sps:$4 sm:$0xff]   ;;  %v4721_v36 = vld [vmem:[#allocation11 + $0x34] ss:$8 sps:$4 sm:$0xff]  }
 0x3f4   :  { %1306 = vmax.xlane.f32.xlu0 %v1305_v37  ;;  %v4719_v37 = vld [vmem:[#allocation11 + $0x30] ss:$8 sps:$4 sm:$0xff]  }
 0x3f6   :  { %1309 = vmax.xlane.f32.xlu1 %v1308_v38  ;;  %v4724_v38 = vld [vmem:[#allocation11 + $0x44] ss:$8 sps:$4 sm:$0xff]  }
 0x46d   :  { %v1289_v39 = vpop.xlane.xlu0 %1288 }
 0x46e   :  { %v1311_v40 = vsub.f32 %v1156_v21, %v1289_v39  ;;  %v4722_v39 = vld [vmem:[#allocation11 + $0x40] ss:$8 sps:$4 sm:$0xff]  }
 0x46f   :  { %v1292_v41 = vpop.xlane.xlu1 %1291 }
 0x470   :  { %v1319_v42 = vmul.f32 1.442695, %v1311_v40  ;;  %v1312_v43 = vsub.f32 %v1159_v24, %v1292_v41  ;;  %v4727_v40 = vld [vmem:[#allocation11 + $0x54] ss:$8 sps:$4 sm:$0xff]   ;;  %v4725_v41 = vld [vmem:[#allocation11 + $0x50] ss:$8 sps:$4 sm:$0xff]  }
 0x472   :  { %5054 = vpow2.f32 %v1319_v42  ;;  %v1321_v44 = vmul.f32 1.442695, %v1312_v43  ;;  %v4730_v42 = vld [vmem:[#allocation11 + $0x64] ss:$8 sps:$4 sm:$0xff]   ;;  %v4728_v43 = vld [vmem:[#allocation11 + $0x60] ss:$8 sps:$4 sm:$0xff]  }
 0x474   :  { %5056 = vpow2.f32 %v1321_v44  ;;  %v4733_v44 = vld [vmem:[#allocation11 + $0x74] ss:$8 sps:$4 sm:$0xff]  }
 0x475   :  { %v1295_v45 = vpop.xlane.xlu0 %1294 }
 0x476   :  { %v1313_v46 = vsub.f32 %v1197_v2, %v1295_v45  ;;  %v4731_v45 = vld [vmem:[#allocation11 + $0x70] ss:$8 sps:$4 sm:$0xff]  }
 0x477   :  { %v1298_v47 = vpop.xlane.xlu1 %1297 }
 0x478   :  { %v1323_v48 = vmul.f32 1.442695, %v1313_v46  ;;  %v1314_v49 = vsub.f32 %v1200_v29, %v1298_v47  ;;  %v4736_v46 = vld [vmem:[#allocation11 + $0x84] ss:$8 sps:$4 sm:$0xff]   ;;  %v4734_v47 = vld [vmem:[#allocation11 + $0x80] ss:$8 sps:$4 sm:$0xff]  }
 0x47a   :  { %5058 = vpow2.f32 %v1323_v48  ;;  %v1325_v50 = vmul.f32 1.442695, %v1314_v49  ;;  %v4739_v48 = vld [vmem:[#allocation11 + $0x94] ss:$8 sps:$4 sm:$0xff]   ;;  %v4737_v49 = vld [vmem:[#allocation11 + $0x90] ss:$8 sps:$4 sm:$0xff]  }
 0x47c   :  { %v5875_v52 = vpop.eup %5054  ;;  %5060 = vpow2.f32 %v1325_v50  ;;  %v4742_v50 = vld [vmem:[#allocation11 + $0xa4] ss:$8 sps:$4 sm:$0xff]  }
 0x47d   :  { %v1301_v57 = vpop.xlane.xlu0 %1300  ;;  %v1335_v58 = vsel %vm1286_vm1, %v5875_v52, 0.0 }
 0x47e   :  { %v5879_v61 = vpop.eup %5056  ;;  %v1315_v62 = vsub.f32 %v1238_v31, %v1301_v57  ;;  %1336 = vadd.xlane.f32.xlu0 %v1335_v58  ;;  %v4712_v31 = vld [vmem:[#allocation11 + $0x4] ss:$8 sps:$4 sm:$0xff]   ;;  %v4740_v57 = vld [vmem:[#allocation11 + $0xa0] ss:$8 sps:$4 sm:$0xff]  }
 0x47f   :  { %v1304_v63 = vpop.xlane.xlu1 %1303  ;;  %v1338_v0 = vsel %vm1286_vm1, %v5879_v61, 0.0  ;;  %1763 = vmatprep.subr.bf16.mxu0 %v4712_v31  ;;  %v4752_v31 = vld [vmem:[#allocation11 + $0xe0] ss:$8 sps:$4 sm:$0xff]  }
 0x480   :  { %v1327_v3 = vmul.f32 1.442695, %v1315_v62  ;;  %v1316_v12 = vsub.f32 %v1241_v34, %v1304_v63  ;;  %1339 = vadd.xlane.f32.xlu1 %v1338_v0  ;;  %1764 = vmatpush1.bf16.msra.mxu0 %v4710_v55  ;;  %v4718_v34 = vld [vmem:[#allocation11 + $0x24] ss:$8 sps:$4 sm:$0xff]   ;;  %v4746_v55 = vld [vmem:[#allocation11 + $0xc0] ss:$8 sps:$4 sm:$0xff]  }
 0x481   :  { %v1307_v14 = vpop.xlane.xlu0 %1306  ;;  %1765 = vmatprep.subr.bf16.mxu0 %v4715_v32 }
 0x482   :  { %5062 = vpow2.f32 %v1327_v3  ;;  %v1329_v13 = vmul.f32 1.442695, %v1316_v12  ;;  %v1317_v16 = vsub.f32 %v1279_v1, %v1307_v14 }
 0x483   :  { %v1310_v18 = vpop.xlane.xlu1 %1309 }
 0x484   :  { %v5883_v21 = vpop.eup %5058  ;;  %5064 = vpow2.f32 %v1329_v13  ;;  %v1331_v22 = vmul.f32 1.442695, %v1317_v16  ;;  %v1318_v23 = vsub.f32 %v1282_v7, %v1310_v18  ;;  %1766 = vmatpush1.bf16.msra.mxu0 %v4713_v33 }
 0x485   :  { %v1341_v24 = vsel %vm1286_vm1, %v5883_v21, 0.0  ;;  %1767 = vmatprep.subr.bf16.mxu0 %v4718_v34 }
 0x486   :  { %v5887_v25 = vpop.eup %5060  ;;  %5066 = vpow2.f32 %v1331_v22  ;;  %v1333_v26 = vmul.f32 1.442695, %v1318_v23  ;;  %1342 = vadd.xlane.f32.xlu0 %v1341_v24 }
 0x487   :  { %v1344_v2 = vsel %vm1286_vm1, %v5887_v25, 0.0 }
 0x488   :  { %5068 = vpow2.f32 %v1333_v26  ;;  %1345 = vadd.xlane.f32.xlu1 %v1344_v2  ;;  %1768 = vmatpush1.bf16.msra.mxu0 %v4716_v35 }
 0x489   :  { %1769 = vmatprep.subr.bf16.mxu0 %v4721_v36 }
 0x48c   :  { %v5891_v27 = vpop.eup %5062  ;;  %1770 = vmatpush1.bf16.msra.mxu0 %v4719_v37 }
 0x48d   :  { %v1347_v1 = vsel %vm1286_vm1, %v5891_v27, 0.0  ;;  %1771 = vmatprep.subr.bf16.mxu0 %v4724_v38 }
 0x48e   :  { %v5895_v56 = vpop.eup %5064  ;;  %1348 = vadd.xlane.f32.xlu0 %v1347_v1 }
 0x48f   :  { %v1350_v28 = vsel %vm1286_vm1, %v5895_v56, 0.0 }
 0x490   :  { %v5899_v29 = vpop.eup %5066  ;;  %1351 = vadd.xlane.f32.xlu1 %v1350_v28  ;;  %1772 = vmatpush1.bf16.msra.mxu0 %v4722_v39 }
 0x491   :  { %v1353_v30 = vsel %vm1286_vm1, %v5899_v29, 0.0  ;;  %1773 = vmatprep.subr.bf16.mxu0 %v4727_v40 }
 0x492   :  { %v5903_v7 = vpop.eup %5068  ;;  %1354 = vadd.xlane.f32.xlu0 %v1353_v30 }
 0x493   :  { %v1356_v4 = vsel %vm1286_vm1, %v5903_v7, 0.0 }
 0x494   :  { %1357 = vadd.xlane.f32.xlu1 %v1356_v4  ;;  %1774 = vmatpush1.bf16.msra.mxu0 %v4725_v41  ;;  %v4748_v4 = vld [vmem:[#allocation11 + $0xc4] ss:$8 sps:$4 sm:$0xff]  }
 0x495   :  { %1775 = vmatprep.subr.bf16.mxu0 %v4730_v42 }
 0x498   :  { %1776 = vmatpush1.bf16.msra.mxu0 %v4728_v43 }
 0x499   :  { %1777 = vmatprep.subr.bf16.mxu0 %v4733_v44 }
 0x49c   :  { %1778 = vmatpush1.bf16.msra.mxu0 %v4731_v45 }
 0x49d   :  { %1779 = vmatprep.subr.bf16.mxu0 %v4736_v46 }
 0x4a0   :  { %1780 = vmatpush1.bf16.msra.mxu0 %v4734_v47 }
 0x4a1   :  { %1781 = vmatprep.subr.bf16.mxu0 %v4739_v48 }
 0x4a4   :  { %1782 = vmatpush1.bf16.msra.mxu0 %v4737_v49 }
 0x4a5   :  { %1783 = vmatprep.subr.bf16.mxu0 %v4742_v50 }
 0x4a8   :  { %1784 = vmatpush1.bf16.msra.mxu0 %v4740_v57 }
 0x50b   :  { %v1337_v58 = vpop.xlane.xlu0 %1336 }
 0x50c   :  { %5070 = vrcp.f32 %v1337_v58  ;;  %v1591_v58 = vld [vmem:[%s6308_s11] sm:$0x3] }
 0x50d   :  { %v1340_v62 = vpop.xlane.xlu1 %1339 }
 0x50e   :  { %5072 = vrcp.f32 %v1340_v62  ;;  %v1596_v62 = vrot.slane %v1591_v58, %v5788_v60 }
 0x513   :  { %v1343_v63 = vpop.xlane.xlu0 %1342 }
 0x514   :  { %5074 = vrcp.f32 %v1343_v63  ;;  %v1600_v63 = vrot.slane %v1591_v58, %v5785_v59  ;;  %v4784_v58 = vld [vmem:[#allocation14 + $0xa4] ss:$16 sps:$4 sm:$0xff]  }
 0x515   :  { %v1346_v0 = vpop.xlane.xlu1 %1345 }
 0x516   :  { %v5071_v3 = vpop.eup %5070  ;;  %5076 = vrcp.f32 %v1346_v0 }
 0x517   :  { %v1367_v14 = vmul.f32 %v5071_v3, %v5875_v52 }
 0x518   :  { %v5073_v12 = vpop.eup %5072 }
 0x519   :  { %v1368_v13 = vmul.f32 %v5073_v12, %v5879_v61 }
 0x51b   :  { %v1349_v16 = vpop.xlane.xlu0 %1348  ;;  %v1375_v18 = vpack.c.bf16 %v1368_v13, %v1367_v14 }
 0x51c   :  { %5078 = vrcp.f32 %v1349_v16  ;;  %v5134_v16 = vld [vmem:[#allocation2] sm:$0xff] }
 0x51d   :  { %4477 = vmatmul.mubr.msk.bf16.vlgmr.msra.gmra.mrb[12].mxu1 %vm1286_vm1, %v1375_v18  ;;  %v1352_v22 = vpop.xlane.xlu1 %1351 }
 0x51e   :  { %v5075_v23 = vpop.eup %5074  ;;  %4481 = vmatpush3.bf16.msra.mxu1 %v1119_v20  ;;  %5080 = vrcp.f32 %v1352_v22  ;;  %4482 = vmatprep.mubr.msk.bf16.mxu1 %vm5438_vm0, %v5437_v5 }
 0x51f   :  { %4486 = vmatprep.subr.bf16.mxu1 %v5437_v5  ;;  %v1369_v61 = vmul.f32 %v5075_v23, %v5883_v21  ;;  %v1355_v26 = vpop.xlane.xlu0 %1354 }
 0x520   :  { %v5077_v52 = vpop.eup %5076 }
 0x521   :  { %v1370_v24 = vmul.f32 %v5077_v52, %v5887_v25  ;;  %v1358_v2 = vpop.xlane.xlu1 %1357  ;;  %v5135_v52 = vld [vmem:[#allocation2 + $0x8] sm:$0xff] }
 0x522   :  { %5082 = vrcp.f32 %v1358_v2 }
 0x523   :  { %v1376_v1 = vpack.c.bf16 %v1370_v24, %v1369_v61  ;;  %5084 = vrcp.f32 %v1355_v26  ;;  %v5136_v26 = vld [vmem:[#allocation2 + $0x10] sm:$0xff] }
 0x525   :  { %4483 = vmatmul.mubr.msk.bf16.vlgmr.msra.gmra.mrb[16].mxu1 %vm1286_vm1, %v1376_v1  ;;  %v5137_v1 = vld [vmem:[#allocation2 + $0x18] sm:$0xff] }
 0x526   :  { %v5079_v15 = vpop.eup %5078  ;;  %4487 = vmatpush3.bf16.msra.mxu1 %v1120_v9  ;;  %4488 = vmatprep.mubr.msk.bf16.mxu1 %vm5438_vm0, %v5437_v5 }
 0x527   :  { %4492 = vmatprep.subr.bf16.mxu1 %v5437_v5  ;;  %v1371_v20 = vmul.f32 %v5079_v15, %v5891_v27  ;;  %v4745_v27 = vld [vmem:[#allocation11 + $0xb4] ss:$8 sps:$4 sm:$0xff]  }
 0x528   :  { %v5081_v17 = vpop.eup %5080  ;;  %1785 = vmatprep.subr.bf16.mxu0 %v4745_v27 }
 0x529   :  { %v1372_v21 = vmul.f32 %v5081_v17, %v5895_v56  ;;  %v4743_v56 = vld [vmem:[#allocation11 + $0xb0] ss:$8 sps:$4 sm:$0xff]  }
 0x52a   :  { %1786 = vmatpush1.bf16.msra.mxu0 %v4743_v56 }
 0x52b   :  { %v1377_v25 = vpack.c.bf16 %v1372_v21, %v1371_v20  ;;  %1787 = vmatprep.subr.bf16.mxu0 %v4748_v4  ;;  %v5139_v4 = vld [vmem:[#allocation2 + $0x28] sm:$0xff] }
 0x52c   :  { %v5083_v28 = vpop.eup %5082 }
 0x52d   :  { %4489 = vmatmul.mubr.msk.bf16.vlgmr.msra.gmra.mrb[20].mxu1 %vm1286_vm1, %v1377_v25  ;;  %v5085_v30 = vpop.eup %5084  ;;  %v1374_v10 = vmul.f32 %v5083_v28, %v5903_v7  ;;  %v4755_v7 = vld [vmem:[#allocation11 + $0xf0] ss:$8 sps:$4 sm:$0xff]  }
 0x52e   :  { %4493 = vmatpush3.bf16.msra.mxu1 %v1121_v53  ;;  %4494 = vmatprep.mubr.msk.bf16.mxu1 %vm5438_vm0, %v5437_v5  ;;  %v1373_v11 = vmul.f32 %v5085_v30, %v5899_v29  ;;  %v4754_v53 = vld [vmem:[#allocation11 + $0xe4] ss:$8 sps:$4 sm:$0xff]   ;;  %v4757_v29 = vld [vmem:[#allocation11 + $0xf4] ss:$8 sps:$4 sm:$0xff]  }
 0x52f   :  { %1788 = vmatpush1.bf16.msra.mxu0 %v4746_v55 }
 0x530   :  { %v1378_v9 = vpack.c.bf16 %v1374_v10, %v1373_v11  ;;  %1789 = vmatprep.subr.bf16.mxu0 %v4751_v19  ;;  %v5138_v11 = vld [vmem:[#allocation2 + $0x20] sm:$0xff] }
 0x533   :  { %1790 = vmatpush1.bf16.msra.mxu0 %v4749_v54  ;;  %v5140_v54 = vld [vmem:[#allocation2 + $0x30] sm:$0xff] }
 0x534   :  { %1791 = vmatprep.subr.bf16.mxu0 %v4754_v53 }
 0x535   :  { %4495 = vmatmul.mubr.msk.bf16.vlgmr.msra.gmra.mrb[24].mxu1 %vm1286_vm1, %v1378_v9 }
 0x537   :  { %1792 = vmatpush1.bf16.msra.mxu0 %v4752_v31  ;;  %v5141_v31 = vld [vmem:[#allocation2 + $0x38] sm:$0xff] }
 0x538   :  { %1793 = vmatprep.subr.bf16.mxu0 %v4757_v29 }
 0x53b   :  { %1794 = vmatpush1.bf16.msra.mxu0 %v4755_v7 }
 0x5f0   :  { %v1416_v32 = vpop.f32.mrb[12].mxu1 }
 0x5f1   :  { %v4478_v33 = vpop.f32.mrb[13].mxu1 }
 0x5f2   :  { %v1419_v34 = vpop.f32.mrb[14].mxu1  ;;  %v4758_v33 = vld [vmem:[#allocation14] ss:$16 sps:$4 sm:$0xff]  }
 0x5f3   :  { %v1587_v35 = vpack.c.bf16 %v1419_v34, %v1416_v32  ;;  %v4479_v36 = vpop.f32.mrb[15].mxu1  ;;  %v4760_v34 = vld [vmem:[#allocation14 + $0x4] ss:$16 sps:$4 sm:$0xff]  }
 0x5f4   :  { %2599 = vmatprep.subr.bf16.mxu0 %v4760_v34  ;;  %v4767_v36 = vld [vmem:[#allocation13] ss:$8 sps:$4 sm:$0xff]  }
 0x5f8   :  { %v1460_v37 = vpop.f32.mrb[16].mxu1 }
 0x5f9   :  { %v4484_v38 = vpop.f32.mrb[17].mxu1 }
 0x5fa   :  { %v1463_v39 = vpop.f32.mrb[18].mxu1  ;;  %v4761_v38 = vld [vmem:[#allocation14 + $0x20] ss:$16 sps:$4 sm:$0xff]  }
 0x5fb   :  { %v1589_v40 = vpack.c.bf16 %v1463_v39, %v1460_v37  ;;  %v4485_v41 = vpop.f32.mrb[19].mxu1  ;;  %v4769_v37 = vld [vmem:[#allocation13 + $0x4] ss:$8 sps:$4 sm:$0xff]   ;;  %v4775_v39 = vld [vmem:[#allocation13 + $0x14] ss:$8 sps:$4 sm:$0xff]  }
 0x5fc   :  { %2136 = vmatprep.subr.bf16.mxu1 %v4769_v37  ;;  %v4773_v41 = vld [vmem:[#allocation13 + $0x10] ss:$8 sps:$4 sm:$0xff]  }
 0x5fd   :  { %2137 = vmatpush1.bf16.msra.mxu1 %v4767_v36 }
 0x5fe   :  { %2138 = vmatprep.subr.bf16.mxu1 %v4775_v39 }
 0x600   :  { %v1504_v42 = vpop.f32.mrb[20].mxu1 }
 0x601   :  { %v4490_v43 = vpop.f32.mrb[21].mxu1  ;;  %2139 = vmatpush1.bf16.msra.mxu1 %v4773_v41 }
 0x602   :  { %v1507_v44 = vpop.f32.mrb[22].mxu1  ;;  %v4764_v43 = vld [vmem:[#allocation14 + $0x40] ss:$16 sps:$4 sm:$0xff]  }
 0x603   :  { %v1588_v45 = vpack.c.bf16 %v1507_v44, %v1504_v42  ;;  %v4491_v46 = vpop.f32.mrb[23].mxu1  ;;  %v4781_v42 = vld [vmem:[#allocation13 + $0x24] ss:$8 sps:$4 sm:$0xff]  }
 0x604   :  { %v4772_v44 = vld [vmem:[#allocation14 + $0x64] ss:$16 sps:$4 sm:$0xff]   ;;  %2140 = vmatprep.subr.bf16.mxu1 %v4781_v42 }
 0x605   :  { %1795 = vmatprep.mubr.bf16.mxu0 %v1588_v45  ;;  %v4779_v45 = vld [vmem:[#allocation13 + $0x20] ss:$8 sps:$4 sm:$0xff]   ;;  %v4787_v46 = vld [vmem:[#allocation13 + $0x34] ss:$8 sps:$4 sm:$0xff]  }
 0x606   :  { %1796 = vmatmul.mubr.bf16.vlgmr.msra.gmra.mrb[28].mxu0 %v1587_v35  ;;  %v4763_v35 = vld [vmem:[#allocation14 + $0x24] ss:$16 sps:$4 sm:$0xff]   ;;  %2141 = vmatpush1.bf16.msra.mxu1 %v4779_v45 }
 0x607   :  { %2600 = vmatpush1.bf16.msra.mxu0 %v4758_v33  ;;  %2142 = vmatprep.subr.bf16.mxu1 %v4787_v46 }
 0x608   :  { %v1548_v47 = vpop.f32.mrb[24].mxu1  ;;  %2601 = vmatprep.subr.bf16.mxu0 %v4763_v35 }
 0x609   :  { %v4496_v48 = vpop.f32.mrb[25].mxu1 }
 0x60a   :  { %v1551_v49 = vpop.f32.mrb[26].mxu1  ;;  %v4778_v48 = vld [vmem:[#allocation14 + $0x84] ss:$16 sps:$4 sm:$0xff]  }
 0x60b   :  { %v1590_v50 = vpack.c.bf16 %v1551_v49, %v1548_v47  ;;  %v4497_v57 = vpop.f32.mrb[27].mxu1  ;;  %2602 = vmatpush1.bf16.msra.mxu0 %v4761_v38  ;;  %v4770_v47 = vld [vmem:[#allocation14 + $0x60] ss:$16 sps:$4 sm:$0xff]  }
 0x60c   :  { %v4785_v49 = vld [vmem:[#allocation13 + $0x30] ss:$8 sps:$4 sm:$0xff]  }
 0x60d   :  { %1805 = vmatprep.mubr.bf16.mxu0 %v1590_v50  ;;  %v4793_v50 = vld [vmem:[#allocation13 + $0x44] ss:$8 sps:$4 sm:$0xff]   ;;  %v4776_v57 = vld [vmem:[#allocation14 + $0x80] ss:$16 sps:$4 sm:$0xff]   ;;  %2143 = vmatpush1.bf16.msra.mxu1 %v4785_v49 }
 0x60e   :  { %1806 = vmatmul.mubr.bf16.gmra.mrb[32].mxu0 %v1589_v40  ;;  %v4766_v40 = vld [vmem:[#allocation14 + $0x44] ss:$16 sps:$4 sm:$0xff]   ;;  %2144 = vmatprep.subr.bf16.mxu1 %v4793_v50  ;;  %v4824_v49 = vld [vmem:[#allocation14 + $0x180] ss:$16 sps:$4 sm:$0xff]  }
 0x60f   :  { %2603 = vmatprep.subr.bf16.mxu0 %v4766_v40  ;;  %v4827_v50 = vld [vmem:[#allocation13 + $0xa0] ss:$8 sps:$4 sm:$0xff]  }
 0x610   :  { %2604 = vmatpush1.bf16.msra.mxu0 %v4764_v43 }
 0x611   :  { %2605 = vmatprep.subr.bf16.mxu0 %v4772_v44 }
 0x614   :  { %2606 = vmatpush1.bf16.msra.mxu0 %v4770_v47 }
 0x615   :  { %2607 = vmatprep.subr.bf16.mxu0 %v4778_v48 }
 0x618   :  { %2608 = vmatpush1.bf16.msra.mxu0 %v4776_v57  ;;  %v4832_v57 = vld [vmem:[#allocation14 + $0x1a4] ss:$16 sps:$4 sm:$0xff]  }
 0x619   :  { %2609 = vmatprep.subr.bf16.mxu0 %v4784_v58  ;;  %v4830_v58 = vld [vmem:[#allocation14 + $0x1a0] ss:$16 sps:$4 sm:$0xff]  }
 0x6d9   :  { %v1797_v0 = vpop.f32.mrb[28].mxu0 }
 0x6da   :  { %v1798_v3 = vadd.f32 %v1797_v0, %v1596_v62  ;;  %v1799_v12 = vpop.f32.mrb[29].mxu0  ;;  %v4782_v0 = vld [vmem:[#allocation14 + $0xa0] ss:$16 sps:$4 sm:$0xff]  }
 0x6db   :  { %v1800_v14 = vadd.f32 %v1799_v12, %v1600_v63  ;;  %v1801_v13 = vpop.f32.mrb[30].mxu0  ;;  %v4797_v12 = vld [vmem:[#allocation13 + $0x50] ss:$8 sps:$4 sm:$0xff]   ;;  %2610 = vmatpush1.bf16.msra.mxu0 %v4782_v0  ;;  %v4838_v0 = vld [vmem:[#allocation14 + $0x1c4] ss:$16 sps:$4 sm:$0xff]  }
 0x6dc   :  { %v5941_v18 = vadd.f32 %v5134_v16, %v1798_v3  ;;  %v1802_v22 = vadd.f32 %v1801_v13, %v1596_v62  ;;  %v1803_v23 = vpop.f32.mrb[31].mxu0  ;;  %v4790_v3 = vld [vmem:[#allocation14 + $0xc4] ss:$16 sps:$4 sm:$0xff]   ;;  %v4788_v13 = vld [vmem:[#allocation14 + $0xc0] ss:$16 sps:$4 sm:$0xff]  }
 0x6dd   :  { %v5943_v61 = vadd.f32 %v5135_v52, %v1800_v14  ;;  %v1804_v24 = vadd.f32 %v1803_v23, %v1600_v63  ;;  %v4805_v14 = vld [vmem:[#allocation13 + $0x64] ss:$8 sps:$4 sm:$0xff]   ;;  %2611 = vmatprep.subr.bf16.mxu0 %v4790_v3  ;;  %v4811_v23 = vld [vmem:[#allocation13 + $0x74] ss:$8 sps:$4 sm:$0xff]   ;;  %v4794_v52 = vld [vmem:[#allocation14 + $0xe0] ss:$16 sps:$4 sm:$0xff]  }
 0x6de   :  { %v5945_v2 = vadd.f32 %v5136_v26, %v1802_v22  ;;  %v4796_v16 = vld [vmem:[#allocation14 + $0xe4] ss:$16 sps:$4 sm:$0xff]   ;;  %v4803_v22 = vld [vmem:[#allocation13 + $0x60] ss:$8 sps:$4 sm:$0xff]   ;;  %v4809_v26 = vld [vmem:[#allocation13 + $0x70] ss:$8 sps:$4 sm:$0xff]  }
 0x6df   :  { %v5947_v15 = vadd.f32 %v5137_v1, %v1804_v24  ;;  %v1826_v17 = vadd.f32 %v5943_v61, %v5941_v18  ;;  %2612 = vmatpush1.bf16.msra.mxu0 %v4788_v13  ;;  %v4802_v24 = vld [vmem:[#allocation14 + $0x104] ss:$16 sps:$4 sm:$0xff]   ;;  %v4836_v3 = vld [vmem:[#allocation14 + $0x1c0] ss:$16 sps:$4 sm:$0xff]  }
 0x6e0   :  { %2613 = vmatprep.subr.bf16.mxu0 %v4796_v16  ;;  %v4817_v1 = vld [vmem:[#allocation13 + $0x84] ss:$8 sps:$4 sm:$0xff]   ;;  %v4842_v16 = vld [vmem:[#allocation14 + $0x1e0] ss:$16 sps:$4 sm:$0xff]  }
 0x6e1   :  { %v1807_v20 = vpop.f32.mrb[32].mxu0  ;;  %1827 = vadd.xlane.f32.xlu0 %v1826_v17  ;;  %v1829_v21 = vadd.f32 %v5947_v15, %v5945_v2  ;;  %v4800_v17 = vld [vmem:[#allocation14 + $0x100] ss:$16 sps:$4 sm:$0xff]   ;;  %v4844_v13 = vld [vmem:[#allocation14 + $0x1e4] ss:$16 sps:$4 sm:$0xff]  }
 0x6e2   :  { %v1808_v25 = vadd.f32 %v1807_v20, %v1596_v62  ;;  %v1809_v28 = vpop.f32.mrb[33].mxu0  ;;  %v4808_v20 = vld [vmem:[#allocation14 + $0x124] ss:$16 sps:$4 sm:$0xff]  }
 0x6e3   :  { %v1810_v30 = vadd.f32 %v1809_v28, %v1600_v63  ;;  %v1811_v10 = vpop.f32.mrb[34].mxu0  ;;  %1830 = vadd.xlane.f32.xlu1 %v1829_v21  ;;  %2614 = vmatpush1.bf16.msra.mxu0 %v4794_v52  ;;  %v4815_v21 = vld [vmem:[#allocation13 + $0x80] ss:$8 sps:$4 sm:$0xff]   ;;  %v229_v52 = vld [vmem:[#allocation5 + $0x18] sm:$0xff] }
 0x6e4   :  { %v5953_v9 = vadd.f32 %v5138_v11, %v1808_v25  ;;  %v1812_v27 = vadd.f32 %v1811_v10, %v1596_v62  ;;  %v1813_v56 = vpop.f32.mrb[35].mxu0  ;;  %v4791_v62 = vld [vmem:[#allocation13 + $0x40] ss:$8 sps:$4 sm:$0xff]   ;;  %2615 = vmatprep.subr.bf16.mxu0 %v4802_v24  ;;  %v4823_v25 = vld [vmem:[#allocation13 + $0x94] ss:$8 sps:$4 sm:$0xff]  }
 0x6e5   :  { %v5955_v55 = vadd.f32 %v5139_v4, %v1810_v30  ;;  %v1814_v19 = vadd.f32 %v1813_v56, %v1600_v63  ;;  %v4799_v63 = vld [vmem:[#allocation13 + $0x54] ss:$8 sps:$4 sm:$0xff]   ;;  %2145 = vmatpush1.bf16.msra.mxu1 %v4791_v62  ;;  %v4806_v28 = vld [vmem:[#allocation14 + $0x120] ss:$16 sps:$4 sm:$0xff]  }
 0x6e6   :  { %v5957_v53 = vadd.f32 %v5140_v54, %v1812_v27  ;;  %2146 = vmatprep.subr.bf16.mxu1 %v4799_v63  ;;  %v4814_v30 = vld [vmem:[#allocation14 + $0x144] ss:$16 sps:$4 sm:$0xff]   ;;  %v4821_v10 = vld [vmem:[#allocation13 + $0x90] ss:$8 sps:$4 sm:$0xff]  }
 0x6e7   :  { %v5959_v29 = vadd.f32 %v5141_v31, %v1814_v19  ;;  %v1832_v7 = vadd.f32 %v5955_v55, %v5953_v9  ;;  %2616 = vmatpush1.bf16.msra.mxu0 %v4800_v17  ;;  %v4812_v11 = vld [vmem:[#allocation14 + $0x140] ss:$16 sps:$4 sm:$0xff]   ;;  %v4820_v27 = vld [vmem:[#allocation14 + $0x164] ss:$16 sps:$4 sm:$0xff]  }
 0x6e8   :  { %2617 = vmatprep.subr.bf16.mxu0 %v4808_v20  ;;  %v4818_v56 = vld [vmem:[#allocation14 + $0x160] ss:$16 sps:$4 sm:$0xff]   ;;  %v4835_v62 = vld [vmem:[#allocation13 + $0xb4] ss:$8 sps:$4 sm:$0xff]  }
 0x6e9   :  { %1833 = vadd.xlane.f32.xlu0 %v1832_v7  ;;  %v1835_v32 = vadd.f32 %v5959_v29, %v5957_v53  ;;  %2147 = vmatpush1.bf16.msra.mxu1 %v4797_v12  ;;  %v4833_v63 = vld [vmem:[#allocation13 + $0xb0] ss:$8 sps:$4 sm:$0xff]   ;;  %v4841_v12 = vld [vmem:[#allocation13 + $0xc4] ss:$8 sps:$4 sm:$0xff]  }
 0x6ea   :  { %2148 = vmatprep.subr.bf16.mxu1 %v4805_v14  ;;  %v4839_v14 = vld [vmem:[#allocation13 + $0xc0] ss:$8 sps:$4 sm:$0xff]   ;;  %v4845_v24 = vld [vmem:[#allocation13 + $0xd0] ss:$8 sps:$4 sm:$0xff]  }
 0x6eb   :  { %1836 = vadd.xlane.f32.xlu1 %v1835_v32  ;;  %2618 = vmatpush1.bf16.msra.mxu0 %v4806_v28  ;;  %v228_v17 = vld [vmem:[#allocation5 + $0x10] sm:$0xff]  ;;  %v4853_v28 = vld [vmem:[#allocation13 + $0xf4] ss:$8 sps:$4 sm:$0xff]  }
 0x6ec   :  { %2619 = vmatprep.subr.bf16.mxu0 %v4814_v30  ;;  %v4851_v30 = vld [vmem:[#allocation13 + $0xf0] ss:$8 sps:$4 sm:$0xff]  }
 0x6ed   :  { %2149 = vmatpush1.bf16.msra.mxu1 %v4803_v22  ;;  %v4847_v22 = vld [vmem:[#allocation13 + $0xd4] ss:$8 sps:$4 sm:$0xff]  }
 0x6ee   :  { %2150 = vmatprep.subr.bf16.mxu1 %v4811_v23  ;;  %v227_v23 = vld [vmem:[#allocation5 + $0x8] sm:$0xff] }
 0x6ef   :  { %2620 = vmatpush1.bf16.msra.mxu0 %v4812_v11  ;;  %v233_v11 = vld [vmem:[#allocation5 + $0x38] sm:$0xff] }
 0x6f0   :  { %2621 = vmatprep.subr.bf16.mxu0 %v4820_v27 }
 0x6f1   :  { %2151 = vmatpush1.bf16.msra.mxu1 %v4809_v26  ;;  %v6005_v26 = vpack.c.bf16 %v229_v52, %v227_v23  ;;  %v4854_v52 = vld [vmem:[#allocation14 + $0x8] ss:$16 sps:$4 sm:$0xff]  }
 0x6f2   :  { %2152 = vmatprep.subr.bf16.mxu1 %v4817_v1  ;;  %v226_v1 = vld [vmem:[#allocation5] sm:$0xff] }
 0x6f3   :  { %2622 = vmatpush1.bf16.msra.mxu0 %v4818_v56  ;;  %v6007_v20 = vpack.c.bf16 %v228_v17, %v226_v1  ;;  %2631 = vmatprep.mubr.bf16.mxu0 %v6005_v26  ;;  %v230_v56 = vld [vmem:[#allocation5 + $0x20] sm:$0xff] }
 0x6f4   :  { %v4859_v1 = vld [vmem:[#allocation14 + $0x2c] ss:$16 sps:$4 sm:$0xff]  }
 0x6f5   :  { %2153 = vmatpush1.bf16.msra.mxu1 %v4815_v21  ;;  %v4848_v21 = vld [vmem:[#allocation13 + $0xe0] ss:$8 sps:$4 sm:$0xff]  }
 0x6f6   :  { %2154 = vmatprep.subr.bf16.mxu1 %v4823_v25  ;;  %v4850_v25 = vld [vmem:[#allocation13 + $0xe4] ss:$8 sps:$4 sm:$0xff]  }
 0x6f9   :  { %2155 = vmatpush1.bf16.msra.mxu1 %v4821_v10  ;;  %v231_v10 = vld [vmem:[#allocation5 + $0x28] sm:$0xff] }
 0x6fa   :  { %v6012_v27 = vpack.c.bf16 %v233_v11, %v231_v10  ;;  %v4857_v11 = vld [vmem:[#allocation14 + $0x28] ss:$16 sps:$4 sm:$0xff]  }
 0x76e   :  { %v1828_v4 = vpop.xlane.xlu0 %1827 }
 0x76f   :  { %v1838_v19 = vmul.f32 0.00390625, %v1828_v4  ;;  %v232_v4 = vld [vmem:[#allocation5 + $0x30] sm:$0xff] }
 0x770   :  { %v1831_v54 = vpop.xlane.xlu1 %1830 }
 0x771   :  { %v5966_v31 = vsub.f32 %v5941_v18, %v1838_v19  ;;  %v5969_v7 = vsub.f32 %v5943_v61, %v1838_v19  ;;  %v1839_v32 = vmul.f32 0.00390625, %v1831_v54  ;;  %v6014_v19 = vpack.c.bf16 %v232_v4, %v230_v56  ;;  %v4856_v54 = vld [vmem:[#allocation14 + $0xc] ss:$16 sps:$4 sm:$0xff]  }
 0x772   :  { %v4862_v56 = vld [vmem:[#allocation14 + $0x4c] ss:$16 sps:$4 sm:$0xff]  }
 0x773   :  { %v5972_v33 = vsub.f32 %v5945_v2, %v1839_v32  ;;  %v5975_v34 = vsub.f32 %v5947_v15, %v1839_v32  ;;  %v1850_v35 = vmul.f32 %v5966_v31, %v5966_v31  ;;  %v1851_v36 = vmul.f32 %v5969_v7, %v5969_v7 }
 0x775   :  { %v1858_v37 = vadd.f32 %v1851_v36, %v1850_v35  ;;  %v1852_v18 = vmul.f32 %v5972_v33, %v5972_v33  ;;  %v1853_v61 = vmul.f32 %v5975_v34, %v5975_v34 }
 0x776   :  { %v1834_v38 = vpop.xlane.xlu0 %1833 }
 0x777   :  { %v1840_v39 = vmul.f32 0.00390625, %v1834_v38  ;;  %1859 = vadd.xlane.f32.xlu0 %v1858_v37  ;;  %v1861_v2 = vadd.f32 %v1853_v61, %v1852_v18 }
 0x778   :  { %v1837_v40 = vpop.xlane.xlu1 %1836 }
 0x779   :  { %v5986_v15 = vsub.f32 %v5953_v9, %v1840_v39  ;;  %v5989_v41 = vsub.f32 %v5955_v55, %v1840_v39  ;;  %v1841_v42 = vmul.f32 0.00390625, %v1837_v40  ;;  %1862 = vadd.xlane.f32.xlu1 %v1861_v2 }
 0x77b   :  { %v5992_v43 = vsub.f32 %v5957_v53, %v1841_v42  ;;  %v5995_v44 = vsub.f32 %v5959_v29, %v1841_v42  ;;  %v1854_v45 = vmul.f32 %v5986_v15, %v5986_v15  ;;  %v1855_v46 = vmul.f32 %v5989_v41, %v5989_v41  ;;  %v4826_v53 = vld [vmem:[#allocation14 + $0x184] ss:$16 sps:$4 sm:$0xff]  }
 0x77c   :  { %2623 = vmatprep.subr.bf16.mxu0 %v4826_v53  ;;  %v4829_v29 = vld [vmem:[#allocation13 + $0xa4] ss:$8 sps:$4 sm:$0xff]  }
 0x77d   :  { %v1864_v47 = vadd.f32 %v1855_v46, %v1854_v45  ;;  %v1856_v9 = vmul.f32 %v5992_v43, %v5992_v43  ;;  %v1857_v55 = vmul.f32 %v5995_v44, %v5995_v44  ;;  %2624 = vmatpush1.bf16.msra.mxu0 %v4824_v49  ;;  %2156 = vmatprep.subr.bf16.mxu1 %v4829_v29  ;;  %v1824_v45 = vld [vmem:[%s6344_s26] sm:$0x3] }
 0x77e   :  { %2157 = vmatpush1.bf16.msra.mxu1 %v4827_v50  ;;  %2625 = vmatprep.subr.bf16.mxu0 %v4832_v57 }
 0x77f   :  { %1865 = vadd.xlane.f32.xlu0 %v1864_v47  ;;  %v1867_v48 = vadd.f32 %v1857_v55, %v1856_v9  ;;  %2158 = vmatprep.subr.bf16.mxu1 %v4835_v62  ;;  %v1825_v47 = vld [vmem:[%s6345_s21] sm:$0x3]  ;;  %v1894_v9 = vrot.slane %v1824_v45, %v5788_v60  ;;  %v1898_v55 = vrot.slane %v1824_v45, %v5785_v59 }
 0x780   :  { %v1913_v50 = vrot.slane %v1825_v47, %v5788_v60  ;;  %v1917_v57 = vrot.slane %v1825_v47, %v5785_v59  ;;  %v4880_v45 = vld [vmem:[#allocation14 + $0x10c] ss:$16 sps:$4 sm:$0xff]   ;;  %v4881_v47 = vld [vmem:[#allocation14 + $0x128] ss:$16 sps:$4 sm:$0xff]  }
 0x781   :  { %1868 = vadd.xlane.f32.xlu1 %v1867_v48  ;;  %2626 = vmatpush1.bf16.msra.mxu0 %v4830_v58 }
 0x782   :  { %2159 = vmatpush1.bf16.msra.mxu1 %v4833_v63  ;;  %2627 = vmatprep.subr.bf16.mxu0 %v4838_v0 }
 0x783   :  { %2160 = vmatprep.subr.bf16.mxu1 %v4841_v12 }
 0x785   :  { %2628 = vmatpush1.bf16.msra.mxu0 %v4836_v3 }
 0x786   :  { %2161 = vmatpush1.bf16.msra.mxu1 %v4839_v14  ;;  %2629 = vmatprep.subr.bf16.mxu0 %v4844_v13 }
 0x787   :  { %2162 = vmatprep.subr.bf16.mxu1 %v4847_v22 }
 0x789   :  { %2630 = vmatpush1.bf16.msra.mxu0 %v4842_v16 }
 0x78a   :  { %4498 = vmatprep.subr.bf16.mxu0 %v5437_v5  ;;  %2163 = vmatpush1.bf16.msra.mxu1 %v4845_v24 }
 0x78b   :  { %2164 = vmatprep.subr.bf16.mxu1 %v4850_v25 }
 0x78c   :  { %2632 = vmatmul.mubr.bf16.vlgmr.msra.gmra.mrb[36].mxu0 %v6007_v20 }
 0x78d   :  { %2641 = vmatprep.mubr.bf16.mxu0 %v6012_v27 }
 0x78e   :  { %2165 = vmatpush1.bf16.msra.mxu1 %v4848_v21 }
 0x78f   :  { %2166 = vmatprep.subr.bf16.mxu1 %v4853_v28 }
 0x792   :  { %2167 = vmatpush1.bf16.msra.mxu1 %v4851_v30 }
 0x793   :  { %2652 = vmatprep.subr.bf16.mxu1 %v4856_v54 }
 0x794   :  { %2642 = vmatmul.mubr.bf16.gmra.mrb[40].mxu0 %v6014_v19 }
 0x795   :  { %4500 = vmatprep.mubr.msk.bf16.mxu0 %vm5438_vm0, %v5437_v5 }
 0x804   :  { %v1860_v32 = vpop.xlane.xlu0 %1859 }
 0x805   :  { %v1870_v35 = vmul.f32 0.00390625, %v1860_v32  ;;  %v4860_v32 = vld [vmem:[#allocation14 + $0x48] ss:$16 sps:$4 sm:$0xff]  }
 0x806   :  { %v1863_v36 = vpop.xlane.xlu1 %1862 }
 0x807   :  { %v1874_v37 = vadd.f32 1e-05, %v1870_v35  ;;  %v1871_v18 = vmul.f32 0.00390625, %v1863_v36  ;;  %v4865_v35 = vld [vmem:[#allocation14 + $0x6c] ss:$16 sps:$4 sm:$0xff]  }
 0x808   :  { %v4863_v36 = vld [vmem:[#allocation14 + $0x68] ss:$16 sps:$4 sm:$0xff]  }
 0x809   :  { %5086 = vrsqrt.f32 %v1874_v37  ;;  %v1875_v61 = vadd.f32 1e-05, %v1871_v18  ;;  %v4868_v37 = vld [vmem:[#allocation14 + $0x8c] ss:$16 sps:$4 sm:$0xff]   ;;  %v4866_v18 = vld [vmem:[#allocation14 + $0x88] ss:$16 sps:$4 sm:$0xff]  }
 0x80b   :  { %5088 = vrsqrt.f32 %v1875_v61  ;;  %v4871_v61 = vld [vmem:[#allocation14 + $0xac] ss:$16 sps:$4 sm:$0xff]  }
 0x80c   :  { %v1866_v38 = vpop.xlane.xlu0 %1865 }
 0x80d   :  { %v1872_v39 = vmul.f32 0.00390625, %v1866_v38  ;;  %v4869_v38 = vld [vmem:[#allocation14 + $0xa8] ss:$16 sps:$4 sm:$0xff]  }
 0x80e   :  { %v1869_v2 = vpop.xlane.xlu1 %1868 }
 0x80f   :  { %v1876_v40 = vadd.f32 1e-05, %v1872_v39  ;;  %v1873_v42 = vmul.f32 0.00390625, %v1869_v2  ;;  %v4874_v39 = vld [vmem:[#allocation14 + $0xcc] ss:$16 sps:$4 sm:$0xff]  }
 0x810   :  { %v4872_v2 = vld [vmem:[#allocation14 + $0xc8] ss:$16 sps:$4 sm:$0xff]  }
 0x811   :  { %5090 = vrsqrt.f32 %v1876_v40  ;;  %v1877_v46 = vadd.f32 1e-05, %v1873_v42  ;;  %v4877_v40 = vld [vmem:[#allocation14 + $0xec] ss:$16 sps:$4 sm:$0xff]   ;;  %v4875_v42 = vld [vmem:[#allocation14 + $0xe8] ss:$16 sps:$4 sm:$0xff]  }
 0x813   :  { %v5087_v48 = vpop.eup %5086  ;;  %5092 = vrsqrt.f32 %v1877_v46  ;;  %v4883_v46 = vld [vmem:[#allocation14 + $0x12c] ss:$16 sps:$4 sm:$0xff]  }
 0x814   :  { %v1882_v53 = vmul.f32 %v5087_v48, %v5966_v31  ;;  %v1883_v49 = vmul.f32 %v5087_v48, %v5969_v7  ;;  %v4889_v48 = vld [vmem:[#allocation14 + $0x16c] ss:$16 sps:$4 sm:$0xff]  }
 0x815   :  { %v5089_v29 = vpop.eup %5088 }
 0x816   :  { %v1884_v58 = vmul.f32 %v5089_v29, %v5972_v33  ;;  %v1885_v62 = vmul.f32 %v5089_v29, %v5975_v34  ;;  %v1902_v63 = vmul.f32 %v1898_v55, %v1883_v49  ;;  %v1901_v0 = vmul.f32 %v1894_v9, %v1882_v53  ;;  %v4887_v53 = vld [vmem:[#allocation14 + $0x168] ss:$16 sps:$4 sm:$0xff]   ;;  %v4892_v49 = vld [vmem:[#allocation14 + $0x18c] ss:$16 sps:$4 sm:$0xff]  }
 0x817   :  { %v4890_v29 = vld [vmem:[#allocation14 + $0x188] ss:$16 sps:$4 sm:$0xff]  }
 0x818   :  { %v1904_v3 = vmul.f32 %v1898_v55, %v1885_v62  ;;  %v1903_v12 = vmul.f32 %v1894_v9, %v1884_v58  ;;  %v6034_v14 = vadd.f32 %v1917_v57, %v1902_v63  ;;  %v6038_v31 = vadd.f32 %v1913_v50, %v1901_v0  ;;  %v4898_v58 = vld [vmem:[#allocation14 + $0x1cc] ss:$16 sps:$4 sm:$0xff]   ;;  %v4896_v62 = vld [vmem:[#allocation14 + $0x1c8] ss:$16 sps:$4 sm:$0xff]  }
 0x819   :  { %v4901_v63 = vld [vmem:[#allocation14 + $0x1ec] ss:$16 sps:$4 sm:$0xff]   ;;  %v4899_v0 = vld [vmem:[#allocation14 + $0x1e8] ss:$16 sps:$4 sm:$0xff]  }
 0x81a   :  { %v6036_v13 = vadd.f32 %v1917_v57, %v1904_v3  ;;  %v6040_v7 = vadd.f32 %v1913_v50, %v1903_v12  ;;  %v6069_v3 = vld [vmem:[%s6312_s15] sm:$0xf] }
 0x81b   :  { %v5091_v16 = vpop.eup %5090  ;;  %v2262_v12 = vrot.slane %v6069_v3, %v5788_v60 }
 0x81c   :  { %v1961_v22 = vpack.c.bf16 %v6036_v13, %v6034_v14  ;;  %v1960_v33 = vpack.c.bf16 %v6040_v7, %v6038_v31  ;;  %v1887_v34 = vmul.f32 %v5091_v16, %v5989_v41  ;;  %v1886_v23 = vmul.f32 %v5091_v16, %v5986_v15 }
 0x81d   :  { %v5093_v24 = vpop.eup %5092  ;;  %v2266_v16 = vrot.slane %v6069_v3, %v5785_v59 }
 0x81e   :  { %2168 = vmatprep.mubr.bf16.mxu1 %v1961_v22  ;;  %v1889_v17 = vmul.f32 %v5093_v24, %v5995_v44  ;;  %v1906_v21 = vmul.f32 %v1898_v55, %v1887_v34  ;;  %v1888_v25 = vmul.f32 %v5093_v24, %v5992_v43  ;;  %v1905_v28 = vmul.f32 %v1894_v9, %v1886_v23 }
 0x81f   :  { %2169 = vmatmul.mubr.bf16.vlgmr.msra.gmra.mrb[28].mxu1 %v1960_v33 }
 0x820   :  { %v1908_v30 = vmul.f32 %v1898_v55, %v1889_v17  ;;  %v1907_v10 = vmul.f32 %v1894_v9, %v1888_v25  ;;  %2653 = vmatpush1.bf16.msra.mxu1 %v4854_v52  ;;  %v6050_v41 = vadd.f32 %v1917_v57, %v1906_v21  ;;  %v6054_v4 = vadd.f32 %v1913_v50, %v1905_v28  ;;  %v4886_v9 = vld [vmem:[#allocation14 + $0x14c] ss:$16 sps:$4 sm:$0xff]   ;;  %v4884_v55 = vld [vmem:[#allocation14 + $0x148] ss:$16 sps:$4 sm:$0xff]  }
 0x821   :  { %2654 = vmatprep.subr.bf16.mxu1 %v4859_v1 }
 0x822   :  { %v6052_v15 = vadd.f32 %v1917_v57, %v1908_v30  ;;  %v6056_v54 = vadd.f32 %v1913_v50, %v1907_v10  ;;  %v4895_v50 = vld [vmem:[#allocation14 + $0x1ac] ss:$16 sps:$4 sm:$0xff]   ;;  %v4893_v57 = vld [vmem:[#allocation14 + $0x1a8] ss:$16 sps:$4 sm:$0xff]  }
 0x824   :  { %v1963_v44 = vpack.c.bf16 %v6052_v15, %v6050_v41  ;;  %v1962_v43 = vpack.c.bf16 %v6056_v54, %v6054_v4  ;;  %2655 = vmatpush1.bf16.msra.mxu1 %v4857_v11 }
 0x825   :  { %2656 = vmatprep.subr.bf16.mxu1 %v4862_v56 }
 0x826   :  { %2178 = vmatprep.mubr.bf16.mxu1 %v1963_v44 }
 0x827   :  { %2179 = vmatmul.mubr.bf16.gmra.mrb[32].mxu1 %v1962_v43 }
 0x828   :  { %2657 = vmatpush1.bf16.msra.mxu1 %v4860_v32  ;;  %2684 = vmatprep.mubr.bf16.mxu1 %v6005_v26  ;;  %v4878_v26 = vld [vmem:[#allocation14 + $0x108] ss:$16 sps:$4 sm:$0xff]   ;;  %v1964_v32 = vld [vmem:[%s6310_s13] sm:$0x3] }
 0x829   :  { %2658 = vmatprep.subr.bf16.mxu1 %v4865_v35  ;;  %v1969_v35 = vrot.slane %v1964_v32, %v5788_v60 }
 0x82c   :  { %2659 = vmatpush1.bf16.msra.mxu1 %v4863_v36 }
 0x82d   :  { %2660 = vmatprep.subr.bf16.mxu1 %v4868_v37  ;;  %v1973_v37 = vrot.slane %v1964_v32, %v5785_v59 }
 0x830   :  { %2661 = vmatpush1.bf16.msra.mxu1 %v4866_v18 }
 0x831   :  { %2662 = vmatprep.subr.bf16.mxu1 %v4871_v61 }
 0x834   :  { %2663 = vmatpush1.bf16.msra.mxu1 %v4869_v38 }
 0x835   :  { %2664 = vmatprep.subr.bf16.mxu1 %v4874_v39 }
 0x838   :  { %2665 = vmatpush1.bf16.msra.mxu1 %v4872_v2 }
 0x839   :  { %2666 = vmatprep.subr.bf16.mxu1 %v4877_v40 }
 0x83c   :  { %2667 = vmatpush1.bf16.msra.mxu1 %v4875_v42 }
 0x83d   :  { %2668 = vmatprep.subr.bf16.mxu1 %v4880_v45 }
 0x840   :  { %2669 = vmatpush1.bf16.msra.mxu1 %v4878_v26 }
 0x841   :  { %2670 = vmatprep.subr.bf16.mxu1 %v4883_v46 }
 0x844   :  { %2671 = vmatpush1.bf16.msra.mxu1 %v4881_v47 }
 0x845   :  { %2672 = vmatprep.subr.bf16.mxu1 %v4886_v9 }
 0x848   :  { %2673 = vmatpush1.bf16.msra.mxu1 %v4884_v55 }
 0x849   :  { %2674 = vmatprep.subr.bf16.mxu1 %v4889_v48 }
 0x84c   :  { %2675 = vmatpush1.bf16.msra.mxu1 %v4887_v53 }
 0x84d   :  { %2676 = vmatprep.subr.bf16.mxu1 %v4892_v49 }
 0x850   :  { %2677 = vmatpush1.bf16.msra.mxu1 %v4890_v29 }
 0x851   :  { %2678 = vmatprep.subr.bf16.mxu1 %v4895_v50 }
 0x854   :  { %2679 = vmatpush1.bf16.msra.mxu1 %v4893_v57 }
 0x855   :  { %2680 = vmatprep.subr.bf16.mxu1 %v4898_v58  ;;  %v2270_v58 = vrot.slane %v6069_v3, %v451_v6 }
 0x858   :  { %2681 = vmatpush1.bf16.msra.mxu1 %v4896_v62  ;;  %v2274_v62 = vrot.slane %v6069_v3, %v455_v8 }
 0x859   :  { %2682 = vmatprep.subr.bf16.mxu1 %v4901_v63 }
 0x85c   :  { %2683 = vmatpush1.bf16.msra.mxu1 %v4899_v0 }
 0x85d   :  { %4510 = vmatprep.subr.bf16.mxu1 %v5437_v5 }
 0x85f   :  { %2685 = vmatmul.mubr.bf16.vlgmr.msra.gmra.mrb[36].mxu1 %v6007_v20  ;;  %v2633_v22 = vpop.f32.mrb[36].mxu0 }
 0x860   :  { %2694 = vmatprep.mubr.bf16.mxu1 %v6012_v27  ;;  %v2634_v20 = vadd.f32 %v2633_v22, %v2262_v12  ;;  %v2635_v33 = vpop.f32.mrb[37].mxu0 }
 0x861   :  { %v2636_v27 = vadd.f32 %v2635_v33, %v2266_v16  ;;  %v2637_v34 = vpop.f32.mrb[38].mxu0 }
 0x862   :  { %v2638_v23 = vadd.f32 %v2637_v34, %v2262_v12  ;;  %v2639_v52 = vpop.f32.mrb[39].mxu0 }
 0x863   :  { %v2640_v24 = vadd.f32 %v2639_v52, %v2266_v16 }
 0x864   :  { %v2709_v1 = vpack.c.bf16 %v2638_v23, %v2634_v20 }
 0x865   :  { %v2711_v17 = vpack.c.bf16 %v2640_v24, %v2636_v27 }
 0x866   :  { %4499 = vmatpush3.bf16.xpose.msra.mxu0 %v2709_v1 }
 0x867   :  { %2695 = vmatmul.mubr.bf16.gmra.mrb[40].mxu1 %v6014_v19  ;;  %v2643_v21 = vpop.f32.mrb[40].mxu0  ;;  %4504 = vmatprep.subr.bf16.mxu0 %v5437_v5 }
 0x868   :  { %4512 = vmatprep.mubr.msk.bf16.mxu1 %vm5438_vm0, %v5437_v5  ;;  %4511 = vmatpush3.bf16.xpose.msra.mxu1 %v2711_v17  ;;  %v2645_v25 = vpop.f32.mrb[41].mxu0  ;;  %v2644_v19 = vadd.f32 %v2643_v21, %v2262_v12 }
 0x869   :  { %4522 = vmatprep.subr.bf16.mxu1 %v5437_v5  ;;  %v2647_v28 = vpop.f32.mrb[42].mxu0  ;;  %v2646_v30 = vadd.f32 %v2645_v25, %v2266_v16 }
 0x86a   :  { %v2649_v10 = vpop.f32.mrb[43].mxu0  ;;  %v2648_v11 = vadd.f32 %v2647_v28, %v2262_v12 }
 0x86b   :  { %v2650_v56 = vadd.f32 %v2649_v10, %v2266_v16 }
 0x86c   :  { %v2710_v44 = vpack.c.bf16 %v2648_v11, %v2644_v19 }
 0x86d   :  { %v2712_v43 = vpack.c.bf16 %v2650_v56, %v2646_v30 }
 0x8f2   :  { %v2170_v36 = vpop.f32.mrb[28].mxu1 }
 0x8f3   :  { %v2172_v18 = vpop.f32.mrb[29].mxu1  ;;  %v2171_v38 = vadd.f32 %v2170_v36, %v1969_v35 }
 0x8f4   :  { %v2174_v61 = vpop.f32.mrb[30].mxu1  ;;  %v2173_v40 = vadd.f32 %v2172_v18, %v1973_v37 }
 0x8f5   :  { %v2175_v39 = vadd.f32 %v2174_v61, %v1969_v35  ;;  %v2176_v2 = vpop.f32.mrb[31].mxu1 }
 0x8f6   :  { %v2177_v42 = vadd.f32 %v2176_v2, %v1973_v37 }
 0x8f7   :  { %v2705_v45 = vpack.c.bf16 %v2175_v39, %v2171_v38 }
 0x8f8   :  { %v2707_v26 = vpack.c.bf16 %v2177_v42, %v2173_v40 }
 0x8f9   :  { %4501 = vmatmul.mubr.bf16.vlgmr.msra.gmra.mrb[44].mxu0 %v2705_v45 }
 0x8fa   :  { %4505 = vmatpush3.bf16.xpose.msra.mxu0 %v2710_v44  ;;  %v2180_v46 = vpop.f32.mrb[32].mxu1  ;;  %4513 = vmatmul.mubr.bf16.vlgmr.msra.gmra.mrb[44].mxu1 %v2707_v26 }
 0x8fb   :  { %v2182_v47 = vpop.f32.mrb[33].mxu1  ;;  %4506 = vmatprep.mubr.msk.bf16.mxu0 %vm5438_vm0, %v5437_v5  ;;  %4516 = vmatprep.subr.bf16.mxu0 %v5437_v5  ;;  %v2181_v55 = vadd.f32 %v2180_v46, %v1969_v35 }
 0x8fc   :  { %v2184_v9 = vpop.f32.mrb[34].mxu1  ;;  %4524 = vmatprep.mubr.msk.bf16.mxu1 %vm5438_vm0, %v5437_v5  ;;  %v2183_v49 = vadd.f32 %v2182_v47, %v1973_v37 }
 0x8fd   :  { %v2185_v48 = vadd.f32 %v2184_v9, %v1969_v35  ;;  %v2186_v53 = vpop.f32.mrb[35].mxu1 }
 0x8fe   :  { %v2187_v29 = vadd.f32 %v2186_v53, %v1973_v37 }
 0x8ff   :  { %v2706_v50 = vpack.c.bf16 %v2185_v48, %v2181_v55 }
 0x900   :  { %v2708_v57 = vpack.c.bf16 %v2187_v29, %v2183_v49 }
 0x901   :  { %4507 = vmatmul.mubr.bf16.vlgmr.msra.gmra.mrb[48].mxu0 %v2706_v50 }
 0x902   :  { %4517 = vmatpush3.bf16.xpose.msra.mxu0 %v2712_v43  ;;  %4518 = vmatprep.mubr.msk.bf16.mxu0 %vm5438_vm0, %v5437_v5 }
 0x903   :  { %4528 = vmatprep.subr.bf16.mxu0 %v5437_v5 }
 0x909   :  { %4519 = vmatmul.mubr.bf16.vlgmr.msra.gmra.mrb[52].mxu0 %v2708_v57 }
 0x90a   :  { %4530 = vmatprep.mubr.msk.bf16.mxu0 %vm5438_vm0, %v5437_v5 }
 0x932   :  { %v2686_v63 = vpop.f32.mrb[36].mxu1 }
 0x933   :  { %v2687_v0 = vadd.f32 %v2686_v63, %v2270_v58  ;;  %v2688_v12 = vpop.f32.mrb[37].mxu1 }
 0x934   :  { %v6101_v16 = vadd.f32 %v2688_v12, %v2274_v62  ;;  %v2690_v22 = vpop.f32.mrb[38].mxu1 }
 0x935   :  { %v2691_v20 = vadd.f32 %v2690_v22, %v2270_v58  ;;  %v2692_v33 = vpop.f32.mrb[39].mxu1 }
 0x936   :  { %v6103_v27 = vadd.f32 %v2692_v33, %v2274_v62 }
 0x937   :  { %v2713_v34 = vpack.c.bf16 %v2691_v20, %v2687_v0 }
 0x938   :  { %v2715_v23 = vpack.c.bf16 %v6103_v27, %v6101_v16  ;;  %v4902_v16 = vld [vmem:[#allocation16] ss:$8 sps:$4 sm:$0xff]  }
 0x939   :  { %4523 = vmatpush3.bf16.msra.mxu1 %v2713_v34 }
 0x93a   :  { %v2696_v6 = vpop.f32.mrb[40].mxu1  ;;  %4534 = vmatprep.subr.bf16.mxu1 %v5437_v5 }
 0x93b   :  { %v2697_v51 = vadd.f32 %v2696_v6, %v2270_v58  ;;  %v2698_v8 = vpop.f32.mrb[41].mxu1 }
 0x93c   :  { %v6108_v3 = vadd.f32 %v2698_v8, %v2274_v62  ;;  %v2700_v52 = vpop.f32.mrb[42].mxu1 }
 0x93d   :  { %v2701_v24 = vadd.f32 %v2700_v52, %v2270_v58  ;;  %v2702_v1 = vpop.f32.mrb[43].mxu1 }
 0x93e   :  { %v6110_v17 = vadd.f32 %v2702_v1, %v2274_v62 }
 0x93f   :  { %v2714_v21 = vpack.c.bf16 %v2701_v24, %v2697_v51 }
 0x940   :  { %v2716_v25 = vpack.c.bf16 %v6110_v17, %v6108_v3  ;;  %v4908_v3 = vld [vmem:[#allocation16 + $0x20] ss:$8 sps:$4 sm:$0xff]   ;;  %v4913_v17 = vld [vmem:[#allocation16 + $0x34] ss:$8 sps:$4 sm:$0xff]  }
 0x941   :  { %4529 = vmatpush3.bf16.msra.mxu0 %v2714_v21 }
 0x942   :  { %4540 = vmatprep.subr.bf16.mxu0 %v5437_v5 }
 0x9cc   :  { %v2751_v19 = vpop.f32.mrb[44].mxu0 }
 0x9cd   :  { %v4502_v28 = vpop.f32.mrb[45].mxu0  ;;  %v2833_v30 = vpop.f32.mrb[44].mxu1  ;;  %v2881_v10 = vsel %vm1286_vm1, %v2751_v19, -inf }
 0x9ce   :  { %2882 = vmax.xlane.f32.xlu0 %v2881_v10  ;;  %v2754_v11 = vpop.f32.mrb[46].mxu0  ;;  %v4514_v56 = vpop.f32.mrb[45].mxu1  ;;  %v2893_v2 = vsel %vm1286_vm1, %v2833_v30, -inf }
 0x9cf   :  { %v4503_v44 = vpop.f32.mrb[47].mxu0  ;;  %v2836_v43 = vpop.f32.mrb[46].mxu1  ;;  %v2884_v32 = vsel %vm1286_vm1, %v2754_v11, -inf }
 0x9d0   :  { %2885 = vmax.xlane.f32.xlu1 %v2884_v32  ;;  %v4515_v35 = vpop.f32.mrb[47].mxu1  ;;  %v2896_v40 = vsel %vm1286_vm1, %v2836_v43, -inf }
 0x9d4   :  { %v2792_v36 = vpop.f32.mrb[48].mxu0 }
 0x9d5   :  { %v4508_v37 = vpop.f32.mrb[49].mxu0  ;;  %v2887_v18 = vsel %vm1286_vm1, %v2792_v36, -inf }
 0x9d6   :  { %2888 = vmax.xlane.f32.xlu0 %v2887_v18  ;;  %v2795_v61 = vpop.f32.mrb[50].mxu0 }
 0x9d7   :  { %v4509_v38 = vpop.f32.mrb[51].mxu0  ;;  %v2890_v39 = vsel %vm1286_vm1, %v2795_v61, -inf }
 0x9d8   :  { %2891 = vmax.xlane.f32.xlu1 %v2890_v39 }
 0x9da   :  { %2894 = vmax.xlane.f32.xlu0 %v2893_v2 }
 0x9dc   :  { %2897 = vmax.xlane.f32.xlu1 %v2896_v40  ;;  %v2874_v42 = vpop.f32.mrb[52].mxu0 }
 0x9dd   :  { %v4520_v45 = vpop.f32.mrb[53].mxu0  ;;  %v2899_v26 = vsel %vm1286_vm1, %v2874_v42, -inf }
 0x9de   :  { %2900 = vmax.xlane.f32.xlu0 %v2899_v26  ;;  %v2877_v46 = vpop.f32.mrb[54].mxu0 }
 0x9df   :  { %v4521_v47 = vpop.f32.mrb[55].mxu0  ;;  %v2902_v9 = vsel %vm1286_vm1, %v2877_v46, -inf }
 0x9e0   :  { %2903 = vmax.xlane.f32.xlu1 %v2902_v9 }
 0xa5b   :  { %v2883_v55 = vpop.xlane.xlu0 %2882 }
 0xa5c   :  { %v2905_v48 = vsub.f32 %v2751_v19, %v2883_v55 }
 0xa5d   :  { %v2886_v53 = vpop.xlane.xlu1 %2885 }
 0xa5e   :  { %v2913_v49 = vmul.f32 1.442695, %v2905_v48  ;;  %v2906_v29 = vsub.f32 %v2754_v11, %v2886_v53 }
 0xa60   :  { %5094 = vpow2.f32 %v2913_v49  ;;  %v2915_v50 = vmul.f32 1.442695, %v2906_v29 }
 0xa62   :  { %5096 = vpow2.f32 %v2915_v50  ;;  %v4904_v50 = vld [vmem:[#allocation16 + $0x4] ss:$8 sps:$4 sm:$0xff]  }
 0xa63   :  { %v2889_v57 = vpop.xlane.xlu0 %2888 }
 0xa64   :  { %v2907_v58 = vsub.f32 %v2792_v36, %v2889_v57 }
 0xa65   :  { %v2892_v62 = vpop.xlane.xlu1 %2891 }
 0xa66   :  { %v2917_v63 = vmul.f32 1.442695, %v2907_v58  ;;  %v2908_v0 = vsub.f32 %v2795_v61, %v2892_v62 }
 0xa67   :  { %v2895_v12 = vpop.xlane.xlu0 %2894 }
 0xa68   :  { %5098 = vpow2.f32 %v2917_v63  ;;  %v2919_v22 = vmul.f32 1.442695, %v2908_v0  ;;  %v2909_v20 = vsub.f32 %v2833_v30, %v2895_v12 }
 0xa69   :  { %v2898_v33 = vpop.xlane.xlu1 %2897 }
 0xa6a   :  { %v5095_v34 = vpop.eup %5094  ;;  %5100 = vpow2.f32 %v2919_v22  ;;  %v2921_v6 = vmul.f32 1.442695, %v2909_v20  ;;  %v2910_v51 = vsub.f32 %v2836_v43, %v2898_v33 }
 0xa6b   :  { %v2901_v8 = vpop.xlane.xlu0 %2900  ;;  %v2929_v52 = vsel %vm1286_vm1, %v5095_v34, 0.0 }
 0xa6c   :  { %v5097_v24 = vpop.eup %5096  ;;  %5102 = vpow2.f32 %v2921_v6  ;;  %v2923_v1 = vmul.f32 1.442695, %v2910_v51  ;;  %v2911_v21 = vsub.f32 %v2874_v42, %v2901_v8  ;;  %2930 = vadd.xlane.f32.xlu0 %v2929_v52 }
 0xa6d   :  { %v2904_v19 = vpop.xlane.xlu1 %2903  ;;  %v2932_v28 = vsel %vm1286_vm1, %v5097_v24, 0.0 }
 0xa6e   :  { %5104 = vpow2.f32 %v2923_v1  ;;  %v2925_v10 = vmul.f32 1.442695, %v2911_v21  ;;  %v2912_v11 = vsub.f32 %v2877_v46, %v2904_v19  ;;  %2933 = vadd.xlane.f32.xlu1 %v2932_v28  ;;  %v4910_v21 = vld [vmem:[#allocation16 + $0x24] ss:$8 sps:$4 sm:$0xff]   ;;  %v4914_v19 = vld [vmem:[#allocation16 + $0x40] ss:$8 sps:$4 sm:$0xff]  }
 0xa6f   :  { %v4919_v28 = vld [vmem:[#allocation16 + $0x54] ss:$8 sps:$4 sm:$0xff]  }
 0xa70   :  { %5106 = vpow2.f32 %v2925_v10  ;;  %v2927_v30 = vmul.f32 1.442695, %v2912_v11  ;;  %v4917_v10 = vld [vmem:[#allocation16 + $0x50] ss:$8 sps:$4 sm:$0xff]   ;;  %v4922_v11 = vld [vmem:[#allocation16 + $0x64] ss:$8 sps:$4 sm:$0xff]  }
 0xa72   :  { %v5099_v56 = vpop.eup %5098  ;;  %5108 = vpow2.f32 %v2927_v30  ;;  %v4920_v30 = vld [vmem:[#allocation16 + $0x60] ss:$8 sps:$4 sm:$0xff]  }
 0xa73   :  { %v2935_v44 = vsel %vm1286_vm1, %v5099_v56, 0.0 }
 0xa74   :  { %v5101_v43 = vpop.eup %5100  ;;  %2936 = vadd.xlane.f32.xlu0 %v2935_v44  ;;  %v4923_v44 = vld [vmem:[#allocation16 + $0x70] ss:$8 sps:$4 sm:$0xff]  }
 0xa75   :  { %v2938_v32 = vsel %vm1286_vm1, %v5101_v43, 0.0 }
 0xa76   :  { %v5103_v35 = vpop.eup %5102  ;;  %2939 = vadd.xlane.f32.xlu1 %v2938_v32  ;;  %v4926_v32 = vld [vmem:[#allocation16 + $0x80] ss:$8 sps:$4 sm:$0xff]  }
 0xa77   :  { %v2941_v36 = vsel %vm1286_vm1, %v5103_v35, 0.0 }
 0xa78   :  { %v5105_v37 = vpop.eup %5104  ;;  %2942 = vadd.xlane.f32.xlu0 %v2941_v36  ;;  %v4929_v36 = vld [vmem:[#allocation16 + $0x90] ss:$8 sps:$4 sm:$0xff]  }
 0xa79   :  { %v2944_v18 = vsel %vm1286_vm1, %v5105_v37, 0.0 }
 0xa7a   :  { %v5107_v61 = vpop.eup %5106  ;;  %2945 = vadd.xlane.f32.xlu1 %v2944_v18  ;;  %v4932_v18 = vld [vmem:[#allocation16 + $0xa0] ss:$8 sps:$4 sm:$0xff]  }
 0xa7b   :  { %v2947_v38 = vsel %vm1286_vm1, %v5107_v61, 0.0 }
 0xa7c   :  { %v5109_v39 = vpop.eup %5108  ;;  %2948 = vadd.xlane.f32.xlu0 %v2947_v38  ;;  %v4935_v38 = vld [vmem:[#allocation16 + $0xb0] ss:$8 sps:$4 sm:$0xff]  }
 0xa7d   :  { %v2950_v2 = vsel %vm1286_vm1, %v5109_v39, 0.0 }
 0xa7e   :  { %2951 = vadd.xlane.f32.xlu1 %v2950_v2  ;;  %v4938_v2 = vld [vmem:[#allocation16 + $0xc0] ss:$8 sps:$4 sm:$0xff]  }
 0xaf9   :  { %v2931_v40 = vpop.xlane.xlu0 %2930 }
 0xafa   :  { %5110 = vrcp.f32 %v2931_v40  ;;  %v4943_v40 = vld [vmem:[#allocation16 + $0xd4] ss:$8 sps:$4 sm:$0xff]  }
 0xafb   :  { %v2934_v42 = vpop.xlane.xlu1 %2933 }
 0xafc   :  { %5112 = vrcp.f32 %v2934_v42  ;;  %v4941_v42 = vld [vmem:[#allocation16 + $0xd0] ss:$8 sps:$4 sm:$0xff]  }
 0xb01   :  { %v2937_v45 = vpop.xlane.xlu0 %2936 }
 0xb02   :  { %5114 = vrcp.f32 %v2937_v45  ;;  %v4946_v45 = vld [vmem:[#allocation16 + $0xe4] ss:$8 sps:$4 sm:$0xff]  }
 0xb03   :  { %v2940_v26 = vpop.xlane.xlu1 %2939 }
 0xb04   :  { %v5111_v46 = vpop.eup %5110  ;;  %5116 = vrcp.f32 %v2940_v26  ;;  %v4944_v26 = vld [vmem:[#allocation16 + $0xe0] ss:$8 sps:$4 sm:$0xff]  }
 0xb05   :  { %v2943_v47 = vpop.xlane.xlu0 %2942  ;;  %v2961_v55 = vmul.f32 %v5111_v46, %v5095_v34  ;;  %v4949_v46 = vld [vmem:[#allocation16 + $0xf4] ss:$8 sps:$4 sm:$0xff]  }
 0xb06   :  { %v5113_v9 = vpop.eup %5112  ;;  %5118 = vrcp.f32 %v2943_v47  ;;  %v4947_v47 = vld [vmem:[#allocation16 + $0xf0] ss:$8 sps:$4 sm:$0xff]  }
 0xb07   :  { %v2962_v48 = vmul.f32 %v5113_v9, %v5097_v24  ;;  %v2946_v53 = vpop.xlane.xlu1 %2945  ;;  %v4905_v24 = vld [vmem:[#allocation16 + $0x10] ss:$8 sps:$4 sm:$0xff]  }
 0xb08   :  { %5120 = vrcp.f32 %v2946_v53 }
 0xb09   :  { %v2949_v49 = vpop.xlane.xlu0 %2948  ;;  %v2969_v29 = vpack.c.bf16 %v2962_v48, %v2961_v55 }
 0xb0a   :  { %5122 = vrcp.f32 %v2949_v49 }
 0xb0b   :  { %v2952_v57 = vpop.xlane.xlu1 %2951  ;;  %4525 = vmatmul.mubr.msk.bf16.vlgmr.msra.gmra.mrb[48].mxu1 %vm1286_vm1, %v2969_v29 }
 0xb0c   :  { %v5115_v58 = vpop.eup %5114  ;;  %5124 = vrcp.f32 %v2952_v57  ;;  %4535 = vmatpush3.bf16.msra.mxu1 %v2715_v23  ;;  %4536 = vmatprep.mubr.msk.bf16.mxu1 %vm5438_vm0, %v5437_v5  ;;  %v4907_v23 = vld [vmem:[#allocation16 + $0x14] ss:$8 sps:$4 sm:$0xff]  }
 0xb0d   :  { %3357 = vmatprep.subr.bf16.mxu1 %v4904_v50  ;;  %v2963_v63 = vmul.f32 %v5115_v58, %v5099_v56  ;;  %v4925_v56 = vld [vmem:[#allocation16 + $0x74] ss:$8 sps:$4 sm:$0xff]  }
 0xb0e   :  { %v5117_v62 = vpop.eup %5116 }
 0xb0f   :  { %v2964_v0 = vmul.f32 %v5117_v62, %v5101_v43  ;;  %v4928_v43 = vld [vmem:[#allocation16 + $0x84] ss:$8 sps:$4 sm:$0xff]  }
 0xb10   :  { %v5119_v12 = vpop.eup %5118 }
 0xb11   :  { %v2970_v22 = vpack.c.bf16 %v2964_v0, %v2963_v63  ;;  %v2965_v33 = vmul.f32 %v5119_v12, %v5103_v35  ;;  %v4931_v35 = vld [vmem:[#allocation16 + $0x94] ss:$8 sps:$4 sm:$0xff]  }
 0xb12   :  { %v5121_v20 = vpop.eup %5120 }
 0xb13   :  { %v2966_v34 = vmul.f32 %v5121_v20, %v5105_v37  ;;  %4531 = vmatmul.mubr.msk.bf16.vlgmr.msra.gmra.mrb[56].mxu0 %vm1286_vm1, %v2970_v22  ;;  %v4934_v37 = vld [vmem:[#allocation16 + $0xa4] ss:$8 sps:$4 sm:$0xff]  }
 0xb14   :  { %v5123_v6 = vpop.eup %5122  ;;  %4541 = vmatpush3.bf16.msra.mxu0 %v2716_v25  ;;  %4542 = vmatprep.mubr.msk.bf16.mxu0 %vm5438_vm0, %v5437_v5  ;;  %v4911_v5 = vld [vmem:[#allocation16 + $0x30] ss:$8 sps:$4 sm:$0xff]   ;;  %v4916_v25 = vld [vmem:[#allocation16 + $0x44] ss:$8 sps:$4 sm:$0xff]  }
 0xb15   :  { %v2971_v27 = vpack.c.bf16 %v2966_v34, %v2965_v33  ;;  %v2967_v8 = vmul.f32 %v5123_v6, %v5107_v61  ;;  %v4937_v61 = vld [vmem:[#allocation16 + $0xb4] ss:$8 sps:$4 sm:$0xff]  }
 0xb16   :  { %v5125_v51 = vpop.eup %5124 }
 0xb17   :  { %v2968_v52 = vmul.f32 %v5125_v51, %v5109_v39  ;;  %4537 = vmatmul.mubr.msk.bf16.vlgmr.msra.gmra.mrb[52].mxu1 %vm1286_vm1, %v2971_v27  ;;  %v4940_v39 = vld [vmem:[#allocation16 + $0xc4] ss:$8 sps:$4 sm:$0xff]  }
 0xb18   :  { %3358 = vmatpush1.bf16.msra.mxu1 %v4902_v16 }
 0xb19   :  { %v2972_v1 = vpack.c.bf16 %v2968_v52, %v2967_v8  ;;  %3359 = vmatprep.subr.bf16.mxu1 %v4907_v23  ;;  %v3185_v23 = vld [vmem:[%s6314_s17] sm:$0x3] }
 0xb1a   :  { %v3190_v51 = vrot.slane %v3185_v23, %v5788_v60  ;;  %v3194_v8 = vrot.slane %v3185_v23, %v5785_v59 }
 0xb1b   :  { %4543 = vmatmul.mubr.msk.bf16.vlgmr.msra.gmra.mrb[60].mxu0 %vm1286_vm1, %v2972_v1 }
 0xb1c   :  { %3360 = vmatpush1.bf16.msra.mxu1 %v4905_v24 }
 0xb1d   :  { %3361 = vmatprep.subr.bf16.mxu1 %v4910_v21 }
 0xb20   :  { %3362 = vmatpush1.bf16.msra.mxu1 %v4908_v3 }
 0xb21   :  { %3363 = vmatprep.subr.bf16.mxu1 %v4913_v17 }
 0xb24   :  { %3364 = vmatpush1.bf16.msra.mxu1 %v4911_v5 }
 0xb25   :  { %3365 = vmatprep.subr.bf16.mxu1 %v4916_v25 }
 0xb28   :  { %3366 = vmatpush1.bf16.msra.mxu1 %v4914_v19 }
 0xb29   :  { %3367 = vmatprep.subr.bf16.mxu1 %v4919_v28 }
 0xb2c   :  { %3368 = vmatpush1.bf16.msra.mxu1 %v4917_v10 }
 0xb2d   :  { %3369 = vmatprep.subr.bf16.mxu1 %v4922_v11 }
 0xb30   :  { %3370 = vmatpush1.bf16.msra.mxu1 %v4920_v30 }
 0xb31   :  { %3371 = vmatprep.subr.bf16.mxu1 %v4925_v56 }
 0xb34   :  { %3372 = vmatpush1.bf16.msra.mxu1 %v4923_v44 }
 0xb35   :  { %3373 = vmatprep.subr.bf16.mxu1 %v4928_v43 }
 0xb38   :  { %3374 = vmatpush1.bf16.msra.mxu1 %v4926_v32 }
 0xb39   :  { %3375 = vmatprep.subr.bf16.mxu1 %v4931_v35 }
 0xb3c   :  { %3376 = vmatpush1.bf16.msra.mxu1 %v4929_v36 }
 0xb3d   :  { %3377 = vmatprep.subr.bf16.mxu1 %v4934_v37 }
 0xb40   :  { %3378 = vmatpush1.bf16.msra.mxu1 %v4932_v18 }
 0xb41   :  { %3379 = vmatprep.subr.bf16.mxu1 %v4937_v61 }
 0xb44   :  { %3380 = vmatpush1.bf16.msra.mxu1 %v4935_v38 }
 0xb45   :  { %3381 = vmatprep.subr.bf16.mxu1 %v4940_v39  ;;  %v4950_v39 = vld [vmem:[#allocation17] ss:$8 sps:$4 sm:$0xff]  }
 0xb48   :  { %3382 = vmatpush1.bf16.msra.mxu1 %v4938_v2  ;;  %v4952_v2 = vld [vmem:[#allocation17 + $0x4] ss:$8 sps:$4 sm:$0xff]  }
 0xb49   :  { %3383 = vmatprep.subr.bf16.mxu1 %v4943_v40  ;;  %v4955_v40 = vld [vmem:[#allocation17 + $0x14] ss:$8 sps:$4 sm:$0xff]   ;;  %3730 = vmatprep.subr.bf16.mxu0 %v4952_v2  ;;  %v5001_v2 = vld [vmem:[#allocation19 + $0x10] ss:$8 sps:$4 sm:$0xff]  }
 0xb4a   :  { %3731 = vmatpush1.bf16.msra.mxu0 %v4950_v39  ;;  %v5003_v39 = vld [vmem:[#allocation19 + $0x14] ss:$8 sps:$4 sm:$0xff]  }
 0xb4b   :  { %3732 = vmatprep.subr.bf16.mxu0 %v4955_v40  ;;  %v5006_v40 = vld [vmem:[#allocation19 + $0x24] ss:$8 sps:$4 sm:$0xff]  }
 0xb4c   :  { %3384 = vmatpush1.bf16.msra.mxu1 %v4941_v42  ;;  %v4956_v42 = vld [vmem:[#allocation17 + $0x20] ss:$8 sps:$4 sm:$0xff]  }
 0xb4d   :  { %3385 = vmatprep.subr.bf16.mxu1 %v4946_v45  ;;  %v4959_v45 = vld [vmem:[#allocation17 + $0x30] ss:$8 sps:$4 sm:$0xff]  }
 0xb50   :  { %3386 = vmatpush1.bf16.msra.mxu1 %v4944_v26  ;;  %v4964_v26 = vld [vmem:[#allocation17 + $0x44] ss:$8 sps:$4 sm:$0xff]  }
 0xb51   :  { %3387 = vmatprep.subr.bf16.mxu1 %v4949_v46  ;;  %v4962_v46 = vld [vmem:[#allocation17 + $0x40] ss:$8 sps:$4 sm:$0xff]  }
 0xb54   :  { %3388 = vmatpush1.bf16.msra.mxu1 %v4947_v47  ;;  %v4967_v47 = vld [vmem:[#allocation17 + $0x54] ss:$8 sps:$4 sm:$0xff]  }
 0xbde   :  { %v3010_v9 = vpop.f32.mrb[48].mxu1 }
 0xbdf   :  { %v4526_v55 = vpop.f32.mrb[49].mxu1 }
 0xbe0   :  { %v3013_v48 = vpop.f32.mrb[50].mxu1  ;;  %v4970_v55 = vld [vmem:[#allocation17 + $0x64] ss:$8 sps:$4 sm:$0xff]  }
 0xbe1   :  { %v3181_v53 = vpack.c.bf16 %v3013_v48, %v3010_v9  ;;  %v4527_v49 = vpop.f32.mrb[51].mxu1  ;;  %v4965_v9 = vld [vmem:[#allocation17 + $0x50] ss:$8 sps:$4 sm:$0xff]   ;;  %v4968_v48 = vld [vmem:[#allocation17 + $0x60] ss:$8 sps:$4 sm:$0xff]  }
 0xbe2   :  { %v4971_v49 = vld [vmem:[#allocation17 + $0x70] ss:$8 sps:$4 sm:$0xff]  }
 0xbe6   :  { %v3054_v29 = vpop.f32.mrb[56].mxu0 }
 0xbe7   :  { %v4532_v50 = vpop.f32.mrb[57].mxu0 }
 0xbe8   :  { %v3057_v57 = vpop.f32.mrb[58].mxu0  ;;  %v4974_v50 = vld [vmem:[#allocation17 + $0x80] ss:$8 sps:$4 sm:$0xff]  }
 0xbe9   :  { %v3183_v58 = vpack.c.bf16 %v3057_v57, %v3054_v29  ;;  %v4533_v62 = vpop.f32.mrb[59].mxu0  ;;  %v4976_v29 = vld [vmem:[#allocation17 + $0x84] ss:$8 sps:$4 sm:$0xff]   ;;  %v4979_v57 = vld [vmem:[#allocation17 + $0x94] ss:$8 sps:$4 sm:$0xff]  }
 0xbea   :  { %v3098_v63 = vpop.f32.mrb[52].mxu1 }
 0xbeb   :  { %v4538_v0 = vpop.f32.mrb[53].mxu1 }
 0xbec   :  { %v3101_v12 = vpop.f32.mrb[54].mxu1 }
 0xbed   :  { %v3182_v22 = vpack.c.bf16 %v3101_v12, %v3098_v63  ;;  %v4539_v20 = vpop.f32.mrb[55].mxu1 }
 0xbee   :  { %v3142_v33 = vpop.f32.mrb[60].mxu0 }
 0xbef   :  { %v4544_v34 = vpop.f32.mrb[61].mxu0  ;;  %3389 = vmatprep.mubr.bf16.mxu1 %v3182_v22 }
 0xbf0   :  { %v3145_v6 = vpop.f32.mrb[62].mxu0  ;;  %3390 = vmatmul.mubr.bf16.vlgmr.msra.gmra.mrb[56].mxu1 %v3181_v53  ;;  %v4973_v53 = vld [vmem:[#allocation17 + $0x74] ss:$8 sps:$4 sm:$0xff]  }
 0xbf1   :  { %v3184_v16 = vpack.c.bf16 %v3145_v6, %v3142_v33  ;;  %v4545_v27 = vpop.f32.mrb[63].mxu0 }
 0xbf3   :  { %3399 = vmatprep.mubr.bf16.mxu1 %v3184_v16 }
 0xbf8   :  { %3400 = vmatmul.mubr.bf16.gmra.mrb[60].mxu1 %v3183_v58  ;;  %v4977_v58 = vld [vmem:[#allocation17 + $0x90] ss:$8 sps:$4 sm:$0xff]  }
 0xcc3   :  { %v3391_v52 = vpop.f32.mrb[56].mxu1 }
 0xcc4   :  { %v3392_v24 = vadd.f32 %v3391_v52, %v3190_v51  ;;  %v3393_v1 = vpop.f32.mrb[57].mxu1 }
 0xcc5   :  { %v3394_v21 = vadd.f32 %v3393_v1, %v3194_v8  ;;  %v3395_v3 = vpop.f32.mrb[58].mxu1 }
 0xcc6   :  { %v6151_v17 = vadd.f32 %v3392_v24, %v6038_v31  ;;  %v3396_v5 = vadd.f32 %v3395_v3, %v3190_v51  ;;  %v3397_v25 = vpop.f32.mrb[59].mxu1 }
 0xcc7   :  { %v6154_v19 = vadd.f32 %v3394_v21, %v6034_v14  ;;  %v3398_v28 = vadd.f32 %v3397_v25, %v3194_v8 }
 0xcc8   :  { %v6157_v10 = vadd.f32 %v3396_v5, %v6040_v7 }
 0xcc9   :  { %v6160_v11 = vadd.f32 %v3398_v28, %v6036_v13  ;;  %v3420_v30 = vadd.f32 %v6154_v19, %v6151_v17 }
 0xccb   :  { %3421 = vadd.xlane.f32.xlu0 %v3420_v30  ;;  %v3401_v56 = vpop.f32.mrb[60].mxu1  ;;  %v3423_v31 = vadd.f32 %v6160_v11, %v6157_v10 }
 0xccc   :  { %v3402_v44 = vadd.f32 %v3401_v56, %v3190_v51  ;;  %v3403_v43 = vpop.f32.mrb[61].mxu1 }
 0xccd   :  { %v3404_v32 = vadd.f32 %v3403_v43, %v3194_v8  ;;  %3424 = vadd.xlane.f32.xlu1 %v3423_v31  ;;  %v3405_v14 = vpop.f32.mrb[62].mxu1  ;;  %v4982_v31 = vld [vmem:[#allocation17 + $0xa4] ss:$8 sps:$4 sm:$0xff]   ;;  %v4985_v43 = vld [vmem:[#allocation17 + $0xb4] ss:$8 sps:$4 sm:$0xff]  }
 0xcce   :  { %v6167_v35 = vadd.f32 %v3402_v44, %v6054_v4  ;;  %v3406_v7 = vadd.f32 %v3405_v14, %v3190_v51  ;;  %v3407_v36 = vpop.f32.mrb[63].mxu1  ;;  %v4980_v44 = vld [vmem:[#allocation17 + $0xa0] ss:$8 sps:$4 sm:$0xff]   ;;  %v4988_v14 = vld [vmem:[#allocation17 + $0xc4] ss:$8 sps:$4 sm:$0xff]  }
 0xccf   :  { %v6170_v13 = vadd.f32 %v3404_v32, %v6050_v41  ;;  %v3408_v37 = vadd.f32 %v3407_v36, %v3194_v8  ;;  %v4953_v41 = vld [vmem:[#allocation17 + $0x10] ss:$8 sps:$4 sm:$0xff]  }
 0xcd0   :  { %v6173_v18 = vadd.f32 %v3406_v7, %v6056_v54  ;;  %v4958_v54 = vld [vmem:[#allocation17 + $0x24] ss:$8 sps:$4 sm:$0xff]   ;;  %3733 = vmatpush1.bf16.msra.mxu0 %v4953_v41  ;;  %v4983_v32 = vld [vmem:[#allocation17 + $0xb0] ss:$8 sps:$4 sm:$0xff]   ;;  %v4991_v7 = vld [vmem:[#allocation17 + $0xd4] ss:$8 sps:$4 sm:$0xff]  }
 0xcd1   :  { %v6176_v61 = vadd.f32 %v3408_v37, %v6052_v15  ;;  %v3426_v38 = vadd.f32 %v6170_v13, %v6167_v35  ;;  %3734 = vmatprep.subr.bf16.mxu0 %v4958_v54  ;;  %v4961_v15 = vld [vmem:[#allocation17 + $0x34] ss:$8 sps:$4 sm:$0xff]   ;;  %v4989_v36 = vld [vmem:[#allocation17 + $0xd0] ss:$8 sps:$4 sm:$0xff]   ;;  %v4994_v37 = vld [vmem:[#allocation17 + $0xe4] ss:$8 sps:$4 sm:$0xff]  }
 0xcd2   :  { %v5004_v41 = vld [vmem:[#allocation19 + $0x20] ss:$8 sps:$4 sm:$0xff]   ;;  %v5009_v54 = vld [vmem:[#allocation19 + $0x34] ss:$8 sps:$4 sm:$0xff]  }
 0xcd3   :  { %3427 = vadd.xlane.f32.xlu0 %v3426_v38  ;;  %v3429_v4 = vadd.f32 %v6176_v61, %v6173_v18  ;;  %v4998_v38 = vld [vmem:[#allocation19] ss:$8 sps:$4 sm:$0xff]  }
 0xcd4   :  { %3735 = vmatpush1.bf16.msra.mxu0 %v4956_v42  ;;  %v5007_v42 = vld [vmem:[#allocation19 + $0x30] ss:$8 sps:$4 sm:$0xff]  }
 0xcd5   :  { %3430 = vadd.xlane.f32.xlu1 %v3429_v4  ;;  %3736 = vmatprep.subr.bf16.mxu0 %v4961_v15  ;;  %v5000_v4 = vld [vmem:[#allocation19 + $0x4] ss:$8 sps:$4 sm:$0xff]  }
 0xcd6   :  { %3999 = vmatprep.subr.bf16.mxu1 %v5000_v4  ;;  %v5012_v15 = vld [vmem:[#allocation19 + $0x44] ss:$8 sps:$4 sm:$0xff]  }
 0xcd7   :  { %4000 = vmatpush1.bf16.msra.mxu1 %v4998_v38 }
 0xcd8   :  { %3737 = vmatpush1.bf16.msra.mxu0 %v4959_v45  ;;  %4001 = vmatprep.subr.bf16.mxu1 %v5003_v39  ;;  %v5010_v45 = vld [vmem:[#allocation19 + $0x40] ss:$8 sps:$4 sm:$0xff]  }
 0xcd9   :  { %3738 = vmatprep.subr.bf16.mxu0 %v4964_v26  ;;  %v5015_v26 = vld [vmem:[#allocation19 + $0x54] ss:$8 sps:$4 sm:$0xff]  }
 0xcdb   :  { %4002 = vmatpush1.bf16.msra.mxu1 %v5001_v2 }
 0xcdc   :  { %3739 = vmatpush1.bf16.msra.mxu0 %v4962_v46  ;;  %4003 = vmatprep.subr.bf16.mxu1 %v5006_v40  ;;  %v5013_v46 = vld [vmem:[#allocation19 + $0x50] ss:$8 sps:$4 sm:$0xff]  }
 0xcdd   :  { %3740 = vmatprep.subr.bf16.mxu0 %v4967_v47  ;;  %v5018_v47 = vld [vmem:[#allocation19 + $0x64] ss:$8 sps:$4 sm:$0xff]  }
 0xcdf   :  { %4004 = vmatpush1.bf16.msra.mxu1 %v5004_v41 }
 0xce0   :  { %3741 = vmatpush1.bf16.msra.mxu0 %v4965_v9  ;;  %4005 = vmatprep.subr.bf16.mxu1 %v5009_v54  ;;  %v5016_v9 = vld [vmem:[#allocation19 + $0x60] ss:$8 sps:$4 sm:$0xff]  }
 0xce1   :  { %3742 = vmatprep.subr.bf16.mxu0 %v4970_v55  ;;  %v5021_v55 = vld [vmem:[#allocation19 + $0x74] ss:$8 sps:$4 sm:$0xff]  }
 0xce3   :  { %4006 = vmatpush1.bf16.msra.mxu1 %v5007_v42 }
 0xce4   :  { %3743 = vmatpush1.bf16.msra.mxu0 %v4968_v48  ;;  %4007 = vmatprep.subr.bf16.mxu1 %v5012_v15  ;;  %v5019_v48 = vld [vmem:[#allocation19 + $0x70] ss:$8 sps:$4 sm:$0xff]  }
 0xce5   :  { %3744 = vmatprep.subr.bf16.mxu0 %v4973_v53  ;;  %v5024_v53 = vld [vmem:[#allocation19 + $0x84] ss:$8 sps:$4 sm:$0xff]  }
 0xce7   :  { %4008 = vmatpush1.bf16.msra.mxu1 %v5010_v45 }
 0xce8   :  { %3745 = vmatpush1.bf16.msra.mxu0 %v4971_v49  ;;  %4009 = vmatprep.subr.bf16.mxu1 %v5015_v26  ;;  %v5022_v49 = vld [vmem:[#allocation19 + $0x80] ss:$8 sps:$4 sm:$0xff]  }
 0xce9   :  { %3746 = vmatprep.subr.bf16.mxu0 %v4976_v29  ;;  %v5027_v29 = vld [vmem:[#allocation19 + $0x94] ss:$8 sps:$4 sm:$0xff]  }
 0xceb   :  { %4010 = vmatpush1.bf16.msra.mxu1 %v5013_v46 }
 0xcec   :  { %3747 = vmatpush1.bf16.msra.mxu0 %v4974_v50  ;;  %4011 = vmatprep.subr.bf16.mxu1 %v5018_v47  ;;  %v5025_v50 = vld [vmem:[#allocation19 + $0x90] ss:$8 sps:$4 sm:$0xff]  }
 0xced   :  { %3748 = vmatprep.subr.bf16.mxu0 %v4979_v57  ;;  %v5030_v57 = vld [vmem:[#allocation19 + $0xa4] ss:$8 sps:$4 sm:$0xff]  }
 0xcef   :  { %4012 = vmatpush1.bf16.msra.mxu1 %v5016_v9 }
 0xcf0   :  { %3749 = vmatpush1.bf16.msra.mxu0 %v4977_v58  ;;  %4013 = vmatprep.subr.bf16.mxu1 %v5021_v55  ;;  %v5028_v58 = vld [vmem:[#allocation19 + $0xa0] ss:$8 sps:$4 sm:$0xff]  }
 0xcf1   :  { %3750 = vmatprep.subr.bf16.mxu0 %v4982_v31 }
 0xcf3   :  { %4014 = vmatpush1.bf16.msra.mxu1 %v5019_v48 }
 0xcf4   :  { %3751 = vmatpush1.bf16.msra.mxu0 %v4980_v44  ;;  %4015 = vmatprep.subr.bf16.mxu1 %v5024_v53 }
 0xcf5   :  { %3752 = vmatprep.subr.bf16.mxu0 %v4985_v43 }
 0xcf7   :  { %4016 = vmatpush1.bf16.msra.mxu1 %v5022_v49  ;;  %v5040_v49 = vld [vmem:[#allocation19 + $0xe0] ss:$8 sps:$4 sm:$0xff]  }
 0xcf8   :  { %3753 = vmatpush1.bf16.msra.mxu0 %v4983_v32  ;;  %4017 = vmatprep.subr.bf16.mxu1 %v5027_v29  ;;  %v5045_v29 = vld [vmem:[#allocation19 + $0xf4] ss:$8 sps:$4 sm:$0xff]  }
 0xcf9   :  { %3754 = vmatprep.subr.bf16.mxu0 %v4988_v14 }
 0xcfb   :  { %4018 = vmatpush1.bf16.msra.mxu1 %v5025_v50  ;;  %v5043_v50 = vld [vmem:[#allocation19 + $0xf0] ss:$8 sps:$4 sm:$0xff]  }
 0xcfc   :  { %4019 = vmatprep.subr.bf16.mxu1 %v5030_v57  ;;  %v3558_v57 = vld [vmem:[%s6316_s19] sm:$0x3] }
 0xcff   :  { %4020 = vmatpush1.bf16.msra.mxu1 %v5028_v58  ;;  %v3563_v58 = vrot.slane %v3558_v57, %v5788_v60 }
 0xd58   :  { %v3422_v62 = vpop.xlane.xlu0 %3421 }
 0xd59   :  { %v3432_v63 = vmul.f32 0.00390625, %v3422_v62  ;;  %v5033_v62 = vld [vmem:[#allocation19 + $0xb4] ss:$8 sps:$4 sm:$0xff]  }
 0xd5a   :  { %v3425_v0 = vpop.xlane.xlu1 %3424  ;;  %4021 = vmatprep.subr.bf16.mxu1 %v5033_v62  ;;  %v3567_v62 = vrot.slane %v3558_v57, %v5785_v59 }
 0xd5b   :  { %v6183_v12 = vsub.f32 %v6151_v17, %v3432_v63  ;;  %v6186_v22 = vsub.f32 %v6154_v19, %v3432_v63  ;;  %v3433_v20 = vmul.f32 0.00390625, %v3425_v0  ;;  %v5031_v63 = vld [vmem:[#allocation19 + $0xb0] ss:$8 sps:$4 sm:$0xff]   ;;  %v5036_v0 = vld [vmem:[#allocation19 + $0xc4] ss:$8 sps:$4 sm:$0xff]  }
 0xd5c   :  { %4022 = vmatpush1.bf16.msra.mxu1 %v5031_v63 }
 0xd5d   :  { %v6189_v33 = vsub.f32 %v6157_v10, %v3433_v20  ;;  %v6192_v34 = vsub.f32 %v6160_v11, %v3433_v20  ;;  %v3444_v6 = vmul.f32 %v6183_v12, %v6183_v12  ;;  %v3445_v16 = vmul.f32 %v6186_v22, %v6186_v22  ;;  %v5034_v20 = vld [vmem:[#allocation19 + $0xc0] ss:$8 sps:$4 sm:$0xff]   ;;  %4023 = vmatprep.subr.bf16.mxu1 %v5036_v0 }
 0xd5f   :  { %v3452_v27 = vadd.f32 %v3445_v16, %v3444_v6  ;;  %v3446_v23 = vmul.f32 %v6189_v33, %v6189_v33  ;;  %v3447_v51 = vmul.f32 %v6192_v34, %v6192_v34  ;;  %v5039_v6 = vld [vmem:[#allocation19 + $0xd4] ss:$8 sps:$4 sm:$0xff]   ;;  %v5037_v16 = vld [vmem:[#allocation19 + $0xd0] ss:$8 sps:$4 sm:$0xff]  }
 0xd60   :  { %v3428_v8 = vpop.xlane.xlu0 %3427  ;;  %4024 = vmatpush1.bf16.msra.mxu1 %v5034_v20 }
 0xd61   :  { %v3434_v52 = vmul.f32 0.00390625, %v3428_v8  ;;  %3453 = vadd.xlane.f32.xlu0 %v3452_v27  ;;  %v3455_v24 = vadd.f32 %v3447_v51, %v3446_v23  ;;  %4025 = vmatprep.subr.bf16.mxu1 %v5039_v6 }
 0xd62   :  { %v3431_v1 = vpop.xlane.xlu1 %3430 }
 0xd63   :  { %v6203_v21 = vsub.f32 %v6167_v35, %v3434_v52  ;;  %v6206_v3 = vsub.f32 %v6170_v13, %v3434_v52  ;;  %v3435_v17 = vmul.f32 0.00390625, %v3431_v1  ;;  %3456 = vadd.xlane.f32.xlu1 %v3455_v24  ;;  %v4986_v35 = vld [vmem:[#allocation17 + $0xc0] ss:$8 sps:$4 sm:$0xff]  }
 0xd64   :  { %3755 = vmatpush1.bf16.msra.mxu0 %v4986_v35  ;;  %v4992_v13 = vld [vmem:[#allocation17 + $0xe0] ss:$8 sps:$4 sm:$0xff]   ;;  %4026 = vmatpush1.bf16.msra.mxu1 %v5037_v16 }
 0xd65   :  { %v6209_v5 = vsub.f32 %v6173_v18, %v3435_v17  ;;  %v6212_v25 = vsub.f32 %v6176_v61, %v3435_v17  ;;  %v3448_v19 = vmul.f32 %v6203_v21, %v6203_v21  ;;  %v3449_v28 = vmul.f32 %v6206_v3, %v6206_v3  ;;  %3756 = vmatprep.subr.bf16.mxu0 %v4991_v7  ;;  %v4997_v18 = vld [vmem:[#allocation17 + $0xf4] ss:$8 sps:$4 sm:$0xff]   ;;  %v4995_v61 = vld [vmem:[#allocation17 + $0xf0] ss:$8 sps:$4 sm:$0xff]  }
 0xd67   :  { %v3458_v10 = vadd.f32 %v3449_v28, %v3448_v19  ;;  %v3450_v11 = vmul.f32 %v6209_v5, %v6209_v5  ;;  %v3451_v30 = vmul.f32 %v6212_v25, %v6212_v25 }
 0xd68   :  { %3757 = vmatpush1.bf16.msra.mxu0 %v4989_v36 }
 0xd69   :  { %3459 = vadd.xlane.f32.xlu0 %v3458_v10  ;;  %v3461_v56 = vadd.f32 %v3451_v30, %v3450_v11  ;;  %3758 = vmatprep.subr.bf16.mxu0 %v4994_v37  ;;  %v3418_v11 = vld [vmem:[%s6346_s6] sm:$0x3] }
 0xd6a   :  { %v3488_v31 = vrot.slane %v3418_v11, %v5788_v60  ;;  %v3492_v44 = vrot.slane %v3418_v11, %v5785_v59 }
 0xd6b   :  { %3462 = vadd.xlane.f32.xlu1 %v3461_v56  ;;  %v3419_v56 = vld [vmem:[%s6304_s7] sm:$0x3] }
 0xd6c   :  { %3759 = vmatpush1.bf16.msra.mxu0 %v4992_v13  ;;  %v3507_v7 = vrot.slane %v3419_v56, %v5788_v60  ;;  %v3511_v36 = vrot.slane %v3419_v56, %v5785_v59 }
 0xd6d   :  { %3760 = vmatprep.subr.bf16.mxu0 %v4997_v18 }
 0xd70   :  { %3761 = vmatpush1.bf16.msra.mxu0 %v4995_v61 }
 0xdee   :  { %v3454_v27 = vpop.xlane.xlu0 %3453 }
 0xdef   :  { %v3464_v23 = vmul.f32 0.00390625, %v3454_v27 }
 0xdf0   :  { %v3457_v51 = vpop.xlane.xlu1 %3456 }
 0xdf1   :  { %v3468_v8 = vadd.f32 1e-05, %v3464_v23  ;;  %v3465_v52 = vmul.f32 0.00390625, %v3457_v51 }
 0xdf3   :  { %5126 = vrsqrt.f32 %v3468_v8  ;;  %v3469_v24 = vadd.f32 1e-05, %v3465_v52 }
 0xdf5   :  { %5128 = vrsqrt.f32 %v3469_v24 }
 0xdf6   :  { %v3460_v1 = vpop.xlane.xlu0 %3459 }
 0xdf7   :  { %v3466_v17 = vmul.f32 0.00390625, %v3460_v1 }
 0xdf8   :  { %v3463_v19 = vpop.xlane.xlu1 %3462 }
 0xdf9   :  { %v3470_v28 = vadd.f32 1e-05, %v3466_v17  ;;  %v3467_v10 = vmul.f32 0.00390625, %v3463_v19 }
 0xdfb   :  { %5130 = vrsqrt.f32 %v3470_v28  ;;  %v3471_v30 = vadd.f32 1e-05, %v3467_v10 }
 0xdfd   :  { %v5127_v43 = vpop.eup %5126  ;;  %5132 = vrsqrt.f32 %v3471_v30 }
 0xdfe   :  { %v3476_v32 = vmul.f32 %v5127_v43, %v6183_v12  ;;  %v3477_v14 = vmul.f32 %v5127_v43, %v6186_v22 }
 0xdff   :  { %v5129_v35 = vpop.eup %5128 }
 0xe00   :  { %v3478_v13 = vmul.f32 %v5129_v35, %v6189_v33  ;;  %v3479_v37 = vmul.f32 %v5129_v35, %v6192_v34  ;;  %v3496_v18 = vmul.f32 %v3492_v44, %v3477_v14  ;;  %v3495_v61 = vmul.f32 %v3488_v31, %v3476_v32 }
 0xe02   :  { %v3498_v38 = vmul.f32 %v3492_v44, %v3479_v37  ;;  %v3497_v4 = vmul.f32 %v3488_v31, %v3478_v13  ;;  %v6236_v39 = vadd.f32 %v3511_v36, %v3496_v18  ;;  %v6240_v12 = vadd.f32 %v3507_v7, %v3495_v61  ;;  %v3827_v37 = vld [vmem:[%s6347_s25] sm:$0x3] }
 0xe03   :  { %v3832_v18 = vrot.slane %v3827_v37, %v5788_v60  ;;  %v3836_v61 = vrot.slane %v3827_v37, %v5785_v59 }
 0xe04   :  { %v6238_v2 = vadd.f32 %v3511_v36, %v3498_v38  ;;  %v6242_v22 = vadd.f32 %v3507_v7, %v3497_v4 }
 0xe05   :  { %v5131_v40 = vpop.eup %5130 }
 0xe06   :  { %v3555_v41 = vpack.c.bf16 %v6238_v2, %v6236_v39  ;;  %v3554_v33 = vpack.c.bf16 %v6242_v22, %v6240_v12  ;;  %v3481_v34 = vmul.f32 %v5131_v40, %v6206_v3  ;;  %v3480_v54 = vmul.f32 %v5131_v40, %v6203_v21 }
 0xe07   :  { %v5133_v42 = vpop.eup %5132 }
 0xe08   :  { %3762 = vmatprep.mubr.bf16.mxu0 %v3555_v41  ;;  %v3483_v15 = vmul.f32 %v5133_v42, %v6212_v25  ;;  %v3500_v45 = vmul.f32 %v3492_v44, %v3481_v34  ;;  %v3482_v26 = vmul.f32 %v5133_v42, %v6209_v5  ;;  %v3499_v46 = vmul.f32 %v3488_v31, %v3480_v54  ;;  %v5042_v5 = vld [vmem:[#allocation19 + $0xe4] ss:$8 sps:$4 sm:$0xff]  }
 0xe09   :  { %3763 = vmatmul.mubr.bf16.vlgmr.msra.gmra.mrb[64].mxu0 %v3554_v33  ;;  %4027 = vmatprep.subr.bf16.mxu1 %v5042_v5 }
 0xe0a   :  { %v3502_v47 = vmul.f32 %v3492_v44, %v3483_v15  ;;  %v3501_v9 = vmul.f32 %v3488_v31, %v3482_v26  ;;  %v6252_v55 = vadd.f32 %v3511_v36, %v3500_v45  ;;  %v6256_v53 = vadd.f32 %v3507_v7, %v3499_v46  ;;  %4028 = vmatpush1.bf16.msra.mxu1 %v5040_v49 }
 0xe0b   :  { %4029 = vmatprep.subr.bf16.mxu1 %v5045_v29 }
 0xe0c   :  { %v6254_v48 = vadd.f32 %v3511_v36, %v3502_v47  ;;  %v6258_v3 = vadd.f32 %v3507_v7, %v3501_v9 }
 0xe0e   :  { %v3557_v21 = vpack.c.bf16 %v6254_v48, %v6252_v55  ;;  %v3556_v25 = vpack.c.bf16 %v6258_v3, %v6256_v53  ;;  %4030 = vmatpush1.bf16.msra.mxu1 %v5043_v50 }
 0xe10   :  { %3772 = vmatprep.mubr.bf16.mxu0 %v3557_v21 }
 0xe11   :  { %3773 = vmatmul.mubr.bf16.gmra.mrb[68].mxu0 %v3556_v25 }
 0xedc   :  { %v3764_v63 = vpop.f32.mrb[64].mxu0 }
 0xedd   :  { %v3765_v0 = vadd.f32 %v3764_v63, %v3563_v58  ;;  %v3766_v20 = vpop.f32.mrb[65].mxu0 }
 0xede   :  { %v3767_v6 = vadd.f32 %v3766_v20, %v3567_v62  ;;  %v3768_v16 = vpop.f32.mrb[66].mxu0 }
 0xedf   :  { %v3769_v27 = vadd.f32 %v3768_v16, %v3563_v58  ;;  %v3770_v23 = vpop.f32.mrb[67].mxu0  ;;  %v3783_v8 = vmax.f32 %v3765_v0, 0.0 }
 0xee0   :  { %v3771_v51 = vadd.f32 %v3770_v23, %v3567_v62  ;;  %v3784_v24 = vmax.f32 %v3767_v6, 0.0 }
 0xee1   :  { %v3785_v52 = vmax.f32 %v3769_v27, 0.0 }
 0xee2   :  { %v3786_v1 = vmax.f32 %v3771_v51, 0.0 }
 0xee3   :  { %v3823_v17 = vpack.c.bf16 %v3785_v52, %v3783_v8 }
 0xee4   :  { %v3824_v19 = vpack.c.bf16 %v3786_v1, %v3784_v24  ;;  %v3774_v28 = vpop.f32.mrb[68].mxu0 }
 0xee5   :  { %v3775_v10 = vadd.f32 %v3774_v28, %v3563_v58  ;;  %v3776_v11 = vpop.f32.mrb[69].mxu0 }
 0xee6   :  { %v3777_v30 = vadd.f32 %v3776_v11, %v3567_v62  ;;  %v3778_v56 = vpop.f32.mrb[70].mxu0  ;;  %4031 = vmatprep.mubr.bf16.mxu1 %v3824_v19 }
 0xee7   :  { %v3779_v31 = vadd.f32 %v3778_v56, %v3563_v58  ;;  %v3780_v44 = vpop.f32.mrb[71].mxu0  ;;  %4032 = vmatmul.mubr.bf16.vlgmr.msra.gmra.mrb[64].mxu1 %v3823_v17  ;;  %v3787_v32 = vmax.f32 %v3775_v10, 0.0 }
 0xee8   :  { %v3781_v43 = vadd.f32 %v3780_v44, %v3567_v62  ;;  %v3788_v35 = vmax.f32 %v3777_v30, 0.0 }
 0xee9   :  { %v3789_v14 = vmax.f32 %v3779_v31, 0.0 }
 0xeea   :  { %v3790_v7 = vmax.f32 %v3781_v43, 0.0 }
 0xeeb   :  { %v3825_v36 = vpack.c.bf16 %v3789_v14, %v3787_v32 }
 0xeec   :  { %v3826_v13 = vpack.c.bf16 %v3790_v7, %v3788_v35 }
 0xeee   :  { %4041 = vmatprep.mubr.bf16.mxu1 %v3826_v13 }
 0xeef   :  { %4042 = vmatmul.mubr.bf16.gmra.mrb[68].mxu1 %v3825_v36 }
 0xfba   :  { %v4033_v38 = vpop.f32.mrb[64].mxu1 }
 0xfbb   :  { %v4034_v4 = vadd.f32 %v4033_v38, %v3832_v18  ;;  %v4035_v40 = vpop.f32.mrb[65].mxu1 }
 0xfbc   :  { %v4036_v41 = vadd.f32 %v4035_v40, %v3836_v61  ;;  %v4037_v33 = vpop.f32.mrb[66].mxu1 }
 0xfbd   :  { %v4052_v34 = vadd.f32 %v4034_v4, %v6240_v12  ;;  %v4038_v54 = vadd.f32 %v4037_v33, %v3832_v18  ;;  %v4039_v42 = vpop.f32.mrb[67].mxu1 }
 0xfbe   :  { %v4053_v15 = vadd.f32 %v4036_v41, %v6236_v39  ;;  %v4040_v45 = vadd.f32 %v4039_v42, %v3836_v61 }
 0xfbf   :  { %4060 = vst [vmem:[#allocation20] sm:$0xff] %v4052_v34  ;;  %v4054_v26 = vadd.f32 %v4038_v54, %v6242_v22 }
 0xfc0   :  { %4061 = vst [vmem:[#allocation20 + $0x8] sm:$0xff] %v4053_v15  ;;  %v4055_v60 = vadd.f32 %v4040_v45, %v6238_v2 }
 0xfc1   :  { %4062 = vst [vmem:[#allocation20 + $0x10] sm:$0xff] %v4054_v26 }
 0xfc2   :  { %4063 = vst [vmem:[#allocation20 + $0x18] sm:$0xff] %v4055_v60  ;;  %v4043_v59 = vpop.f32.mrb[68].mxu1 }
 0xfc3   :  { %v4044_v46 = vadd.f32 %v4043_v59, %v3832_v18  ;;  %v4045_v47 = vpop.f32.mrb[69].mxu1 }
 0xfc4   :  { %v4046_v9 = vadd.f32 %v4045_v47, %v3836_v61  ;;  %v4047_v21 = vpop.f32.mrb[70].mxu1 }
 0xfc5   :  { %v4056_v12 = vadd.f32 %v4044_v46, %v6256_v53  ;;  %v4048_v25 = vadd.f32 %v4047_v21, %v3832_v18  ;;  %v4049_v5 = vpop.f32.mrb[71].mxu1 }
 0xfc6   :  { %v4057_v39 = vadd.f32 %v4046_v9, %v6252_v55  ;;  %v4050_v49 = vadd.f32 %v4049_v5, %v3836_v61 }
 0xfc7   :  { %4064 = vst [vmem:[#allocation20 + $0x20] sm:$0xff] %v4056_v12  ;;  %v4058_v22 = vadd.f32 %v4048_v25, %v6258_v3 }
 0xfc8   :  { %4065 = vst [vmem:[#allocation20 + $0x28] sm:$0xff] %v4057_v39  ;;  %v4059_v2 = vadd.f32 %v4050_v49, %v6254_v48 }
 0xfc9   :  { %4066 = vst [vmem:[#allocation20 + $0x30] sm:$0xff] %v4058_v22 }
 0xfca   :  { %4067 = vst [vmem:[#allocation20 + $0x38] sm:$0xff] %v4059_v2 }
 0xfcb   :  { %5395 = shalt.err (!%p5392_p8)
}
 0xfcc   :  { %s6348_s9 = sld [smem:[#allocation36_spill]] }
 0xfd2   :  { %s5396_s1 = scalar_lea.hbm %s6348_s9, 1024 }
 0xfd3   :  { %p5397_p9 = scmp.ne.s32.totalorder %s6348_s9, %s5396_s1  ;;  %p5400_p10 = scmp.lt.u32.totalorder %s5396_s1, %s6348_s9 }
 0xfd5   :  { %p5402_p11 = pnand %p5400_p10, %p5397_p9 }
 0xfd7   :  { %5405 = shalt.err (!%p5402_p11)
}
 0xfd8   :  { %4079 = dma.vmem_to_hbm [thread:$0]  %s4074_s16, 1024, %s6348_s9, [#allocation4], %s6341_s28, %s6341_s28, %s6340_s29  }
 0xfd9   :  { %5418 = dma.done.wait [#allocation4], 1024  }
 0xfda   :  { %5419 = vsyncadd [#allocation4], 4294966272 }
 0xfdb   :  { %4083 = vsyncpa [#allocation3], 1 }
 0xfdc   :  { %4084 = vsyncpa [#allocation6], 1 }
 0xfdd   :  { %4085 = vsyncpa [#allocation9], 1 }
 0xfde   :  { %4086 = vsyncpa [#allocation12], 1 }
 0xfdf   :  { %4087 = vsyncpa [#allocation15], 1 }
 0xfe0   :  { %4088 = vsyncpa [#allocation18], 1 }
 0xfe1   :  { %4089 = vsyncpa [#allocation4], 1 }

</bundles_post_ra>
